<compile_context>
chip_gen: v7x
topology: tpu7x:2x2x1
jax: 0.10.0
libtpu: 0.0.40
codegen_flags: <defaults>
</compile_context>

<pallas_src>
import functools

import numpy as np
import jax
import jax.numpy as jnp
from jax.experimental import pallas as pl
from jax.experimental.pallas import tpu as pltpu


def _round_up(x, m):
    return ((x + m - 1) // m) * m


def cnn_clf_kernel(x_ref, wt_ref, bconv_ref, pmask_ref, wfc_ref, bfc_ref,
                   out_ref, win_ref, *, bt, k_used, k_pad, lp):
    """Fused 3-branch conv (one MXU matmul) + tanh -> masked max-pool -> FC -> softmax.

    x_ref    : (bt, L_pad)      bf16  flat embeddings (zero padded)
    wt_ref   : (Cp, K_pad)      bf16  fused, transposed conv weights (zero padded)
    bconv_ref: (Cp, 1)          f32   fused conv bias
    pmask_ref: (Cp, Lp)         f32   0 for valid (channel, position), -4 otherwise
    wfc_ref  : (Cp, Op)         f32   padded FC weight
    bfc_ref  : (1, Op)          f32   FC bias; padded columns hold -1e30
    out_ref  : (bt, Op)         f32   softmax probabilities (padded cols ~ 0)
    win_ref  : (K_pad, bt*Lp)   bf16  scratch: in-kernel sliding windows
    """
    # 0) Zero any padded contraction rows once (garbage * 0 could be NaN).
    if k_pad > k_used:
        win_ref[pl.ds(k_used, k_pad - k_used), :] = jnp.zeros(
            (k_pad - k_used, win_ref.shape[1]), win_ref.dtype)

    # 1) In-kernel im2col: row k of the window buffer is x shifted left by k.
    #    win[k, b*Lp + j] = x[b, j + k]; all stores are lane-aligned single rows.
    for b in range(bt):
        for k in range(k_used):
            win_ref[pl.ds(k, 1), pl.ds(b * lp, lp)] = \
                x_ref[pl.ds(b, 1), pl.ds(k, lp)]

    # 2) All three conv branches in one MXU matmul, f32 accumulation.
    #    Branch i's weight rows are zero for k >= K_i, so the shared "prefix"
    #    window buffer yields exactly Conv1d(1, C, K_i) for each branch.
    h = jnp.dot(wt_ref[...], win_ref[...],
                preferred_element_type=jnp.float32)        # (Cp, bt*Lp)
    h = jnp.tanh(h + bconv_ref[...])

    # 3) Masked global max-pool per batch row (lane-aligned slices; mask added
    #    after tanh so padded positions (<= -3) can never win against tanh>=-1).
    pmask = pmask_ref[...]
    cols = []
    for b in range(bt):
        hb = h[:, b * lp:(b + 1) * lp] + pmask
        cols.append(jnp.max(hb, axis=1, keepdims=True))     # (Cp, 1)
    pooled_t = cols[0] if bt == 1 else jnp.concatenate(cols, axis=1)  # (Cp, bt)

    # 4) concat + Linear + softmax, lane-dense (bt, Op) output.
    pooled = pooled_t.T                                      # (bt, Cp)
    logits = jnp.dot(pooled, wfc_ref[...],
                     preferred_element_type=jnp.float32) + bfc_ref[...]
    m = jnp.max(logits, axis=1, keepdims=True)
    e = jnp.exp(logits - m)                                  # padded cols -> exp(-1e30) == 0
    out_ref[...] = (e / jnp.sum(e, axis=1, keepdims=True)).astype(out_ref.dtype)


def cnn_clf_forward(token_ids, params, *, embed_size, filter_sizes, out_chs,
                    output_size):
    """JAX wrapper: embedding gather (glue) + padded flat input, then one pallas_call."""
    B, seq_len = token_ids.shape
    E = embed_size
    L = seq_len * E
    nb = len(filter_sizes)
    C = out_chs

    Ks = [E * fs for fs in filter_sizes]
    L_outs = [L - K + 1 for K in Ks]
    assert min(L_outs) >= 1, "filter longer than flattened input"
    K_max = max(Ks)
    K_pad = _round_up(K_max, 16)                 # bf16 sublane-pair alignment
    Lp = _round_up(max(L_outs), 128)             # lane-dense position axis
    L_pad = _round_up(Lp + K_max - 1, 128)       # covers all in-kernel window loads (>= L)

    # Batch tiling: sublane-clean blocks; bt == B for tiny batches (block == full).
    if B >= 8:
        bt = 8
        B_pad = _round_up(B, bt)
    else:
        bt, B_pad = B, B
    grid = (B_pad // bt,)

    C_tot = nb * C
    Cp = _round_up(C_tot, 16)
    Op = _round_up(output_size, 128)             # lane-dense output block

    # --- glue in XLA: nn.Embedding lookup + reshape(batch, 1, -1) ---
    flat = params["embedding"][token_ids].reshape(B, L)
    x = jnp.zeros((B_pad, L_pad), jnp.bfloat16)
    x = x.at[:B, :L].set(flat.astype(jnp.bfloat16))

    # --- fused / padded parameters (would normally be prepared once) ---
    wt = jnp.zeros((Cp, K_pad), jnp.float32)
    bconv = jnp.zeros((Cp, 1), jnp.float32)
    pmask = jnp.zeros((Cp, Lp), jnp.float32)
    for i in range(nb):
        r0 = i * C
        wt = wt.at[r0:r0 + C, :Ks[i]].set(params["w_conv"][i].T)    # (C, K_i)
        bconv = bconv.at[r0:r0 + C, 0].set(params["b_conv"][i].reshape(-1))
        pmask = pmask.at[r0:r0 + C, L_outs[i]:].set(-4.0)
    wt = wt.astype(jnp.bfloat16)

    wfc = jnp.zeros((Cp, Op), jnp.float32)
    wfc = wfc.at[:C_tot, :output_size].set(params["w_fc"])
    bfc = jnp.full((1, Op), -1e30, jnp.float32)   # padded logits never survive softmax
    bfc = bfc.at[0, :output_size].set(params["b_fc"].reshape(-1))

    kernel = functools.partial(cnn_clf_kernel, bt=bt, k_used=K_max,
                               k_pad=K_pad, lp=Lp)

    out = pl.pallas_call(
        kernel,
        out_shape=jax.ShapeDtypeStruct((B_pad, Op), jnp.float32),
        grid=grid,
        in_specs=[
            pl.BlockSpec((bt, L_pad), lambda g: (g, 0)),   # batch-tiled flat x
            pl.BlockSpec((Cp, K_pad), lambda g: (0, 0)),   # fused conv weight (resident)
            pl.BlockSpec((Cp, 1), lambda g: (0, 0)),       # conv bias
            pl.BlockSpec((Cp, Lp), lambda g: (0, 0)),      # pool mask
            pl.BlockSpec((Cp, Op), lambda g: (0, 0)),      # FC weight
            pl.BlockSpec((1, Op), lambda g: (0, 0)),       # FC bias + column mask
        ],
        out_specs=pl.BlockSpec((bt, Op), lambda g: (g, 0)),
        scratch_shapes=[pltpu.VMEM((K_pad, bt * Lp), jnp.bfloat16)],
        compiler_params=pltpu.CompilerParams(
            dimension_semantics=("parallel",)),
    )(x, wt, bconv, pmask, wfc, bfc)

    return out[:B, :output_size]


def init_params(key, vocab_size, embed_size, out_chs, output_size, filter_sizes):
    keys = jax.random.split(key, 3 + 2 * len(filter_sizes))
    embedding = jax.random.normal(keys[0], (vocab_size, embed_size), jnp.float32)

    w_conv, b_conv = [], []
    for i, fs in enumerate(filter_sizes):
        K = embed_size * fs
        scale = 1.0 / np.sqrt(K)
        w = jax.random.normal(keys[1 + i], (K, out_chs), jnp.float32) * scale
        b = jax.random.normal(keys[1 + len(filter_sizes) + i], (1, out_chs),
                              jnp.float32) * scale
        w_conv.append(w)
        b_conv.append(b)

    in_feat = out_chs * len(filter_sizes)
    fc_scale = 1.0 / np.sqrt(in_feat)
    w_fc = jax.random.normal(keys[-2], (in_feat, output_size), jnp.float32) * fc_scale
    b_fc = jax.random.normal(keys[-1], (1, output_size), jnp.float32) * fc_scale
    return dict(embedding=embedding, w_conv=w_conv, b_conv=b_conv,
                w_fc=w_fc, b_fc=b_fc)


def reference_forward(token_ids, params, embed_size, filter_sizes):
    """Pure-JAX f32 reference matching the PyTorch forward (eval-mode dropout)."""
    B = token_ids.shape[0]
    flat = params["embedding"][token_ids].reshape(B, -1).astype(jnp.float32)
    pooled = []
    for i, fs in enumerate(filter_sizes):
        K = embed_size * fs
        L_out = flat.shape[1] - K + 1
        idx = jnp.arange(L_out)[:, None] + jnp.arange(K)[None, :]
        h = jnp.tanh(flat[:, idx] @ params["w_conv"][i] + params["b_conv"][i])
        pooled.append(jnp.max(h, axis=1))            # (B, out_chs)
    feat = jnp.concatenate(pooled, axis=1)
    logits = feat @ params["w_fc"] + params["b_fc"]
    return jax.nn.softmax(logits, axis=1)


if __name__ == "__main__":
    # Small shapes consistent with the module's forward pass.
    vocab_size, embed_size, output_size = 50, 16, 2
    out_chs = 8
    filter_sizes = (2, 3, 4)
    batch, seq_len = 2, 8

    key = jax.random.PRNGKey(0)
    k_params, k_tokens = jax.random.split(key)
    params = init_params(k_params, vocab_size, embed_size, out_chs, output_size,
                         filter_sizes)
    token_ids = jax.random.randint(k_tokens, (batch, seq_len), 0, vocab_size,
                                   dtype=jnp.int32)

    out = cnn_clf_forward(token_ids, params, embed_size=embed_size,
                          filter_sizes=filter_sizes, out_chs=out_chs,
                          output_size=output_size)
    out = jax.block_until_ready(out)

    ref = reference_forward(token_ids, params, embed_size, filter_sizes)
    assert out.shape == (batch, output_size)
    # bf16 conv inputs/weights vs. the pure-f32 reference.
    assert np.allclose(np.asarray(out), np.asarray(ref), atol=2e-2), (out, ref)
    # Exact softmax division: rows are valid distributions.
    assert np.allclose(np.asarray(out).sum(axis=1), 1.0, atol=1e-4)
    print("KERNEL_OK")
</pallas_src>

<mosaic_0001>
module attributes {stable_mosaic.version = 11 : i64} {
  func.func @cnn_clf_kernel(%arg0: i32, %arg1: memref<2x256xbf16, #tpu.memory_space<vmem>>, %arg2: memref<32x64xbf16, #tpu.memory_space<vmem>>, %arg3: memref<32x1xf32, #tpu.memory_space<vmem>>, %arg4: memref<32x128xf32, #tpu.memory_space<vmem>>, %arg5: memref<32x128xf32, #tpu.memory_space<vmem>>, %arg6: memref<1x128xf32, #tpu.memory_space<vmem>>, %arg7: memref<2x128xf32, #tpu.memory_space<vmem>>, %arg8: memref<64x256xbf16, #tpu.memory_space<vmem>>) attributes {dimension_semantics = [#tpu.dimension_semantics<parallel>], iteration_bounds = array<i64: 1>, scalar_prefetch = 0 : i64, scratch_operands = 1 : i64, tpu.core_type = #tpu.core_type<tc>, window_params = [{transform_indices = @transform_0, window_bounds = array<i64: 2, 256>}, {pipeline_mode = #tpu.pipeline_mode<synchronous>, transform_indices = @transform_1, window_bounds = array<i64: 32, 64>}, {pipeline_mode = #tpu.pipeline_mode<synchronous>, transform_indices = @transform_2, window_bounds = array<i64: 32, 1>}, {pipeline_mode = #tpu.pipeline_mode<synchronous>, transform_indices = @transform_3, window_bounds = array<i64: 32, 128>}, {pipeline_mode = #tpu.pipeline_mode<synchronous>, transform_indices = @transform_4, window_bounds = array<i64: 32, 128>}, {pipeline_mode = #tpu.pipeline_mode<synchronous>, transform_indices = @transform_5, window_bounds = array<i64: 1, 128>}, {transform_indices = @transform_6, window_bounds = array<i64: 2, 128>}]} {
    %c0 = arith.constant 0 : index
    %c0_0 = arith.constant 0 : index
    %0 = vector.load %arg1[%c0, %c0_0] : memref<2x256xbf16, #tpu.memory_space<vmem>>, vector<1x128xbf16>
    %c0_1 = arith.constant 0 : index
    %c0_2 = arith.constant 0 : index
    %1 = vector.load %arg8[%c0_1, %c0_2] : memref<64x256xbf16, #tpu.memory_space<vmem>>, vector<1x128xbf16>
    tpu.vector_store %arg8[%c0_1, %c0_2], %0 {strides = array<i32>} : memref<64x256xbf16, #tpu.memory_space<vmem>>, vector<1x128xbf16>,
    %c0_3 = arith.constant 0 : index
    %c1 = arith.constant 1 : index
    %2 = vector.load %arg1[%c0_3, %c1] : memref<2x256xbf16, #tpu.memory_space<vmem>>, vector<1x128xbf16>
    %c1_4 = arith.constant 1 : index
    %c0_5 = arith.constant 0 : index
    %3 = vector.load %arg8[%c1_4, %c0_5] : memref<64x256xbf16, #tpu.memory_space<vmem>>, vector<1x128xbf16>
    tpu.vector_store %arg8[%c1_4, %c0_5], %2 {strides = array<i32>} : memref<64x256xbf16, #tpu.memory_space<vmem>>, vector<1x128xbf16>,
    %c0_6 = arith.constant 0 : index
    %c2 = arith.constant 2 : index
    %4 = vector.load %arg1[%c0_6, %c2] : memref<2x256xbf16, #tpu.memory_space<vmem>>, vector<1x128xbf16>
    %c2_7 = arith.constant 2 : index
    %c0_8 = arith.constant 0 : index
    %5 = vector.load %arg8[%c2_7, %c0_8] : memref<64x256xbf16, #tpu.memory_space<vmem>>, vector<1x128xbf16>
    tpu.vector_store %arg8[%c2_7, %c0_8], %4 {strides = array<i32>} : memref<64x256xbf16, #tpu.memory_space<vmem>>, vector<1x128xbf16>,
    %c0_9 = arith.constant 0 : index
    %c3 = arith.constant 3 : index
    %6 = vector.load %arg1[%c0_9, %c3] : memref<2x256xbf16, #tpu.memory_space<vmem>>, vector<1x128xbf16>
    %c3_10 = arith.constant 3 : index
    %c0_11 = arith.constant 0 : index
    %7 = vector.load %arg8[%c3_10, %c0_11] : memref<64x256xbf16, #tpu.memory_space<vmem>>, vector<1x128xbf16>
    tpu.vector_store %arg8[%c3_10, %c0_11], %6 {strides = array<i32>} : memref<64x256xbf16, #tpu.memory_space<vmem>>, vector<1x128xbf16>,
    %c0_12 = arith.constant 0 : index
    %c4 = arith.constant 4 : index
    %8 = vector.load %arg1[%c0_12, %c4] : memref<2x256xbf16, #tpu.memory_space<vmem>>, vector<1x128xbf16>
    %c4_13 = arith.constant 4 : index
    %c0_14 = arith.constant 0 : index
    %9 = vector.load %arg8[%c4_13, %c0_14] : memref<64x256xbf16, #tpu.memory_space<vmem>>, vector<1x128xbf16>
    tpu.vector_store %arg8[%c4_13, %c0_14], %8 {strides = array<i32>} : memref<64x256xbf16, #tpu.memory_space<vmem>>, vector<1x128xbf16>,
    %c0_15 = arith.constant 0 : index
    %c5 = arith.constant 5 : index
    %10 = vector.load %arg1[%c0_15, %c5] : memref<2x256xbf16, #tpu.memory_space<vmem>>, vector<1x128xbf16>
    %c5_16 = arith.constant 5 : index
    %c0_17 = arith.constant 0 : index
    %11 = vector.load %arg8[%c5_16, %c0_17] : memref<64x256xbf16, #tpu.memory_space<vmem>>, vector<1x128xbf16>
    tpu.vector_store %arg8[%c5_16, %c0_17], %10 {strides = array<i32>} : memref<64x256xbf16, #tpu.memory_space<vmem>>, vector<1x128xbf16>,
    %c0_18 = arith.constant 0 : index
    %c6 = arith.constant 6 : index
    %12 = vector.load %arg1[%c0_18, %c6] : memref<2x256xbf16, #tpu.memory_space<vmem>>, vector<1x128xbf16>
    %c6_19 = arith.constant 6 : index
    %c0_20 = arith.constant 0 : index
    %13 = vector.load %arg8[%c6_19, %c0_20] : memref<64x256xbf16, #tpu.memory_space<vmem>>, vector<1x128xbf16>
    tpu.vector_store %arg8[%c6_19, %c0_20], %12 {strides = array<i32>} : memref<64x256xbf16, #tpu.memory_space<vmem>>, vector<1x128xbf16>,
    %c0_21 = arith.constant 0 : index
    %c7 = arith.constant 7 : index
    %14 = vector.load %arg1[%c0_21, %c7] : memref<2x256xbf16, #tpu.memory_space<vmem>>, vector<1x128xbf16>
    %c7_22 = arith.constant 7 : index
    %c0_23 = arith.constant 0 : index
    %15 = vector.load %arg8[%c7_22, %c0_23] : memref<64x256xbf16, #tpu.memory_space<vmem>>, vector<1x128xbf16>
    tpu.vector_store %arg8[%c7_22, %c0_23], %14 {strides = array<i32>} : memref<64x256xbf16, #tpu.memory_space<vmem>>, vector<1x128xbf16>,
    %c0_24 = arith.constant 0 : index
    %c8 = arith.constant 8 : index
    %16 = vector.load %arg1[%c0_24, %c8] : memref<2x256xbf16, #tpu.memory_space<vmem>>, vector<1x128xbf16>
    %c8_25 = arith.constant 8 : index
    %c0_26 = arith.constant 0 : index
    %17 = vector.load %arg8[%c8_25, %c0_26] : memref<64x256xbf16, #tpu.memory_space<vmem>>, vector<1x128xbf16>
    tpu.vector_store %arg8[%c8_25, %c0_26], %16 {strides = array<i32>} : memref<64x256xbf16, #tpu.memory_space<vmem>>, vector<1x128xbf16>,
    %c0_27 = arith.constant 0 : index
    %c9 = arith.constant 9 : index
    %18 = vector.load %arg1[%c0_27, %c9] : memref<2x256xbf16, #tpu.memory_space<vmem>>, vector<1x128xbf16>
    %c9_28 = arith.constant 9 : index
    %c0_29 = arith.constant 0 : index
    %19 = vector.load %arg8[%c9_28, %c0_29] : memref<64x256xbf16, #tpu.memory_space<vmem>>, vector<1x128xbf16>
    tpu.vector_store %arg8[%c9_28, %c0_29], %18 {strides = array<i32>} : memref<64x256xbf16, #tpu.memory_space<vmem>>, vector<1x128xbf16>,
    %c0_30 = arith.constant 0 : index
    %c10 = arith.constant 10 : index
    %20 = vector.load %arg1[%c0_30, %c10] : memref<2x256xbf16, #tpu.memory_space<vmem>>, vector<1x128xbf16>
    %c10_31 = arith.constant 10 : index
    %c0_32 = arith.constant 0 : index
    %21 = vector.load %arg8[%c10_31, %c0_32] : memref<64x256xbf16, #tpu.memory_space<vmem>>, vector<1x128xbf16>
    tpu.vector_store %arg8[%c10_31, %c0_32], %20 {strides = array<i32>} : memref<64x256xbf16, #tpu.memory_space<vmem>>, vector<1x128xbf16>,
    %c0_33 = arith.constant 0 : index
    %c11 = arith.constant 11 : index
    %22 = vector.load %arg1[%c0_33, %c11] : memref<2x256xbf16, #tpu.memory_space<vmem>>, vector<1x128xbf16>
    %c11_34 = arith.constant 11 : index
    %c0_35 = arith.constant 0 : index
    %23 = vector.load %arg8[%c11_34, %c0_35] : memref<64x256xbf16, #tpu.memory_space<vmem>>, vector<1x128xbf16>
    tpu.vector_store %arg8[%c11_34, %c0_35], %22 {strides = array<i32>} : memref<64x256xbf16, #tpu.memory_space<vmem>>, vector<1x128xbf16>,
    %c0_36 = arith.constant 0 : index
    %c12 = arith.constant 12 : index
    %24 = vector.load %arg1[%c0_36, %c12] : memref<2x256xbf16, #tpu.memory_space<vmem>>, vector<1x128xbf16>
    %c12_37 = arith.constant 12 : index
    %c0_38 = arith.constant 0 : index
    %25 = vector.load %arg8[%c12_37, %c0_38] : memref<64x256xbf16, #tpu.memory_space<vmem>>, vector<1x128xbf16>
    tpu.vector_store %arg8[%c12_37, %c0_38], %24 {strides = array<i32>} : memref<64x256xbf16, #tpu.memory_space<vmem>>, vector<1x128xbf16>,
    %c0_39 = arith.constant 0 : index
    %c13 = arith.constant 13 : index
    %26 = vector.load %arg1[%c0_39, %c13] : memref<2x256xbf16, #tpu.memory_space<vmem>>, vector<1x128xbf16>
    %c13_40 = arith.constant 13 : index
    %c0_41 = arith.constant 0 : index
    %27 = vector.load %arg8[%c13_40, %c0_41] : memref<64x256xbf16, #tpu.memory_space<vmem>>, vector<1x128xbf16>
    tpu.vector_store %arg8[%c13_40, %c0_41], %26 {strides = array<i32>} : memref<64x256xbf16, #tpu.memory_space<vmem>>, vector<1x128xbf16>,
    %c0_42 = arith.constant 0 : index
    %c14 = arith.constant 14 : index
    %28 = vector.load %arg1[%c0_42, %c14] : memref<2x256xbf16, #tpu.memory_space<vmem>>, vector<1x128xbf16>
    %c14_43 = arith.constant 14 : index
    %c0_44 = arith.constant 0 : index
    %29 = vector.load %arg8[%c14_43, %c0_44] : memref<64x256xbf16, #tpu.memory_space<vmem>>, vector<1x128xbf16>
    tpu.vector_store %arg8[%c14_43, %c0_44], %28 {strides = array<i32>} : memref<64x256xbf16, #tpu.memory_space<vmem>>, vector<1x128xbf16>,
    %c0_45 = arith.constant 0 : index
    %c15 = arith.constant 15 : index
    %30 = vector.load %arg1[%c0_45, %c15] : memref<2x256xbf16, #tpu.memory_space<vmem>>, vector<1x128xbf16>
    %c15_46 = arith.constant 15 : index
    %c0_47 = arith.constant 0 : index
    %31 = vector.load %arg8[%c15_46, %c0_47] : memref<64x256xbf16, #tpu.memory_space<vmem>>, vector<1x128xbf16>
    tpu.vector_store %arg8[%c15_46, %c0_47], %30 {strides = array<i32>} : memref<64x256xbf16, #tpu.memory_space<vmem>>, vector<1x128xbf16>,
    %c0_48 = arith.constant 0 : index
    %c16 = arith.constant 16 : index
    %32 = vector.load %arg1[%c0_48, %c16] : memref<2x256xbf16, #tpu.memory_space<vmem>>, vector<1x128xbf16>
    %c16_49 = arith.constant 16 : index
    %c0_50 = arith.constant 0 : index
    %33 = vector.load %arg8[%c16_49, %c0_50] : memref<64x256xbf16, #tpu.memory_space<vmem>>, vector<1x128xbf16>
    tpu.vector_store %arg8[%c16_49, %c0_50], %32 {strides = array<i32>} : memref<64x256xbf16, #tpu.memory_space<vmem>>, vector<1x128xbf16>,
    %c0_51 = arith.constant 0 : index
    %c17 = arith.constant 17 : index
    %34 = vector.load %arg1[%c0_51, %c17] : memref<2x256xbf16, #tpu.memory_space<vmem>>, vector<1x128xbf16>
    %c17_52 = arith.constant 17 : index
    %c0_53 = arith.constant 0 : index
    %35 = vector.load %arg8[%c17_52, %c0_53] : memref<64x256xbf16, #tpu.memory_space<vmem>>, vector<1x128xbf16>
    tpu.vector_store %arg8[%c17_52, %c0_53], %34 {strides = array<i32>} : memref<64x256xbf16, #tpu.memory_space<vmem>>, vector<1x128xbf16>,
    %c0_54 = arith.constant 0 : index
    %c18 = arith.constant 18 : index
    %36 = vector.load %arg1[%c0_54, %c18] : memref<2x256xbf16, #tpu.memory_space<vmem>>, vector<1x128xbf16>
    %c18_55 = arith.constant 18 : index
    %c0_56 = arith.constant 0 : index
    %37 = vector.load %arg8[%c18_55, %c0_56] : memref<64x256xbf16, #tpu.memory_space<vmem>>, vector<1x128xbf16>
    tpu.vector_store %arg8[%c18_55, %c0_56], %36 {strides = array<i32>} : memref<64x256xbf16, #tpu.memory_space<vmem>>, vector<1x128xbf16>,
    %c0_57 = arith.constant 0 : index
    %c19 = arith.constant 19 : index
    %38 = vector.load %arg1[%c0_57, %c19] : memref<2x256xbf16, #tpu.memory_space<vmem>>, vector<1x128xbf16>
    %c19_58 = arith.constant 19 : index
    %c0_59 = arith.constant 0 : index
    %39 = vector.load %arg8[%c19_58, %c0_59] : memref<64x256xbf16, #tpu.memory_space<vmem>>, vector<1x128xbf16>
    tpu.vector_store %arg8[%c19_58, %c0_59], %38 {strides = array<i32>} : memref<64x256xbf16, #tpu.memory_space<vmem>>, vector<1x128xbf16>,
    %c0_60 = arith.constant 0 : index
    %c20 = arith.constant 20 : index
    %40 = vector.load %arg1[%c0_60, %c20] : memref<2x256xbf16, #tpu.memory_space<vmem>>, vector<1x128xbf16>
    %c20_61 = arith.constant 20 : index
    %c0_62 = arith.constant 0 : index
    %41 = vector.load %arg8[%c20_61, %c0_62] : memref<64x256xbf16, #tpu.memory_space<vmem>>, vector<1x128xbf16>
    tpu.vector_store %arg8[%c20_61, %c0_62], %40 {strides = array<i32>} : memref<64x256xbf16, #tpu.memory_space<vmem>>, vector<1x128xbf16>,
    %c0_63 = arith.constant 0 : index
    %c21 = arith.constant 21 : index
    %42 = vector.load %arg1[%c0_63, %c21] : memref<2x256xbf16, #tpu.memory_space<vmem>>, vector<1x128xbf16>
    %c21_64 = arith.constant 21 : index
    %c0_65 = arith.constant 0 : index
    %43 = vector.load %arg8[%c21_64, %c0_65] : memref<64x256xbf16, #tpu.memory_space<vmem>>, vector<1x128xbf16>
    tpu.vector_store %arg8[%c21_64, %c0_65], %42 {strides = array<i32>} : memref<64x256xbf16, #tpu.memory_space<vmem>>, vector<1x128xbf16>,
    %c0_66 = arith.constant 0 : index
    %c22 = arith.constant 22 : index
    %44 = vector.load %arg1[%c0_66, %c22] : memref<2x256xbf16, #tpu.memory_space<vmem>>, vector<1x128xbf16>
    %c22_67 = arith.constant 22 : index
    %c0_68 = arith.constant 0 : index
    %45 = vector.load %arg8[%c22_67, %c0_68] : memref<64x256xbf16, #tpu.memory_space<vmem>>, vector<1x128xbf16>
    tpu.vector_store %arg8[%c22_67, %c0_68], %44 {strides = array<i32>} : memref<64x256xbf16, #tpu.memory_space<vmem>>, vector<1x128xbf16>,
    %c0_69 = arith.constant 0 : index
    %c23 = arith.constant 23 : index
    %46 = vector.load %arg1[%c0_69, %c23] : memref<2x256xbf16, #tpu.memory_space<vmem>>, vector<1x128xbf16>
    %c23_70 = arith.constant 23 : index
    %c0_71 = arith.constant 0 : index
    %47 = vector.load %arg8[%c23_70, %c0_71] : memref<64x256xbf16, #tpu.memory_space<vmem>>, vector<1x128xbf16>
    tpu.vector_store %arg8[%c23_70, %c0_71], %46 {strides = array<i32>} : memref<64x256xbf16, #tpu.memory_space<vmem>>, vector<1x128xbf16>,
    %c0_72 = arith.constant 0 : index
    %c24 = arith.constant 24 : index
    %48 = vector.load %arg1[%c0_72, %c24] : memref<2x256xbf16, #tpu.memory_space<vmem>>, vector<1x128xbf16>
    %c24_73 = arith.constant 24 : index
    %c0_74 = arith.constant 0 : index
    %49 = vector.load %arg8[%c24_73, %c0_74] : memref<64x256xbf16, #tpu.memory_space<vmem>>, vector<1x128xbf16>
    tpu.vector_store %arg8[%c24_73, %c0_74], %48 {strides = array<i32>} : memref<64x256xbf16, #tpu.memory_space<vmem>>, vector<1x128xbf16>,
    %c0_75 = arith.constant 0 : index
    %c25 = arith.constant 25 : index
    %50 = vector.load %arg1[%c0_75, %c25] : memref<2x256xbf16, #tpu.memory_space<vmem>>, vector<1x128xbf16>
    %c25_76 = arith.constant 25 : index
    %c0_77 = arith.constant 0 : index
    %51 = vector.load %arg8[%c25_76, %c0_77] : memref<64x256xbf16, #tpu.memory_space<vmem>>, vector<1x128xbf16>
    tpu.vector_store %arg8[%c25_76, %c0_77], %50 {strides = array<i32>} : memref<64x256xbf16, #tpu.memory_space<vmem>>, vector<1x128xbf16>,
    %c0_78 = arith.constant 0 : index
    %c26 = arith.constant 26 : index
    %52 = vector.load %arg1[%c0_78, %c26] : memref<2x256xbf16, #tpu.memory_space<vmem>>, vector<1x128xbf16>
    %c26_79 = arith.constant 26 : index
    %c0_80 = arith.constant 0 : index
    %53 = vector.load %arg8[%c26_79, %c0_80] : memref<64x256xbf16, #tpu.memory_space<vmem>>, vector<1x128xbf16>
    tpu.vector_store %arg8[%c26_79, %c0_80], %52 {strides = array<i32>} : memref<64x256xbf16, #tpu.memory_space<vmem>>, vector<1x128xbf16>,
    %c0_81 = arith.constant 0 : index
    %c27 = arith.constant 27 : index
    %54 = vector.load %arg1[%c0_81, %c27] : memref<2x256xbf16, #tpu.memory_space<vmem>>, vector<1x128xbf16>
    %c27_82 = arith.constant 27 : index
    %c0_83 = arith.constant 0 : index
    %55 = vector.load %arg8[%c27_82, %c0_83] : memref<64x256xbf16, #tpu.memory_space<vmem>>, vector<1x128xbf16>
    tpu.vector_store %arg8[%c27_82, %c0_83], %54 {strides = array<i32>} : memref<64x256xbf16, #tpu.memory_space<vmem>>, vector<1x128xbf16>,
    %c0_84 = arith.constant 0 : index
    %c28 = arith.constant 28 : index
    %56 = vector.load %arg1[%c0_84, %c28] : memref<2x256xbf16, #tpu.memory_space<vmem>>, vector<1x128xbf16>
    %c28_85 = arith.constant 28 : index
    %c0_86 = arith.constant 0 : index
    %57 = vector.load %arg8[%c28_85, %c0_86] : memref<64x256xbf16, #tpu.memory_space<vmem>>, vector<1x128xbf16>
    tpu.vector_store %arg8[%c28_85, %c0_86], %56 {strides = array<i32>} : memref<64x256xbf16, #tpu.memory_space<vmem>>, vector<1x128xbf16>,
    %c0_87 = arith.constant 0 : index
    %c29 = arith.constant 29 : index
    %58 = vector.load %arg1[%c0_87, %c29] : memref<2x256xbf16, #tpu.memory_space<vmem>>, vector<1x128xbf16>
    %c29_88 = arith.constant 29 : index
    %c0_89 = arith.constant 0 : index
    %59 = vector.load %arg8[%c29_88, %c0_89] : memref<64x256xbf16, #tpu.memory_space<vmem>>, vector<1x128xbf16>
    tpu.vector_store %arg8[%c29_88, %c0_89], %58 {strides = array<i32>} : memref<64x256xbf16, #tpu.memory_space<vmem>>, vector<1x128xbf16>,
    %c0_90 = arith.constant 0 : index
    %c30 = arith.constant 30 : index
    %60 = vector.load %arg1[%c0_90, %c30] : memref<2x256xbf16, #tpu.memory_space<vmem>>, vector<1x128xbf16>
    %c30_91 = arith.constant 30 : index
    %c0_92 = arith.constant 0 : index
    %61 = vector.load %arg8[%c30_91, %c0_92] : memref<64x256xbf16, #tpu.memory_space<vmem>>, vector<1x128xbf16>
    tpu.vector_store %arg8[%c30_91, %c0_92], %60 {strides = array<i32>} : memref<64x256xbf16, #tpu.memory_space<vmem>>, vector<1x128xbf16>,
    %c0_93 = arith.constant 0 : index
    %c31 = arith.constant 31 : index
    %62 = vector.load %arg1[%c0_93, %c31] : memref<2x256xbf16, #tpu.memory_space<vmem>>, vector<1x128xbf16>
    %c31_94 = arith.constant 31 : index
    %c0_95 = arith.constant 0 : index
    %63 = vector.load %arg8[%c31_94, %c0_95] : memref<64x256xbf16, #tpu.memory_space<vmem>>, vector<1x128xbf16>
    tpu.vector_store %arg8[%c31_94, %c0_95], %62 {strides = array<i32>} : memref<64x256xbf16, #tpu.memory_space<vmem>>, vector<1x128xbf16>,
    %c0_96 = arith.constant 0 : index
    %c32 = arith.constant 32 : index
    %64 = vector.load %arg1[%c0_96, %c32] : memref<2x256xbf16, #tpu.memory_space<vmem>>, vector<1x128xbf16>
    %c32_97 = arith.constant 32 : index
    %c0_98 = arith.constant 0 : index
    %65 = vector.load %arg8[%c32_97, %c0_98] : memref<64x256xbf16, #tpu.memory_space<vmem>>, vector<1x128xbf16>
    tpu.vector_store %arg8[%c32_97, %c0_98], %64 {strides = array<i32>} : memref<64x256xbf16, #tpu.memory_space<vmem>>, vector<1x128xbf16>,
    %c0_99 = arith.constant 0 : index
    %c33 = arith.constant 33 : index
    %66 = vector.load %arg1[%c0_99, %c33] : memref<2x256xbf16, #tpu.memory_space<vmem>>, vector<1x128xbf16>
    %c33_100 = arith.constant 33 : index
    %c0_101 = arith.constant 0 : index
    %67 = vector.load %arg8[%c33_100, %c0_101] : memref<64x256xbf16, #tpu.memory_space<vmem>>, vector<1x128xbf16>
    tpu.vector_store %arg8[%c33_100, %c0_101], %66 {strides = array<i32>} : memref<64x256xbf16, #tpu.memory_space<vmem>>, vector<1x128xbf16>,
    %c0_102 = arith.constant 0 : index
    %c34 = arith.constant 34 : index
    %68 = vector.load %arg1[%c0_102, %c34] : memref<2x256xbf16, #tpu.memory_space<vmem>>, vector<1x128xbf16>
    %c34_103 = arith.constant 34 : index
    %c0_104 = arith.constant 0 : index
    %69 = vector.load %arg8[%c34_103, %c0_104] : memref<64x256xbf16, #tpu.memory_space<vmem>>, vector<1x128xbf16>
    tpu.vector_store %arg8[%c34_103, %c0_104], %68 {strides = array<i32>} : memref<64x256xbf16, #tpu.memory_space<vmem>>, vector<1x128xbf16>,
    %c0_105 = arith.constant 0 : index
    %c35 = arith.constant 35 : index
    %70 = vector.load %arg1[%c0_105, %c35] : memref<2x256xbf16, #tpu.memory_space<vmem>>, vector<1x128xbf16>
    %c35_106 = arith.constant 35 : index
    %c0_107 = arith.constant 0 : index
    %71 = vector.load %arg8[%c35_106, %c0_107] : memref<64x256xbf16, #tpu.memory_space<vmem>>, vector<1x128xbf16>
    tpu.vector_store %arg8[%c35_106, %c0_107], %70 {strides = array<i32>} : memref<64x256xbf16, #tpu.memory_space<vmem>>, vector<1x128xbf16>,
    %c0_108 = arith.constant 0 : index
    %c36 = arith.constant 36 : index
    %72 = vector.load %arg1[%c0_108, %c36] : memref<2x256xbf16, #tpu.memory_space<vmem>>, vector<1x128xbf16>
    %c36_109 = arith.constant 36 : index
    %c0_110 = arith.constant 0 : index
    %73 = vector.load %arg8[%c36_109, %c0_110] : memref<64x256xbf16, #tpu.memory_space<vmem>>, vector<1x128xbf16>
    tpu.vector_store %arg8[%c36_109, %c0_110], %72 {strides = array<i32>} : memref<64x256xbf16, #tpu.memory_space<vmem>>, vector<1x128xbf16>,
    %c0_111 = arith.constant 0 : index
    %c37 = arith.constant 37 : index
    %74 = vector.load %arg1[%c0_111, %c37] : memref<2x256xbf16, #tpu.memory_space<vmem>>, vector<1x128xbf16>
    %c37_112 = arith.constant 37 : index
    %c0_113 = arith.constant 0 : index
    %75 = vector.load %arg8[%c37_112, %c0_113] : memref<64x256xbf16, #tpu.memory_space<vmem>>, vector<1x128xbf16>
    tpu.vector_store %arg8[%c37_112, %c0_113], %74 {strides = array<i32>} : memref<64x256xbf16, #tpu.memory_space<vmem>>, vector<1x128xbf16>,
    %c0_114 = arith.constant 0 : index
    %c38 = arith.constant 38 : index
    %76 = vector.load %arg1[%c0_114, %c38] : memref<2x256xbf16, #tpu.memory_space<vmem>>, vector<1x128xbf16>
    %c38_115 = arith.constant 38 : index
    %c0_116 = arith.constant 0 : index
    %77 = vector.load %arg8[%c38_115, %c0_116] : memref<64x256xbf16, #tpu.memory_space<vmem>>, vector<1x128xbf16>
    tpu.vector_store %arg8[%c38_115, %c0_116], %76 {strides = array<i32>} : memref<64x256xbf16, #tpu.memory_space<vmem>>, vector<1x128xbf16>,
    %c0_117 = arith.constant 0 : index
    %c39 = arith.constant 39 : index
    %78 = vector.load %arg1[%c0_117, %c39] : memref<2x256xbf16, #tpu.memory_space<vmem>>, vector<1x128xbf16>
    %c39_118 = arith.constant 39 : index
    %c0_119 = arith.constant 0 : index
    %79 = vector.load %arg8[%c39_118, %c0_119] : memref<64x256xbf16, #tpu.memory_space<vmem>>, vector<1x128xbf16>
    tpu.vector_store %arg8[%c39_118, %c0_119], %78 {strides = array<i32>} : memref<64x256xbf16, #tpu.memory_space<vmem>>, vector<1x128xbf16>,
    %c0_120 = arith.constant 0 : index
    %c40 = arith.constant 40 : index
    %80 = vector.load %arg1[%c0_120, %c40] : memref<2x256xbf16, #tpu.memory_space<vmem>>, vector<1x128xbf16>
    %c40_121 = arith.constant 40 : index
    %c0_122 = arith.constant 0 : index
    %81 = vector.load %arg8[%c40_121, %c0_122] : memref<64x256xbf16, #tpu.memory_space<vmem>>, vector<1x128xbf16>
    tpu.vector_store %arg8[%c40_121, %c0_122], %80 {strides = array<i32>} : memref<64x256xbf16, #tpu.memory_space<vmem>>, vector<1x128xbf16>,
    %c0_123 = arith.constant 0 : index
    %c41 = arith.constant 41 : index
    %82 = vector.load %arg1[%c0_123, %c41] : memref<2x256xbf16, #tpu.memory_space<vmem>>, vector<1x128xbf16>
    %c41_124 = arith.constant 41 : index
    %c0_125 = arith.constant 0 : index
    %83 = vector.load %arg8[%c41_124, %c0_125] : memref<64x256xbf16, #tpu.memory_space<vmem>>, vector<1x128xbf16>
    tpu.vector_store %arg8[%c41_124, %c0_125], %82 {strides = array<i32>} : memref<64x256xbf16, #tpu.memory_space<vmem>>, vector<1x128xbf16>,
    %c0_126 = arith.constant 0 : index
    %c42 = arith.constant 42 : index
    %84 = vector.load %arg1[%c0_126, %c42] : memref<2x256xbf16, #tpu.memory_space<vmem>>, vector<1x128xbf16>
    %c42_127 = arith.constant 42 : index
    %c0_128 = arith.constant 0 : index
    %85 = vector.load %arg8[%c42_127, %c0_128] : memref<64x256xbf16, #tpu.memory_space<vmem>>, vector<1x128xbf16>
    tpu.vector_store %arg8[%c42_127, %c0_128], %84 {strides = array<i32>} : memref<64x256xbf16, #tpu.memory_space<vmem>>, vector<1x128xbf16>,
    %c0_129 = arith.constant 0 : index
    %c43 = arith.constant 43 : index
    %86 = vector.load %arg1[%c0_129, %c43] : memref<2x256xbf16, #tpu.memory_space<vmem>>, vector<1x128xbf16>
    %c43_130 = arith.constant 43 : index
    %c0_131 = arith.constant 0 : index
    %87 = vector.load %arg8[%c43_130, %c0_131] : memref<64x256xbf16, #tpu.memory_space<vmem>>, vector<1x128xbf16>
    tpu.vector_store %arg8[%c43_130, %c0_131], %86 {strides = array<i32>} : memref<64x256xbf16, #tpu.memory_space<vmem>>, vector<1x128xbf16>,
    %c0_132 = arith.constant 0 : index
    %c44 = arith.constant 44 : index
    %88 = vector.load %arg1[%c0_132, %c44] : memref<2x256xbf16, #tpu.memory_space<vmem>>, vector<1x128xbf16>
    %c44_133 = arith.constant 44 : index
    %c0_134 = arith.constant 0 : index
    %89 = vector.load %arg8[%c44_133, %c0_134] : memref<64x256xbf16, #tpu.memory_space<vmem>>, vector<1x128xbf16>
    tpu.vector_store %arg8[%c44_133, %c0_134], %88 {strides = array<i32>} : memref<64x256xbf16, #tpu.memory_space<vmem>>, vector<1x128xbf16>,
    %c0_135 = arith.constant 0 : index
    %c45 = arith.constant 45 : index
    %90 = vector.load %arg1[%c0_135, %c45] : memref<2x256xbf16, #tpu.memory_space<vmem>>, vector<1x128xbf16>
    %c45_136 = arith.constant 45 : index
    %c0_137 = arith.constant 0 : index
    %91 = vector.load %arg8[%c45_136, %c0_137] : memref<64x256xbf16, #tpu.memory_space<vmem>>, vector<1x128xbf16>
    tpu.vector_store %arg8[%c45_136, %c0_137], %90 {strides = array<i32>} : memref<64x256xbf16, #tpu.memory_space<vmem>>, vector<1x128xbf16>,
    %c0_138 = arith.constant 0 : index
    %c46 = arith.constant 46 : index
    %92 = vector.load %arg1[%c0_138, %c46] : memref<2x256xbf16, #tpu.memory_space<vmem>>, vector<1x128xbf16>
    %c46_139 = arith.constant 46 : index
    %c0_140 = arith.constant 0 : index
    %93 = vector.load %arg8[%c46_139, %c0_140] : memref<64x256xbf16, #tpu.memory_space<vmem>>, vector<1x128xbf16>
    tpu.vector_store %arg8[%c46_139, %c0_140], %92 {strides = array<i32>} : memref<64x256xbf16, #tpu.memory_space<vmem>>, vector<1x128xbf16>,
    %c0_141 = arith.constant 0 : index
    %c47 = arith.constant 47 : index
    %94 = vector.load %arg1[%c0_141, %c47] : memref<2x256xbf16, #tpu.memory_space<vmem>>, vector<1x128xbf16>
    %c47_142 = arith.constant 47 : index
    %c0_143 = arith.constant 0 : index
    %95 = vector.load %arg8[%c47_142, %c0_143] : memref<64x256xbf16, #tpu.memory_space<vmem>>, vector<1x128xbf16>
    tpu.vector_store %arg8[%c47_142, %c0_143], %94 {strides = array<i32>} : memref<64x256xbf16, #tpu.memory_space<vmem>>, vector<1x128xbf16>,
    %c0_144 = arith.constant 0 : index
    %c48 = arith.constant 48 : index
    %96 = vector.load %arg1[%c0_144, %c48] : memref<2x256xbf16, #tpu.memory_space<vmem>>, vector<1x128xbf16>
    %c48_145 = arith.constant 48 : index
    %c0_146 = arith.constant 0 : index
    %97 = vector.load %arg8[%c48_145, %c0_146] : memref<64x256xbf16, #tpu.memory_space<vmem>>, vector<1x128xbf16>
    tpu.vector_store %arg8[%c48_145, %c0_146], %96 {strides = array<i32>} : memref<64x256xbf16, #tpu.memory_space<vmem>>, vector<1x128xbf16>,
    %c0_147 = arith.constant 0 : index
    %c49 = arith.constant 49 : index
    %98 = vector.load %arg1[%c0_147, %c49] : memref<2x256xbf16, #tpu.memory_space<vmem>>, vector<1x128xbf16>
    %c49_148 = arith.constant 49 : index
    %c0_149 = arith.constant 0 : index
    %99 = vector.load %arg8[%c49_148, %c0_149] : memref<64x256xbf16, #tpu.memory_space<vmem>>, vector<1x128xbf16>
    tpu.vector_store %arg8[%c49_148, %c0_149], %98 {strides = array<i32>} : memref<64x256xbf16, #tpu.memory_space<vmem>>, vector<1x128xbf16>,
    %c0_150 = arith.constant 0 : index
    %c50 = arith.constant 50 : index
    %100 = vector.load %arg1[%c0_150, %c50] : memref<2x256xbf16, #tpu.memory_space<vmem>>, vector<1x128xbf16>
    %c50_151 = arith.constant 50 : index
    %c0_152 = arith.constant 0 : index
    %101 = vector.load %arg8[%c50_151, %c0_152] : memref<64x256xbf16, #tpu.memory_space<vmem>>, vector<1x128xbf16>
    tpu.vector_store %arg8[%c50_151, %c0_152], %100 {strides = array<i32>} : memref<64x256xbf16, #tpu.memory_space<vmem>>, vector<1x128xbf16>,
    %c0_153 = arith.constant 0 : index
    %c51 = arith.constant 51 : index
    %102 = vector.load %arg1[%c0_153, %c51] : memref<2x256xbf16, #tpu.memory_space<vmem>>, vector<1x128xbf16>
    %c51_154 = arith.constant 51 : index
    %c0_155 = arith.constant 0 : index
    %103 = vector.load %arg8[%c51_154, %c0_155] : memref<64x256xbf16, #tpu.memory_space<vmem>>, vector<1x128xbf16>
    tpu.vector_store %arg8[%c51_154, %c0_155], %102 {strides = array<i32>} : memref<64x256xbf16, #tpu.memory_space<vmem>>, vector<1x128xbf16>,
    %c0_156 = arith.constant 0 : index
    %c52 = arith.constant 52 : index
    %104 = vector.load %arg1[%c0_156, %c52] : memref<2x256xbf16, #tpu.memory_space<vmem>>, vector<1x128xbf16>
    %c52_157 = arith.constant 52 : index
    %c0_158 = arith.constant 0 : index
    %105 = vector.load %arg8[%c52_157, %c0_158] : memref<64x256xbf16, #tpu.memory_space<vmem>>, vector<1x128xbf16>
    tpu.vector_store %arg8[%c52_157, %c0_158], %104 {strides = array<i32>} : memref<64x256xbf16, #tpu.memory_space<vmem>>, vector<1x128xbf16>,
    %c0_159 = arith.constant 0 : index
    %c53 = arith.constant 53 : index
    %106 = vector.load %arg1[%c0_159, %c53] : memref<2x256xbf16, #tpu.memory_space<vmem>>, vector<1x128xbf16>
    %c53_160 = arith.constant 53 : index
    %c0_161 = arith.constant 0 : index
    %107 = vector.load %arg8[%c53_160, %c0_161] : memref<64x256xbf16, #tpu.memory_space<vmem>>, vector<1x128xbf16>
    tpu.vector_store %arg8[%c53_160, %c0_161], %106 {strides = array<i32>} : memref<64x256xbf16, #tpu.memory_space<vmem>>, vector<1x128xbf16>,
    %c0_162 = arith.constant 0 : index
    %c54 = arith.constant 54 : index
    %108 = vector.load %arg1[%c0_162, %c54] : memref<2x256xbf16, #tpu.memory_space<vmem>>, vector<1x128xbf16>
    %c54_163 = arith.constant 54 : index
    %c0_164 = arith.constant 0 : index
    %109 = vector.load %arg8[%c54_163, %c0_164] : memref<64x256xbf16, #tpu.memory_space<vmem>>, vector<1x128xbf16>
    tpu.vector_store %arg8[%c54_163, %c0_164], %108 {strides = array<i32>} : memref<64x256xbf16, #tpu.memory_space<vmem>>, vector<1x128xbf16>,
    %c0_165 = arith.constant 0 : index
    %c55 = arith.constant 55 : index
    %110 = vector.load %arg1[%c0_165, %c55] : memref<2x256xbf16, #tpu.memory_space<vmem>>, vector<1x128xbf16>
    %c55_166 = arith.constant 55 : index
    %c0_167 = arith.constant 0 : index
    %111 = vector.load %arg8[%c55_166, %c0_167] : memref<64x256xbf16, #tpu.memory_space<vmem>>, vector<1x128xbf16>
    tpu.vector_store %arg8[%c55_166, %c0_167], %110 {strides = array<i32>} : memref<64x256xbf16, #tpu.memory_space<vmem>>, vector<1x128xbf16>,
    %c0_168 = arith.constant 0 : index
    %c56 = arith.constant 56 : index
    %112 = vector.load %arg1[%c0_168, %c56] : memref<2x256xbf16, #tpu.memory_space<vmem>>, vector<1x128xbf16>
    %c56_169 = arith.constant 56 : index
    %c0_170 = arith.constant 0 : index
    %113 = vector.load %arg8[%c56_169, %c0_170] : memref<64x256xbf16, #tpu.memory_space<vmem>>, vector<1x128xbf16>
    tpu.vector_store %arg8[%c56_169, %c0_170], %112 {strides = array<i32>} : memref<64x256xbf16, #tpu.memory_space<vmem>>, vector<1x128xbf16>,
    %c0_171 = arith.constant 0 : index
    %c57 = arith.constant 57 : index
    %114 = vector.load %arg1[%c0_171, %c57] : memref<2x256xbf16, #tpu.memory_space<vmem>>, vector<1x128xbf16>
    %c57_172 = arith.constant 57 : index
    %c0_173 = arith.constant 0 : index
    %115 = vector.load %arg8[%c57_172, %c0_173] : memref<64x256xbf16, #tpu.memory_space<vmem>>, vector<1x128xbf16>
    tpu.vector_store %arg8[%c57_172, %c0_173], %114 {strides = array<i32>} : memref<64x256xbf16, #tpu.memory_space<vmem>>, vector<1x128xbf16>,
    %c0_174 = arith.constant 0 : index
    %c58 = arith.constant 58 : index
    %116 = vector.load %arg1[%c0_174, %c58] : memref<2x256xbf16, #tpu.memory_space<vmem>>, vector<1x128xbf16>
    %c58_175 = arith.constant 58 : index
    %c0_176 = arith.constant 0 : index
    %117 = vector.load %arg8[%c58_175, %c0_176] : memref<64x256xbf16, #tpu.memory_space<vmem>>, vector<1x128xbf16>
    tpu.vector_store %arg8[%c58_175, %c0_176], %116 {strides = array<i32>} : memref<64x256xbf16, #tpu.memory_space<vmem>>, vector<1x128xbf16>,
    %c0_177 = arith.constant 0 : index
    %c59 = arith.constant 59 : index
    %118 = vector.load %arg1[%c0_177, %c59] : memref<2x256xbf16, #tpu.memory_space<vmem>>, vector<1x128xbf16>
    %c59_178 = arith.constant 59 : index
    %c0_179 = arith.constant 0 : index
    %119 = vector.load %arg8[%c59_178, %c0_179] : memref<64x256xbf16, #tpu.memory_space<vmem>>, vector<1x128xbf16>
    tpu.vector_store %arg8[%c59_178, %c0_179], %118 {strides = array<i32>} : memref<64x256xbf16, #tpu.memory_space<vmem>>, vector<1x128xbf16>,
    %c0_180 = arith.constant 0 : index
    %c60 = arith.constant 60 : index
    %120 = vector.load %arg1[%c0_180, %c60] : memref<2x256xbf16, #tpu.memory_space<vmem>>, vector<1x128xbf16>
    %c60_181 = arith.constant 60 : index
    %c0_182 = arith.constant 0 : index
    %121 = vector.load %arg8[%c60_181, %c0_182] : memref<64x256xbf16, #tpu.memory_space<vmem>>, vector<1x128xbf16>
    tpu.vector_store %arg8[%c60_181, %c0_182], %120 {strides = array<i32>} : memref<64x256xbf16, #tpu.memory_space<vmem>>, vector<1x128xbf16>,
    %c0_183 = arith.constant 0 : index
    %c61 = arith.constant 61 : index
    %122 = vector.load %arg1[%c0_183, %c61] : memref<2x256xbf16, #tpu.memory_space<vmem>>, vector<1x128xbf16>
    %c61_184 = arith.constant 61 : index
    %c0_185 = arith.constant 0 : index
    %123 = vector.load %arg8[%c61_184, %c0_185] : memref<64x256xbf16, #tpu.memory_space<vmem>>, vector<1x128xbf16>
    tpu.vector_store %arg8[%c61_184, %c0_185], %122 {strides = array<i32>} : memref<64x256xbf16, #tpu.memory_space<vmem>>, vector<1x128xbf16>,
    %c0_186 = arith.constant 0 : index
    %c62 = arith.constant 62 : index
    %124 = vector.load %arg1[%c0_186, %c62] : memref<2x256xbf16, #tpu.memory_space<vmem>>, vector<1x128xbf16>
    %c62_187 = arith.constant 62 : index
    %c0_188 = arith.constant 0 : index
    %125 = vector.load %arg8[%c62_187, %c0_188] : memref<64x256xbf16, #tpu.memory_space<vmem>>, vector<1x128xbf16>
    tpu.vector_store %arg8[%c62_187, %c0_188], %124 {strides = array<i32>} : memref<64x256xbf16, #tpu.memory_space<vmem>>, vector<1x128xbf16>,
    %c0_189 = arith.constant 0 : index
    %c63 = arith.constant 63 : index
    %126 = vector.load %arg1[%c0_189, %c63] : memref<2x256xbf16, #tpu.memory_space<vmem>>, vector<1x128xbf16>
    %c63_190 = arith.constant 63 : index
    %c0_191 = arith.constant 0 : index
    %127 = vector.load %arg8[%c63_190, %c0_191] : memref<64x256xbf16, #tpu.memory_space<vmem>>, vector<1x128xbf16>
    tpu.vector_store %arg8[%c63_190, %c0_191], %126 {strides = array<i32>} : memref<64x256xbf16, #tpu.memory_space<vmem>>, vector<1x128xbf16>,
    %c1_192 = arith.constant 1 : index
    %c0_193 = arith.constant 0 : index
    %128 = vector.load %arg1[%c1_192, %c0_193] : memref<2x256xbf16, #tpu.memory_space<vmem>>, vector<1x128xbf16>
    %c0_194 = arith.constant 0 : index
    %c128 = arith.constant 128 : index
    %129 = vector.load %arg8[%c0_194, %c128] : memref<64x256xbf16, #tpu.memory_space<vmem>>, vector<1x128xbf16>
    tpu.vector_store %arg8[%c0_194, %c128], %128 {strides = array<i32>} : memref<64x256xbf16, #tpu.memory_space<vmem>>, vector<1x128xbf16>,
    %c1_195 = arith.constant 1 : index
    %c1_196 = arith.constant 1 : index
    %130 = vector.load %arg1[%c1_195, %c1_196] : memref<2x256xbf16, #tpu.memory_space<vmem>>, vector<1x128xbf16>
    %c1_197 = arith.constant 1 : index
    %c128_198 = arith.constant 128 : index
    %131 = vector.load %arg8[%c1_197, %c128_198] : memref<64x256xbf16, #tpu.memory_space<vmem>>, vector<1x128xbf16>
    tpu.vector_store %arg8[%c1_197, %c128_198], %130 {strides = array<i32>} : memref<64x256xbf16, #tpu.memory_space<vmem>>, vector<1x128xbf16>,
    %c1_199 = arith.constant 1 : index
    %c2_200 = arith.constant 2 : index
    %132 = vector.load %arg1[%c1_199, %c2_200] : memref<2x256xbf16, #tpu.memory_space<vmem>>, vector<1x128xbf16>
    %c2_201 = arith.constant 2 : index
    %c128_202 = arith.constant 128 : index
    %133 = vector.load %arg8[%c2_201, %c128_202] : memref<64x256xbf16, #tpu.memory_space<vmem>>, vector<1x128xbf16>
    tpu.vector_store %arg8[%c2_201, %c128_202], %132 {strides = array<i32>} : memref<64x256xbf16, #tpu.memory_space<vmem>>, vector<1x128xbf16>,
    %c1_203 = arith.constant 1 : index
    %c3_204 = arith.constant 3 : index
    %134 = vector.load %arg1[%c1_203, %c3_204] : memref<2x256xbf16, #tpu.memory_space<vmem>>, vector<1x128xbf16>
    %c3_205 = arith.constant 3 : index
    %c128_206 = arith.constant 128 : index
    %135 = vector.load %arg8[%c3_205, %c128_206] : memref<64x256xbf16, #tpu.memory_space<vmem>>, vector<1x128xbf16>
    tpu.vector_store %arg8[%c3_205, %c128_206], %134 {strides = array<i32>} : memref<64x256xbf16, #tpu.memory_space<vmem>>, vector<1x128xbf16>,
    %c1_207 = arith.constant 1 : index
    %c4_208 = arith.constant 4 : index
    %136 = vector.load %arg1[%c1_207, %c4_208] : memref<2x256xbf16, #tpu.memory_space<vmem>>, vector<1x128xbf16>
    %c4_209 = arith.constant 4 : index
    %c128_210 = arith.constant 128 : index
    %137 = vector.load %arg8[%c4_209, %c128_210] : memref<64x256xbf16, #tpu.memory_space<vmem>>, vector<1x128xbf16>
    tpu.vector_store %arg8[%c4_209, %c128_210], %136 {strides = array<i32>} : memref<64x256xbf16, #tpu.memory_space<vmem>>, vector<1x128xbf16>,
    %c1_211 = arith.constant 1 : index
    %c5_212 = arith.constant 5 : index
    %138 = vector.load %arg1[%c1_211, %c5_212] : memref<2x256xbf16, #tpu.memory_space<vmem>>, vector<1x128xbf16>
    %c5_213 = arith.constant 5 : index
    %c128_214 = arith.constant 128 : index
    %139 = vector.load %arg8[%c5_213, %c128_214] : memref<64x256xbf16, #tpu.memory_space<vmem>>, vector<1x128xbf16>
    tpu.vector_store %arg8[%c5_213, %c128_214], %138 {strides = array<i32>} : memref<64x256xbf16, #tpu.memory_space<vmem>>, vector<1x128xbf16>,
    %c1_215 = arith.constant 1 : index
    %c6_216 = arith.constant 6 : index
    %140 = vector.load %arg1[%c1_215, %c6_216] : memref<2x256xbf16, #tpu.memory_space<vmem>>, vector<1x128xbf16>
    %c6_217 = arith.constant 6 : index
    %c128_218 = arith.constant 128 : index
    %141 = vector.load %arg8[%c6_217, %c128_218] : memref<64x256xbf16, #tpu.memory_space<vmem>>, vector<1x128xbf16>
    tpu.vector_store %arg8[%c6_217, %c128_218], %140 {strides = array<i32>} : memref<64x256xbf16, #tpu.memory_space<vmem>>, vector<1x128xbf16>,
    %c1_219 = arith.constant 1 : index
    %c7_220 = arith.constant 7 : index
    %142 = vector.load %arg1[%c1_219, %c7_220] : memref<2x256xbf16, #tpu.memory_space<vmem>>, vector<1x128xbf16>
    %c7_221 = arith.constant 7 : index
    %c128_222 = arith.constant 128 : index
    %143 = vector.load %arg8[%c7_221, %c128_222] : memref<64x256xbf16, #tpu.memory_space<vmem>>, vector<1x128xbf16>
    tpu.vector_store %arg8[%c7_221, %c128_222], %142 {strides = array<i32>} : memref<64x256xbf16, #tpu.memory_space<vmem>>, vector<1x128xbf16>,
    %c1_223 = arith.constant 1 : index
    %c8_224 = arith.constant 8 : index
    %144 = vector.load %arg1[%c1_223, %c8_224] : memref<2x256xbf16, #tpu.memory_space<vmem>>, vector<1x128xbf16>
    %c8_225 = arith.constant 8 : index
    %c128_226 = arith.constant 128 : index
    %145 = vector.load %arg8[%c8_225, %c128_226] : memref<64x256xbf16, #tpu.memory_space<vmem>>, vector<1x128xbf16>
    tpu.vector_store %arg8[%c8_225, %c128_226], %144 {strides = array<i32>} : memref<64x256xbf16, #tpu.memory_space<vmem>>, vector<1x128xbf16>,
    %c1_227 = arith.constant 1 : index
    %c9_228 = arith.constant 9 : index
    %146 = vector.load %arg1[%c1_227, %c9_228] : memref<2x256xbf16, #tpu.memory_space<vmem>>, vector<1x128xbf16>
    %c9_229 = arith.constant 9 : index
    %c128_230 = arith.constant 128 : index
    %147 = vector.load %arg8[%c9_229, %c128_230] : memref<64x256xbf16, #tpu.memory_space<vmem>>, vector<1x128xbf16>
    tpu.vector_store %arg8[%c9_229, %c128_230], %146 {strides = array<i32>} : memref<64x256xbf16, #tpu.memory_space<vmem>>, vector<1x128xbf16>,
    %c1_231 = arith.constant 1 : index
    %c10_232 = arith.constant 10 : index
    %148 = vector.load %arg1[%c1_231, %c10_232] : memref<2x256xbf16, #tpu.memory_space<vmem>>, vector<1x128xbf16>
    %c10_233 = arith.constant 10 : index
    %c128_234 = arith.constant 128 : index
    %149 = vector.load %arg8[%c10_233, %c128_234] : memref<64x256xbf16, #tpu.memory_space<vmem>>, vector<1x128xbf16>
    tpu.vector_store %arg8[%c10_233, %c128_234], %148 {strides = array<i32>} : memref<64x256xbf16, #tpu.memory_space<vmem>>, vector<1x128xbf16>,
    %c1_235 = arith.constant 1 : index
    %c11_236 = arith.constant 11 : index
    %150 = vector.load %arg1[%c1_235, %c11_236] : memref<2x256xbf16, #tpu.memory_space<vmem>>, vector<1x128xbf16>
    %c11_237 = arith.constant 11 : index
    %c128_238 = arith.constant 128 : index
    %151 = vector.load %arg8[%c11_237, %c128_238] : memref<64x256xbf16, #tpu.memory_space<vmem>>, vector<1x128xbf16>
    tpu.vector_store %arg8[%c11_237, %c128_238], %150 {strides = array<i32>} : memref<64x256xbf16, #tpu.memory_space<vmem>>, vector<1x128xbf16>,
    %c1_239 = arith.constant 1 : index
    %c12_240 = arith.constant 12 : index
    %152 = vector.load %arg1[%c1_239, %c12_240] : memref<2x256xbf16, #tpu.memory_space<vmem>>, vector<1x128xbf16>
    %c12_241 = arith.constant 12 : index
    %c128_242 = arith.constant 128 : index
    %153 = vector.load %arg8[%c12_241, %c128_242] : memref<64x256xbf16, #tpu.memory_space<vmem>>, vector<1x128xbf16>
    tpu.vector_store %arg8[%c12_241, %c128_242], %152 {strides = array<i32>} : memref<64x256xbf16, #tpu.memory_space<vmem>>, vector<1x128xbf16>,
    %c1_243 = arith.constant 1 : index
    %c13_244 = arith.constant 13 : index
    %154 = vector.load %arg1[%c1_243, %c13_244] : memref<2x256xbf16, #tpu.memory_space<vmem>>, vector<1x128xbf16>
    %c13_245 = arith.constant 13 : index
    %c128_246 = arith.constant 128 : index
    %155 = vector.load %arg8[%c13_245, %c128_246] : memref<64x256xbf16, #tpu.memory_space<vmem>>, vector<1x128xbf16>
    tpu.vector_store %arg8[%c13_245, %c128_246], %154 {strides = array<i32>} : memref<64x256xbf16, #tpu.memory_space<vmem>>, vector<1x128xbf16>,
    %c1_247 = arith.constant 1 : index
    %c14_248 = arith.constant 14 : index
    %156 = vector.load %arg1[%c1_247, %c14_248] : memref<2x256xbf16, #tpu.memory_space<vmem>>, vector<1x128xbf16>
    %c14_249 = arith.constant 14 : index
    %c128_250 = arith.constant 128 : index
    %157 = vector.load %arg8[%c14_249, %c128_250] : memref<64x256xbf16, #tpu.memory_space<vmem>>, vector<1x128xbf16>
    tpu.vector_store %arg8[%c14_249, %c128_250], %156 {strides = array<i32>} : memref<64x256xbf16, #tpu.memory_space<vmem>>, vector<1x128xbf16>,
    %c1_251 = arith.constant 1 : index
    %c15_252 = arith.constant 15 : index
    %158 = vector.load %arg1[%c1_251, %c15_252] : memref<2x256xbf16, #tpu.memory_space<vmem>>, vector<1x128xbf16>
    %c15_253 = arith.constant 15 : index
    %c128_254 = arith.constant 128 : index
    %159 = vector.load %arg8[%c15_253, %c128_254] : memref<64x256xbf16, #tpu.memory_space<vmem>>, vector<1x128xbf16>
    tpu.vector_store %arg8[%c15_253, %c128_254], %158 {strides = array<i32>} : memref<64x256xbf16, #tpu.memory_space<vmem>>, vector<1x128xbf16>,
    %c1_255 = arith.constant 1 : index
    %c16_256 = arith.constant 16 : index
    %160 = vector.load %arg1[%c1_255, %c16_256] : memref<2x256xbf16, #tpu.memory_space<vmem>>, vector<1x128xbf16>
    %c16_257 = arith.constant 16 : index
    %c128_258 = arith.constant 128 : index
    %161 = vector.load %arg8[%c16_257, %c128_258] : memref<64x256xbf16, #tpu.memory_space<vmem>>, vector<1x128xbf16>
    tpu.vector_store %arg8[%c16_257, %c128_258], %160 {strides = array<i32>} : memref<64x256xbf16, #tpu.memory_space<vmem>>, vector<1x128xbf16>,
    %c1_259 = arith.constant 1 : index
    %c17_260 = arith.constant 17 : index
    %162 = vector.load %arg1[%c1_259, %c17_260] : memref<2x256xbf16, #tpu.memory_space<vmem>>, vector<1x128xbf16>
    %c17_261 = arith.constant 17 : index
    %c128_262 = arith.constant 128 : index
    %163 = vector.load %arg8[%c17_261, %c128_262] : memref<64x256xbf16, #tpu.memory_space<vmem>>, vector<1x128xbf16>
    tpu.vector_store %arg8[%c17_261, %c128_262], %162 {strides = array<i32>} : memref<64x256xbf16, #tpu.memory_space<vmem>>, vector<1x128xbf16>,
    %c1_263 = arith.constant 1 : index
    %c18_264 = arith.constant 18 : index
    %164 = vector.load %arg1[%c1_263, %c18_264] : memref<2x256xbf16, #tpu.memory_space<vmem>>, vector<1x128xbf16>
    %c18_265 = arith.constant 18 : index
    %c128_266 = arith.constant 128 : index
    %165 = vector.load %arg8[%c18_265, %c128_266] : memref<64x256xbf16, #tpu.memory_space<vmem>>, vector<1x128xbf16>
    tpu.vector_store %arg8[%c18_265, %c128_266], %164 {strides = array<i32>} : memref<64x256xbf16, #tpu.memory_space<vmem>>, vector<1x128xbf16>,
    %c1_267 = arith.constant 1 : index
    %c19_268 = arith.constant 19 : index
    %166 = vector.load %arg1[%c1_267, %c19_268] : memref<2x256xbf16, #tpu.memory_space<vmem>>, vector<1x128xbf16>
    %c19_269 = arith.constant 19 : index
    %c128_270 = arith.constant 128 : index
    %167 = vector.load %arg8[%c19_269, %c128_270] : memref<64x256xbf16, #tpu.memory_space<vmem>>, vector<1x128xbf16>
    tpu.vector_store %arg8[%c19_269, %c128_270], %166 {strides = array<i32>} : memref<64x256xbf16, #tpu.memory_space<vmem>>, vector<1x128xbf16>,
    %c1_271 = arith.constant 1 : index
    %c20_272 = arith.constant 20 : index
    %168 = vector.load %arg1[%c1_271, %c20_272] : memref<2x256xbf16, #tpu.memory_space<vmem>>, vector<1x128xbf16>
    %c20_273 = arith.constant 20 : index
    %c128_274 = arith.constant 128 : index
    %169 = vector.load %arg8[%c20_273, %c128_274] : memref<64x256xbf16, #tpu.memory_space<vmem>>, vector<1x128xbf16>
    tpu.vector_store %arg8[%c20_273, %c128_274], %168 {strides = array<i32>} : memref<64x256xbf16, #tpu.memory_space<vmem>>, vector<1x128xbf16>,
    %c1_275 = arith.constant 1 : index
    %c21_276 = arith.constant 21 : index
    %170 = vector.load %arg1[%c1_275, %c21_276] : memref<2x256xbf16, #tpu.memory_space<vmem>>, vector<1x128xbf16>
    %c21_277 = arith.constant 21 : index
    %c128_278 = arith.constant 128 : index
    %171 = vector.load %arg8[%c21_277, %c128_278] : memref<64x256xbf16, #tpu.memory_space<vmem>>, vector<1x128xbf16>
    tpu.vector_store %arg8[%c21_277, %c128_278], %170 {strides = array<i32>} : memref<64x256xbf16, #tpu.memory_space<vmem>>, vector<1x128xbf16>,
    %c1_279 = arith.constant 1 : index
    %c22_280 = arith.constant 22 : index
    %172 = vector.load %arg1[%c1_279, %c22_280] : memref<2x256xbf16, #tpu.memory_space<vmem>>, vector<1x128xbf16>
    %c22_281 = arith.constant 22 : index
    %c128_282 = arith.constant 128 : index
    %173 = vector.load %arg8[%c22_281, %c128_282] : memref<64x256xbf16, #tpu.memory_space<vmem>>, vector<1x128xbf16>
    tpu.vector_store %arg8[%c22_281, %c128_282], %172 {strides = array<i32>} : memref<64x256xbf16, #tpu.memory_space<vmem>>, vector<1x128xbf16>,
    %c1_283 = arith.constant 1 : index
    %c23_284 = arith.constant 23 : index
    %174 = vector.load %arg1[%c1_283, %c23_284] : memref<2x256xbf16, #tpu.memory_space<vmem>>, vector<1x128xbf16>
    %c23_285 = arith.constant 23 : index
    %c128_286 = arith.constant 128 : index
    %175 = vector.load %arg8[%c23_285, %c128_286] : memref<64x256xbf16, #tpu.memory_space<vmem>>, vector<1x128xbf16>
    tpu.vector_store %arg8[%c23_285, %c128_286], %174 {strides = array<i32>} : memref<64x256xbf16, #tpu.memory_space<vmem>>, vector<1x128xbf16>,
    %c1_287 = arith.constant 1 : index
    %c24_288 = arith.constant 24 : index
    %176 = vector.load %arg1[%c1_287, %c24_288] : memref<2x256xbf16, #tpu.memory_space<vmem>>, vector<1x128xbf16>
    %c24_289 = arith.constant 24 : index
    %c128_290 = arith.constant 128 : index
    %177 = vector.load %arg8[%c24_289, %c128_290] : memref<64x256xbf16, #tpu.memory_space<vmem>>, vector<1x128xbf16>
    tpu.vector_store %arg8[%c24_289, %c128_290], %176 {strides = array<i32>} : memref<64x256xbf16, #tpu.memory_space<vmem>>, vector<1x128xbf16>,
    %c1_291 = arith.constant 1 : index
    %c25_292 = arith.constant 25 : index
    %178 = vector.load %arg1[%c1_291, %c25_292] : memref<2x256xbf16, #tpu.memory_space<vmem>>, vector<1x128xbf16>
    %c25_293 = arith.constant 25 : index
    %c128_294 = arith.constant 128 : index
    %179 = vector.load %arg8[%c25_293, %c128_294] : memref<64x256xbf16, #tpu.memory_space<vmem>>, vector<1x128xbf16>
    tpu.vector_store %arg8[%c25_293, %c128_294], %178 {strides = array<i32>} : memref<64x256xbf16, #tpu.memory_space<vmem>>, vector<1x128xbf16>,
    %c1_295 = arith.constant 1 : index
    %c26_296 = arith.constant 26 : index
    %180 = vector.load %arg1[%c1_295, %c26_296] : memref<2x256xbf16, #tpu.memory_space<vmem>>, vector<1x128xbf16>
    %c26_297 = arith.constant 26 : index
    %c128_298 = arith.constant 128 : index
    %181 = vector.load %arg8[%c26_297, %c128_298] : memref<64x256xbf16, #tpu.memory_space<vmem>>, vector<1x128xbf16>
    tpu.vector_store %arg8[%c26_297, %c128_298], %180 {strides = array<i32>} : memref<64x256xbf16, #tpu.memory_space<vmem>>, vector<1x128xbf16>,
    %c1_299 = arith.constant 1 : index
    %c27_300 = arith.constant 27 : index
    %182 = vector.load %arg1[%c1_299, %c27_300] : memref<2x256xbf16, #tpu.memory_space<vmem>>, vector<1x128xbf16>
    %c27_301 = arith.constant 27 : index
    %c128_302 = arith.constant 128 : index
    %183 = vector.load %arg8[%c27_301, %c128_302] : memref<64x256xbf16, #tpu.memory_space<vmem>>, vector<1x128xbf16>
    tpu.vector_store %arg8[%c27_301, %c128_302], %182 {strides = array<i32>} : memref<64x256xbf16, #tpu.memory_space<vmem>>, vector<1x128xbf16>,
    %c1_303 = arith.constant 1 : index
    %c28_304 = arith.constant 28 : index
    %184 = vector.load %arg1[%c1_303, %c28_304] : memref<2x256xbf16, #tpu.memory_space<vmem>>, vector<1x128xbf16>
    %c28_305 = arith.constant 28 : index
    %c128_306 = arith.constant 128 : index
    %185 = vector.load %arg8[%c28_305, %c128_306] : memref<64x256xbf16, #tpu.memory_space<vmem>>, vector<1x128xbf16>
    tpu.vector_store %arg8[%c28_305, %c128_306], %184 {strides = array<i32>} : memref<64x256xbf16, #tpu.memory_space<vmem>>, vector<1x128xbf16>,
    %c1_307 = arith.constant 1 : index
    %c29_308 = arith.constant 29 : index
    %186 = vector.load %arg1[%c1_307, %c29_308] : memref<2x256xbf16, #tpu.memory_space<vmem>>, vector<1x128xbf16>
    %c29_309 = arith.constant 29 : index
    %c128_310 = arith.constant 128 : index
    %187 = vector.load %arg8[%c29_309, %c128_310] : memref<64x256xbf16, #tpu.memory_space<vmem>>, vector<1x128xbf16>
    tpu.vector_store %arg8[%c29_309, %c128_310], %186 {strides = array<i32>} : memref<64x256xbf16, #tpu.memory_space<vmem>>, vector<1x128xbf16>,
    %c1_311 = arith.constant 1 : index
    %c30_312 = arith.constant 30 : index
    %188 = vector.load %arg1[%c1_311, %c30_312] : memref<2x256xbf16, #tpu.memory_space<vmem>>, vector<1x128xbf16>
    %c30_313 = arith.constant 30 : index
    %c128_314 = arith.constant 128 : index
    %189 = vector.load %arg8[%c30_313, %c128_314] : memref<64x256xbf16, #tpu.memory_space<vmem>>, vector<1x128xbf16>
    tpu.vector_store %arg8[%c30_313, %c128_314], %188 {strides = array<i32>} : memref<64x256xbf16, #tpu.memory_space<vmem>>, vector<1x128xbf16>,
    %c1_315 = arith.constant 1 : index
    %c31_316 = arith.constant 31 : index
    %190 = vector.load %arg1[%c1_315, %c31_316] : memref<2x256xbf16, #tpu.memory_space<vmem>>, vector<1x128xbf16>
    %c31_317 = arith.constant 31 : index
    %c128_318 = arith.constant 128 : index
    %191 = vector.load %arg8[%c31_317, %c128_318] : memref<64x256xbf16, #tpu.memory_space<vmem>>, vector<1x128xbf16>
    tpu.vector_store %arg8[%c31_317, %c128_318], %190 {strides = array<i32>} : memref<64x256xbf16, #tpu.memory_space<vmem>>, vector<1x128xbf16>,
    %c1_319 = arith.constant 1 : index
    %c32_320 = arith.constant 32 : index
    %192 = vector.load %arg1[%c1_319, %c32_320] : memref<2x256xbf16, #tpu.memory_space<vmem>>, vector<1x128xbf16>
    %c32_321 = arith.constant 32 : index
    %c128_322 = arith.constant 128 : index
    %193 = vector.load %arg8[%c32_321, %c128_322] : memref<64x256xbf16, #tpu.memory_space<vmem>>, vector<1x128xbf16>
    tpu.vector_store %arg8[%c32_321, %c128_322], %192 {strides = array<i32>} : memref<64x256xbf16, #tpu.memory_space<vmem>>, vector<1x128xbf16>,
    %c1_323 = arith.constant 1 : index
    %c33_324 = arith.constant 33 : index
    %194 = vector.load %arg1[%c1_323, %c33_324] : memref<2x256xbf16, #tpu.memory_space<vmem>>, vector<1x128xbf16>
    %c33_325 = arith.constant 33 : index
    %c128_326 = arith.constant 128 : index
    %195 = vector.load %arg8[%c33_325, %c128_326] : memref<64x256xbf16, #tpu.memory_space<vmem>>, vector<1x128xbf16>
    tpu.vector_store %arg8[%c33_325, %c128_326], %194 {strides = array<i32>} : memref<64x256xbf16, #tpu.memory_space<vmem>>, vector<1x128xbf16>,
    %c1_327 = arith.constant 1 : index
    %c34_328 = arith.constant 34 : index
    %196 = vector.load %arg1[%c1_327, %c34_328] : memref<2x256xbf16, #tpu.memory_space<vmem>>, vector<1x128xbf16>
    %c34_329 = arith.constant 34 : index
    %c128_330 = arith.constant 128 : index
    %197 = vector.load %arg8[%c34_329, %c128_330] : memref<64x256xbf16, #tpu.memory_space<vmem>>, vector<1x128xbf16>
    tpu.vector_store %arg8[%c34_329, %c128_330], %196 {strides = array<i32>} : memref<64x256xbf16, #tpu.memory_space<vmem>>, vector<1x128xbf16>,
    %c1_331 = arith.constant 1 : index
    %c35_332 = arith.constant 35 : index
    %198 = vector.load %arg1[%c1_331, %c35_332] : memref<2x256xbf16, #tpu.memory_space<vmem>>, vector<1x128xbf16>
    %c35_333 = arith.constant 35 : index
    %c128_334 = arith.constant 128 : index
    %199 = vector.load %arg8[%c35_333, %c128_334] : memref<64x256xbf16, #tpu.memory_space<vmem>>, vector<1x128xbf16>
    tpu.vector_store %arg8[%c35_333, %c128_334], %198 {strides = array<i32>} : memref<64x256xbf16, #tpu.memory_space<vmem>>, vector<1x128xbf16>,
    %c1_335 = arith.constant 1 : index
    %c36_336 = arith.constant 36 : index
    %200 = vector.load %arg1[%c1_335, %c36_336] : memref<2x256xbf16, #tpu.memory_space<vmem>>, vector<1x128xbf16>
    %c36_337 = arith.constant 36 : index
    %c128_338 = arith.constant 128 : index
    %201 = vector.load %arg8[%c36_337, %c128_338] : memref<64x256xbf16, #tpu.memory_space<vmem>>, vector<1x128xbf16>
    tpu.vector_store %arg8[%c36_337, %c128_338], %200 {strides = array<i32>} : memref<64x256xbf16, #tpu.memory_space<vmem>>, vector<1x128xbf16>,
    %c1_339 = arith.constant 1 : index
    %c37_340 = arith.constant 37 : index
    %202 = vector.load %arg1[%c1_339, %c37_340] : memref<2x256xbf16, #tpu.memory_space<vmem>>, vector<1x128xbf16>
    %c37_341 = arith.constant 37 : index
    %c128_342 = arith.constant 128 : index
    %203 = vector.load %arg8[%c37_341, %c128_342] : memref<64x256xbf16, #tpu.memory_space<vmem>>, vector<1x128xbf16>
    tpu.vector_store %arg8[%c37_341, %c128_342], %202 {strides = array<i32>} : memref<64x256xbf16, #tpu.memory_space<vmem>>, vector<1x128xbf16>,
    %c1_343 = arith.constant 1 : index
    %c38_344 = arith.constant 38 : index
    %204 = vector.load %arg1[%c1_343, %c38_344] : memref<2x256xbf16, #tpu.memory_space<vmem>>, vector<1x128xbf16>
    %c38_345 = arith.constant 38 : index
    %c128_346 = arith.constant 128 : index
    %205 = vector.load %arg8[%c38_345, %c128_346] : memref<64x256xbf16, #tpu.memory_space<vmem>>, vector<1x128xbf16>
    tpu.vector_store %arg8[%c38_345, %c128_346], %204 {strides = array<i32>} : memref<64x256xbf16, #tpu.memory_space<vmem>>, vector<1x128xbf16>,
    %c1_347 = arith.constant 1 : index
    %c39_348 = arith.constant 39 : index
    %206 = vector.load %arg1[%c1_347, %c39_348] : memref<2x256xbf16, #tpu.memory_space<vmem>>, vector<1x128xbf16>
    %c39_349 = arith.constant 39 : index
    %c128_350 = arith.constant 128 : index
    %207 = vector.load %arg8[%c39_349, %c128_350] : memref<64x256xbf16, #tpu.memory_space<vmem>>, vector<1x128xbf16>
    tpu.vector_store %arg8[%c39_349, %c128_350], %206 {strides = array<i32>} : memref<64x256xbf16, #tpu.memory_space<vmem>>, vector<1x128xbf16>,
    %c1_351 = arith.constant 1 : index
    %c40_352 = arith.constant 40 : index
    %208 = vector.load %arg1[%c1_351, %c40_352] : memref<2x256xbf16, #tpu.memory_space<vmem>>, vector<1x128xbf16>
    %c40_353 = arith.constant 40 : index
    %c128_354 = arith.constant 128 : index
    %209 = vector.load %arg8[%c40_353, %c128_354] : memref<64x256xbf16, #tpu.memory_space<vmem>>, vector<1x128xbf16>
    tpu.vector_store %arg8[%c40_353, %c128_354], %208 {strides = array<i32>} : memref<64x256xbf16, #tpu.memory_space<vmem>>, vector<1x128xbf16>,
    %c1_355 = arith.constant 1 : index
    %c41_356 = arith.constant 41 : index
    %210 = vector.load %arg1[%c1_355, %c41_356] : memref<2x256xbf16, #tpu.memory_space<vmem>>, vector<1x128xbf16>
    %c41_357 = arith.constant 41 : index
    %c128_358 = arith.constant 128 : index
    %211 = vector.load %arg8[%c41_357, %c128_358] : memref<64x256xbf16, #tpu.memory_space<vmem>>, vector<1x128xbf16>
    tpu.vector_store %arg8[%c41_357, %c128_358], %210 {strides = array<i32>} : memref<64x256xbf16, #tpu.memory_space<vmem>>, vector<1x128xbf16>,
    %c1_359 = arith.constant 1 : index
    %c42_360 = arith.constant 42 : index
    %212 = vector.load %arg1[%c1_359, %c42_360] : memref<2x256xbf16, #tpu.memory_space<vmem>>, vector<1x128xbf16>
    %c42_361 = arith.constant 42 : index
    %c128_362 = arith.constant 128 : index
    %213 = vector.load %arg8[%c42_361, %c128_362] : memref<64x256xbf16, #tpu.memory_space<vmem>>, vector<1x128xbf16>
    tpu.vector_store %arg8[%c42_361, %c128_362], %212 {strides = array<i32>} : memref<64x256xbf16, #tpu.memory_space<vmem>>, vector<1x128xbf16>,
    %c1_363 = arith.constant 1 : index
    %c43_364 = arith.constant 43 : index
    %214 = vector.load %arg1[%c1_363, %c43_364] : memref<2x256xbf16, #tpu.memory_space<vmem>>, vector<1x128xbf16>
    %c43_365 = arith.constant 43 : index
    %c128_366 = arith.constant 128 : index
    %215 = vector.load %arg8[%c43_365, %c128_366] : memref<64x256xbf16, #tpu.memory_space<vmem>>, vector<1x128xbf16>
    tpu.vector_store %arg8[%c43_365, %c128_366], %214 {strides = array<i32>} : memref<64x256xbf16, #tpu.memory_space<vmem>>, vector<1x128xbf16>,
    %c1_367 = arith.constant 1 : index
    %c44_368 = arith.constant 44 : index
    %216 = vector.load %arg1[%c1_367, %c44_368] : memref<2x256xbf16, #tpu.memory_space<vmem>>, vector<1x128xbf16>
    %c44_369 = arith.constant 44 : index
    %c128_370 = arith.constant 128 : index
    %217 = vector.load %arg8[%c44_369, %c128_370] : memref<64x256xbf16, #tpu.memory_space<vmem>>, vector<1x128xbf16>
    tpu.vector_store %arg8[%c44_369, %c128_370], %216 {strides = array<i32>} : memref<64x256xbf16, #tpu.memory_space<vmem>>, vector<1x128xbf16>,
    %c1_371 = arith.constant 1 : index
    %c45_372 = arith.constant 45 : index
    %218 = vector.load %arg1[%c1_371, %c45_372] : memref<2x256xbf16, #tpu.memory_space<vmem>>, vector<1x128xbf16>
    %c45_373 = arith.constant 45 : index
    %c128_374 = arith.constant 128 : index
    %219 = vector.load %arg8[%c45_373, %c128_374] : memref<64x256xbf16, #tpu.memory_space<vmem>>, vector<1x128xbf16>
    tpu.vector_store %arg8[%c45_373, %c128_374], %218 {strides = array<i32>} : memref<64x256xbf16, #tpu.memory_space<vmem>>, vector<1x128xbf16>,
    %c1_375 = arith.constant 1 : index
    %c46_376 = arith.constant 46 : index
    %220 = vector.load %arg1[%c1_375, %c46_376] : memref<2x256xbf16, #tpu.memory_space<vmem>>, vector<1x128xbf16>
    %c46_377 = arith.constant 46 : index
    %c128_378 = arith.constant 128 : index
    %221 = vector.load %arg8[%c46_377, %c128_378] : memref<64x256xbf16, #tpu.memory_space<vmem>>, vector<1x128xbf16>
    tpu.vector_store %arg8[%c46_377, %c128_378], %220 {strides = array<i32>} : memref<64x256xbf16, #tpu.memory_space<vmem>>, vector<1x128xbf16>,
    %c1_379 = arith.constant 1 : index
    %c47_380 = arith.constant 47 : index
    %222 = vector.load %arg1[%c1_379, %c47_380] : memref<2x256xbf16, #tpu.memory_space<vmem>>, vector<1x128xbf16>
    %c47_381 = arith.constant 47 : index
    %c128_382 = arith.constant 128 : index
    %223 = vector.load %arg8[%c47_381, %c128_382] : memref<64x256xbf16, #tpu.memory_space<vmem>>, vector<1x128xbf16>
    tpu.vector_store %arg8[%c47_381, %c128_382], %222 {strides = array<i32>} : memref<64x256xbf16, #tpu.memory_space<vmem>>, vector<1x128xbf16>,
    %c1_383 = arith.constant 1 : index
    %c48_384 = arith.constant 48 : index
    %224 = vector.load %arg1[%c1_383, %c48_384] : memref<2x256xbf16, #tpu.memory_space<vmem>>, vector<1x128xbf16>
    %c48_385 = arith.constant 48 : index
    %c128_386 = arith.constant 128 : index
    %225 = vector.load %arg8[%c48_385, %c128_386] : memref<64x256xbf16, #tpu.memory_space<vmem>>, vector<1x128xbf16>
    tpu.vector_store %arg8[%c48_385, %c128_386], %224 {strides = array<i32>} : memref<64x256xbf16, #tpu.memory_space<vmem>>, vector<1x128xbf16>,
    %c1_387 = arith.constant 1 : index
    %c49_388 = arith.constant 49 : index
    %226 = vector.load %arg1[%c1_387, %c49_388] : memref<2x256xbf16, #tpu.memory_space<vmem>>, vector<1x128xbf16>
    %c49_389 = arith.constant 49 : index
    %c128_390 = arith.constant 128 : index
    %227 = vector.load %arg8[%c49_389, %c128_390] : memref<64x256xbf16, #tpu.memory_space<vmem>>, vector<1x128xbf16>
    tpu.vector_store %arg8[%c49_389, %c128_390], %226 {strides = array<i32>} : memref<64x256xbf16, #tpu.memory_space<vmem>>, vector<1x128xbf16>,
    %c1_391 = arith.constant 1 : index
    %c50_392 = arith.constant 50 : index
    %228 = vector.load %arg1[%c1_391, %c50_392] : memref<2x256xbf16, #tpu.memory_space<vmem>>, vector<1x128xbf16>
    %c50_393 = arith.constant 50 : index
    %c128_394 = arith.constant 128 : index
    %229 = vector.load %arg8[%c50_393, %c128_394] : memref<64x256xbf16, #tpu.memory_space<vmem>>, vector<1x128xbf16>
    tpu.vector_store %arg8[%c50_393, %c128_394], %228 {strides = array<i32>} : memref<64x256xbf16, #tpu.memory_space<vmem>>, vector<1x128xbf16>,
    %c1_395 = arith.constant 1 : index
    %c51_396 = arith.constant 51 : index
    %230 = vector.load %arg1[%c1_395, %c51_396] : memref<2x256xbf16, #tpu.memory_space<vmem>>, vector<1x128xbf16>
    %c51_397 = arith.constant 51 : index
    %c128_398 = arith.constant 128 : index
    %231 = vector.load %arg8[%c51_397, %c128_398] : memref<64x256xbf16, #tpu.memory_space<vmem>>, vector<1x128xbf16>
    tpu.vector_store %arg8[%c51_397, %c128_398], %230 {strides = array<i32>} : memref<64x256xbf16, #tpu.memory_space<vmem>>, vector<1x128xbf16>,
    %c1_399 = arith.constant 1 : index
    %c52_400 = arith.constant 52 : index
    %232 = vector.load %arg1[%c1_399, %c52_400] : memref<2x256xbf16, #tpu.memory_space<vmem>>, vector<1x128xbf16>
    %c52_401 = arith.constant 52 : index
    %c128_402 = arith.constant 128 : index
    %233 = vector.load %arg8[%c52_401, %c128_402] : memref<64x256xbf16, #tpu.memory_space<vmem>>, vector<1x128xbf16>
    tpu.vector_store %arg8[%c52_401, %c128_402], %232 {strides = array<i32>} : memref<64x256xbf16, #tpu.memory_space<vmem>>, vector<1x128xbf16>,
    %c1_403 = arith.constant 1 : index
    %c53_404 = arith.constant 53 : index
    %234 = vector.load %arg1[%c1_403, %c53_404] : memref<2x256xbf16, #tpu.memory_space<vmem>>, vector<1x128xbf16>
    %c53_405 = arith.constant 53 : index
    %c128_406 = arith.constant 128 : index
    %235 = vector.load %arg8[%c53_405, %c128_406] : memref<64x256xbf16, #tpu.memory_space<vmem>>, vector<1x128xbf16>
    tpu.vector_store %arg8[%c53_405, %c128_406], %234 {strides = array<i32>} : memref<64x256xbf16, #tpu.memory_space<vmem>>, vector<1x128xbf16>,
    %c1_407 = arith.constant 1 : index
    %c54_408 = arith.constant 54 : index
    %236 = vector.load %arg1[%c1_407, %c54_408] : memref<2x256xbf16, #tpu.memory_space<vmem>>, vector<1x128xbf16>
    %c54_409 = arith.constant 54 : index
    %c128_410 = arith.constant 128 : index
    %237 = vector.load %arg8[%c54_409, %c128_410] : memref<64x256xbf16, #tpu.memory_space<vmem>>, vector<1x128xbf16>
    tpu.vector_store %arg8[%c54_409, %c128_410], %236 {strides = array<i32>} : memref<64x256xbf16, #tpu.memory_space<vmem>>, vector<1x128xbf16>,
    %c1_411 = arith.constant 1 : index
    %c55_412 = arith.constant 55 : index
    %238 = vector.load %arg1[%c1_411, %c55_412] : memref<2x256xbf16, #tpu.memory_space<vmem>>, vector<1x128xbf16>
    %c55_413 = arith.constant 55 : index
    %c128_414 = arith.constant 128 : index
    %239 = vector.load %arg8[%c55_413, %c128_414] : memref<64x256xbf16, #tpu.memory_space<vmem>>, vector<1x128xbf16>
    tpu.vector_store %arg8[%c55_413, %c128_414], %238 {strides = array<i32>} : memref<64x256xbf16, #tpu.memory_space<vmem>>, vector<1x128xbf16>,
    %c1_415 = arith.constant 1 : index
    %c56_416 = arith.constant 56 : index
    %240 = vector.load %arg1[%c1_415, %c56_416] : memref<2x256xbf16, #tpu.memory_space<vmem>>, vector<1x128xbf16>
    %c56_417 = arith.constant 56 : index
    %c128_418 = arith.constant 128 : index
    %241 = vector.load %arg8[%c56_417, %c128_418] : memref<64x256xbf16, #tpu.memory_space<vmem>>, vector<1x128xbf16>
    tpu.vector_store %arg8[%c56_417, %c128_418], %240 {strides = array<i32>} : memref<64x256xbf16, #tpu.memory_space<vmem>>, vector<1x128xbf16>,
    %c1_419 = arith.constant 1 : index
    %c57_420 = arith.constant 57 : index
    %242 = vector.load %arg1[%c1_419, %c57_420] : memref<2x256xbf16, #tpu.memory_space<vmem>>, vector<1x128xbf16>
    %c57_421 = arith.constant 57 : index
    %c128_422 = arith.constant 128 : index
    %243 = vector.load %arg8[%c57_421, %c128_422] : memref<64x256xbf16, #tpu.memory_space<vmem>>, vector<1x128xbf16>
    tpu.vector_store %arg8[%c57_421, %c128_422], %242 {strides = array<i32>} : memref<64x256xbf16, #tpu.memory_space<vmem>>, vector<1x128xbf16>,
    %c1_423 = arith.constant 1 : index
    %c58_424 = arith.constant 58 : index
    %244 = vector.load %arg1[%c1_423, %c58_424] : memref<2x256xbf16, #tpu.memory_space<vmem>>, vector<1x128xbf16>
    %c58_425 = arith.constant 58 : index
    %c128_426 = arith.constant 128 : index
    %245 = vector.load %arg8[%c58_425, %c128_426] : memref<64x256xbf16, #tpu.memory_space<vmem>>, vector<1x128xbf16>
    tpu.vector_store %arg8[%c58_425, %c128_426], %244 {strides = array<i32>} : memref<64x256xbf16, #tpu.memory_space<vmem>>, vector<1x128xbf16>,
    %c1_427 = arith.constant 1 : index
    %c59_428 = arith.constant 59 : index
    %246 = vector.load %arg1[%c1_427, %c59_428] : memref<2x256xbf16, #tpu.memory_space<vmem>>, vector<1x128xbf16>
    %c59_429 = arith.constant 59 : index
    %c128_430 = arith.constant 128 : index
    %247 = vector.load %arg8[%c59_429, %c128_430] : memref<64x256xbf16, #tpu.memory_space<vmem>>, vector<1x128xbf16>
    tpu.vector_store %arg8[%c59_429, %c128_430], %246 {strides = array<i32>} : memref<64x256xbf16, #tpu.memory_space<vmem>>, vector<1x128xbf16>,
    %c1_431 = arith.constant 1 : index
    %c60_432 = arith.constant 60 : index
    %248 = vector.load %arg1[%c1_431, %c60_432] : memref<2x256xbf16, #tpu.memory_space<vmem>>, vector<1x128xbf16>
    %c60_433 = arith.constant 60 : index
    %c128_434 = arith.constant 128 : index
    %249 = vector.load %arg8[%c60_433, %c128_434] : memref<64x256xbf16, #tpu.memory_space<vmem>>, vector<1x128xbf16>
    tpu.vector_store %arg8[%c60_433, %c128_434], %248 {strides = array<i32>} : memref<64x256xbf16, #tpu.memory_space<vmem>>, vector<1x128xbf16>,
    %c1_435 = arith.constant 1 : index
    %c61_436 = arith.constant 61 : index
    %250 = vector.load %arg1[%c1_435, %c61_436] : memref<2x256xbf16, #tpu.memory_space<vmem>>, vector<1x128xbf16>
    %c61_437 = arith.constant 61 : index
    %c128_438 = arith.constant 128 : index
    %251 = vector.load %arg8[%c61_437, %c128_438] : memref<64x256xbf16, #tpu.memory_space<vmem>>, vector<1x128xbf16>
    tpu.vector_store %arg8[%c61_437, %c128_438], %250 {strides = array<i32>} : memref<64x256xbf16, #tpu.memory_space<vmem>>, vector<1x128xbf16>,
    %c1_439 = arith.constant 1 : index
    %c62_440 = arith.constant 62 : index
    %252 = vector.load %arg1[%c1_439, %c62_440] : memref<2x256xbf16, #tpu.memory_space<vmem>>, vector<1x128xbf16>
    %c62_441 = arith.constant 62 : index
    %c128_442 = arith.constant 128 : index
    %253 = vector.load %arg8[%c62_441, %c128_442] : memref<64x256xbf16, #tpu.memory_space<vmem>>, vector<1x128xbf16>
    tpu.vector_store %arg8[%c62_441, %c128_442], %252 {strides = array<i32>} : memref<64x256xbf16, #tpu.memory_space<vmem>>, vector<1x128xbf16>,
    %c1_443 = arith.constant 1 : index
    %c63_444 = arith.constant 63 : index
    %254 = vector.load %arg1[%c1_443, %c63_444] : memref<2x256xbf16, #tpu.memory_space<vmem>>, vector<1x128xbf16>
    %c63_445 = arith.constant 63 : index
    %c128_446 = arith.constant 128 : index
    %255 = vector.load %arg8[%c63_445, %c128_446] : memref<64x256xbf16, #tpu.memory_space<vmem>>, vector<1x128xbf16>
    tpu.vector_store %arg8[%c63_445, %c128_446], %254 {strides = array<i32>} : memref<64x256xbf16, #tpu.memory_space<vmem>>, vector<1x128xbf16>,
    %c0_447 = arith.constant 0 : index
    %c0_448 = arith.constant 0 : index
    %256 = vector.load %arg2[%c0_447, %c0_448] : memref<32x64xbf16, #tpu.memory_space<vmem>>, vector<32x64xbf16>
    %c0_449 = arith.constant 0 : index
    %c0_450 = arith.constant 0 : index
    %257 = vector.load %arg8[%c0_449, %c0_450] : memref<64x256xbf16, #tpu.memory_space<vmem>>, vector<64x256xbf16>
    %cst = arith.constant dense<0.000000e+00> : vector<32x256xf32>
    %258 = tpu.matmul %256, %257, %cst {dimension_numbers = #tpu.dot_dimension_numbers<[1], [0], [0], [1], [0, 0, 1, 1], [], []>} : vector<32x64xbf16>, vector<64x256xbf16>, vector<32x256xf32> -> vector<32x256xf32>
    %c0_451 = arith.constant 0 : index
    %c0_452 = arith.constant 0 : index
    %259 = vector.load %arg3[%c0_451, %c0_452] : memref<32x1xf32, #tpu.memory_space<vmem>>, vector<32x1xf32>
    %260 = vector.broadcast %259 : vector<32x1xf32> to vector<32x256xf32>
    %261 = arith.addf %258, %260 : vector<32x256xf32>
    %262 = math.tanh %261 : vector<32x256xf32>
    %c0_453 = arith.constant 0 : index
    %c0_454 = arith.constant 0 : index
    %263 = vector.load %arg4[%c0_453, %c0_454] : memref<32x128xf32, #tpu.memory_space<vmem>>, vector<32x128xf32>
    %264 = vector.extract_strided_slice %262 {offsets = [0, 0], sizes = [32, 128], strides = [1, 1]} : vector<32x256xf32> to vector<32x128xf32>
    %265 = arith.addf %264, %263 : vector<32x128xf32>
    %cst_455 = arith.constant dense<0xFF800000> : vector<32xf32>
    %266 = vector.multi_reduction <maximumf>, %265, %cst_455 [1] : vector<32x128xf32> to vector<32xf32>
    %267 = vector.shape_cast %266 : vector<32xf32> to vector<32x1xf32>
    %268 = vector.extract_strided_slice %262 {offsets = [0, 128], sizes = [32, 128], strides = [1, 1]} : vector<32x256xf32> to vector<32x128xf32>
    %269 = arith.addf %268, %263 : vector<32x128xf32>
    %cst_456 = arith.constant dense<0xFF800000> : vector<32xf32>
    %270 = vector.multi_reduction <maximumf>, %269, %cst_456 [1] : vector<32x128xf32> to vector<32xf32>
    %271 = vector.shape_cast %270 : vector<32xf32> to vector<32x1xf32>
    %272 = tpu.concatenate %267, %271 in 1 : vector<32x1xf32>, vector<32x1xf32> -> vector<32x2xf32>
    %273 = tpu.transpose %272, [1, 0] : vector<32x2xf32> -> vector<2x32xf32>
    %c0_457 = arith.constant 0 : index
    %c0_458 = arith.constant 0 : index
    %274 = vector.load %arg5[%c0_457, %c0_458] : memref<32x128xf32, #tpu.memory_space<vmem>>, vector<32x128xf32>
    %cst_459 = arith.constant dense<0.000000e+00> : vector<2x128xf32>
    %275 = tpu.matmul %273, %274, %cst_459 {dimension_numbers = #tpu.dot_dimension_numbers<[1], [0], [0], [1], [0, 0, 1, 1], [], []>} : vector<2x32xf32>, vector<32x128xf32>, vector<2x128xf32> -> vector<2x128xf32>
    %c0_460 = arith.constant 0 : index
    %c0_461 = arith.constant 0 : index
    %276 = vector.load %arg6[%c0_460, %c0_461] : memref<1x128xf32, #tpu.memory_space<vmem>>, vector<1x128xf32>
    %277 = vector.broadcast %276 : vector<1x128xf32> to vector<2x128xf32>
    %278 = arith.addf %275, %277 : vector<2x128xf32>
    %cst_462 = arith.constant dense<0xFF800000> : vector<2xf32>
    %279 = vector.multi_reduction <maximumf>, %278, %cst_462 [1] : vector<2x128xf32> to vector<2xf32>
    %280 = vector.shape_cast %279 : vector<2xf32> to vector<2x1xf32>
    %281 = vector.broadcast %280 : vector<2x1xf32> to vector<2x128xf32>
    %282 = arith.subf %278, %281 : vector<2x128xf32>
    %283 = math.exp %282 : vector<2x128xf32>
    %cst_463 = arith.constant dense<0.000000e+00> : vector<2xf32>
    %284 = vector.multi_reduction <add>, %283, %cst_463 [1] : vector<2x128xf32> to vector<2xf32>
    %285 = vector.shape_cast %284 : vector<2xf32> to vector<2x1xf32>
    %286 = vector.broadcast %285 : vector<2x1xf32> to vector<2x128xf32>
    %287 = arith.divf %283, %286 : vector<2x128xf32>
    %c0_464 = arith.constant 0 : index
    %c0_465 = arith.constant 0 : index
    %288 = vector.load %arg7[%c0_464, %c0_465] : memref<2x128xf32, #tpu.memory_space<vmem>>, vector<2x128xf32>
    tpu.vector_store %arg7[%c0_464, %c0_465], %287 {strides = array<i32>} : memref<2x128xf32, #tpu.memory_space<vmem>>, vector<2x128xf32>,
    return
  }
  func.func @transform_0(%arg0: i32) -> (i32, i32) {
    %c0_i32 = arith.constant 0 : i32
    %c0_i32_0 = arith.constant 0 : i32
    return %arg0, %c0_i32 : i32, i32
  }
  func.func @transform_1(%arg0: i32) -> (i32, i32) {
    %c0_i32 = arith.constant 0 : i32
    %c0_i32_0 = arith.constant 0 : i32
    %c0_i32_1 = arith.constant 0 : i32
    return %c0_i32, %c0_i32_0 : i32, i32
  }
  func.func @transform_2(%arg0: i32) -> (i32, i32) {
    %c0_i32 = arith.constant 0 : i32
    %c0_i32_0 = arith.constant 0 : i32
    %c0_i32_1 = arith.constant 0 : i32
    return %c0_i32, %c0_i32_0 : i32, i32
  }
  func.func @transform_3(%arg0: i32) -> (i32, i32) {
    %c0_i32 = arith.constant 0 : i32
    %c0_i32_0 = arith.constant 0 : i32
    %c0_i32_1 = arith.constant 0 : i32
    return %c0_i32, %c0_i32_0 : i32, i32
  }
  func.func @transform_4(%arg0: i32) -> (i32, i32) {
    %c0_i32 = arith.constant 0 : i32
    %c0_i32_0 = arith.constant 0 : i32
    %c0_i32_1 = arith.constant 0 : i32
    return %c0_i32, %c0_i32_0 : i32, i32
  }
  func.func @transform_5(%arg0: i32) -> (i32, i32) {
    %c0_i32 = arith.constant 0 : i32
    %c0_i32_0 = arith.constant 0 : i32
    %c0_i32_1 = arith.constant 0 : i32
    return %c0_i32, %c0_i32_0 : i32, i32
  }
  func.func @transform_6(%arg0: i32) -> (i32, i32) {
    %c0_i32 = arith.constant 0 : i32
    %c0_i32_0 = arith.constant 0 : i32
    return %arg0, %c0_i32 : i32, i32
  }
}

</mosaic_0001>

<bundles_post_ra>
// kernel: tpu_custom_call.1
= control target key start
LH: loop header
LB: loop body
LE: loop exit
PB: predicated region body
PF: predicated region fallthrough
CT: control target
= control target key end

     0   :  { %11 = vsyncpa [#allocation4], 0  ;;  %s7136_s0 = inlined_call_operand.vmem [shape: bf16[2,256], index: 0, kind: input, shape index: {}]   ;;  %s7137_s1 = inlined_call_operand.hbm [shape: bf16[32,64], index: 1, kind: input, shape index: {}]   ;;  %s7138_s2 = inlined_call_operand.vmem [shape: f32[32,1], index: 2, kind: input, shape index: {}]   ;;  %s7139_s3 = inlined_call_operand.vmem [shape: f32[32,128], index: 3, kind: input, shape index: {}]   ;;  %s7140_s4 = inlined_call_operand.hbm [shape: f32[32,128], index: 4, kind: input, shape index: {}]   ;;  %s7141_s5 = inlined_call_operand.vmem [shape: f32[1,128], index: 5, kind: input, shape index: {}]   ;;  %s7142_s6 = inlined_call_operand.hbm [shape: f32[2,128], index: 6, kind: output, shape index: {}]  }
   0x1   :  { %12 = vsyncpa [#allocation7], 0 }
   0x2   :  { %13 = vsyncpa [#allocation5], 0  ;;  %s5714_s21 = smov [#allocation3]   ;;  %s5642_s25 = scalar_lea.hbm %s7137_s1, 256 }
   0x3   :  { %s21_s22 = sshll.u32 %s5714_s21, 4  ;;  %p5643_p0 = scmp.ne.s32.totalorder %s7137_s1, %s5642_s25  ;;  %s22_s22 = int_to_ptr.vmem [resolvable:$true] %s21_s22 }
   0x4   :  { %p5646_p1 = scmp.lt.u32.totalorder %s5642_s25, %s7137_s1 }
   0x6   :  { %p5648_p2 = pnand %p5646_p1, %p5643_p0 }
   0x8   :  { %5651 = shalt.err (!%p5648_p2)
}
   0x9   :  { %s5652_s30 = scalar_lea.vmem %s22_s22, 256  ;;  %p5657_p4 = scmp.lt.s32.totalorder %s22_s22, %s22_s22 }
   0xa   :  { %p5653_p3 = scmp.ne.s32.totalorder %s22_s22, %s5652_s30  ;;  %p5658_p5 = scmp.lt.s32.totalorder %s5652_s30, %s5652_s30 }
   0xc   :  { %p5659_p6 = por %p5658_p5, %p5657_p4 }
   0xe   :  { %p5660_p7 = pnand %p5659_p6, %p5653_p3 }
  0x10   :  { %5663 = shalt.err (!%p5660_p7)
}
  0x11   :  { %s5715_s7 = smov 64   ;;  %s5716_s8 = smov 4  }
  0x12   :  { %27 = dma.hbm_to_vmem [thread:$0]  %s7137_s1, 256, %s22_s22, [#allocation4], %s5715_s7, %s5715_s7, %s5716_s8  }
  0x13   :  { %s5717_s11 = smov [#allocation6]   ;;  %s5664_s15 = scalar_lea.hbm %s7140_s4, 512 }
  0x14   :  { %s37_s12 = sshll.u32 %s5717_s11, 4  ;;  %p5665_p8 = scmp.ne.s32.totalorder %s7140_s4, %s5664_s15  ;;  %s38_s12 = int_to_ptr.vmem [resolvable:$true] %s37_s12 }
  0x15   :  { %p5668_p9 = scmp.lt.u32.totalorder %s5664_s15, %s7140_s4 }
  0x17   :  { %p5670_p10 = pnand %p5668_p9, %p5665_p8 }
  0x19   :  { %5673 = shalt.err (!%p5670_p10)
}
  0x1a   :  { %s5674_s20 = scalar_lea.vmem %s38_s12, 512  ;;  %p5679_p12 = scmp.lt.s32.totalorder %s38_s12, %s38_s12 }
  0x1b   :  { %p5675_p11 = scmp.ne.s32.totalorder %s38_s12, %s5674_s20  ;;  %p5680_p13 = scmp.lt.s32.totalorder %s5674_s20, %s5674_s20 }
  0x1d   :  { %p5681_p0 = por %p5680_p13, %p5679_p12 }
  0x1f   :  { %p5682_p1 = pnand %p5681_p0, %p5675_p11 }
  0x21   :  { %5685 = shalt.err (!%p5682_p1)
}
  0x22   :  { %s5718_s1 = smov 128   ;;  %s5719_s21 = smov 8  }
  0x23   :  { %43 = dma.hbm_to_vmem [thread:$0]  %s7140_s4, 512, %s38_s12, [#allocation7], %s5718_s1, %s5718_s1, %s5719_s21  }
  0x24   :  { %5708 = dma.done.wait [#allocation4], 256  }
  0x25   :  { %5709 = vsyncadd [#allocation4], 4294967040 }
  0x26   :  { %5710 = dma.done.wait [#allocation7], 512  }
  0x27   :  { %5711 = vsyncadd [#allocation7], 4294966784  ;;  %v73_v0 = vlaneseq  ;;  %v5720_v1 = vmov 1966171168   ;;  %s5721_s4 = smov 124   ;;  %s5722_s26 = smov 126  }
  0x28   :  { %v71_v2 = vunpack.c.l.s4 %v5720_v1  ;;  %v5270_v6 = vld.sshfl [vmem:[%s7136_s0] sm:$0x11 pattern:$0x75316420]  ;;  %s5723_s27 = smov 122   ;;  %s5724_s28 = smov 120  }
  0x29   :  { %v74_v3 = vshrl.u32 %v73_v0, 7  ;;  %v2675_v8 = vcombine.high %v5270_v6, %v5270_v6  ;;  %v5588_v20 = vld [vmem:[%s7136_s0] ss:$0 sps:$4 sm:$0x33]   ;;  %s5725_s7 = smov 118   ;;  %s5726_s8 = smov 116   ;;  %v193_v30 = vcombine.low %v5270_v6, %v5270_v6 }
  0x2a   :  { %v72_v4 = vunpack.c.0.s8 %v71_v2  ;;  %v5589_v29 = vld [vmem:[%s7136_s0] ss:$0 sps:$4 sm:$0x33]   ;;  %s5727_s13 = smov 114   ;;  %s5728_s16 = smov 112   ;;  %vm7145_vm0 = vcmask 1042434  }
  0x2b   :  { %v5590_v31 = vld [vmem:[%s7136_s0] ss:$0 sps:$4 sm:$0x33]   ;;  %s5729_s17 = smov 110   ;;  %s5730_s18 = smov 108   ;;  %vm212_vm2 = vcmask 1014784  }
  0x2c   :  { %v5848_v5 = vsub.s32 %v72_v4, %v74_v3  ;;  %v5591_v41 = vld [vmem:[%s7136_s0] ss:$0 sps:$4 sm:$0x33]   ;;  %s5731_s19 = smov 106   ;;  %s5732_s20 = smov 104   ;;  %vm7144_vm4 = vcmask 1043459  }
  0x2d   :  { %s5733_s1 = smov 102   ;;  %v5592_v55 = vld [vmem:[%s7136_s0] ss:$0 sps:$4 sm:$0x33]   ;;  %s5734_s23 = smov 100   ;;  %vm294_vm6 = vcmask 998400  }
  0x2e   :  { %v5854_v7 = vrot.slane %v5270_v6, %v5848_v5  ;;  %v5860_v10 = vrot.slane %v2675_v8, %v5848_v5  ;;  %v111_v25 = vrot.slane %v5588_v20, %v5848_v5  ;;  %v274_v34 = vrot.slane %v5589_v29, %v5848_v5  ;;  %s5735_s24 = smov 98   ;;  %v5593_v58 = vld [vmem:[%s7136_s0] ss:$0 sps:$4 sm:$0x33]   ;;  %s5736_s30 = smov 96  }
  0x2f   :  { %v5951_v35 = vrot.slane %v193_v30, %v5848_v5  ;;  %v439_v37 = vrot.slane %v5590_v31, %v5848_v5  ;;  %v606_v46 = vrot.slane %v5591_v41, %v5848_v5  ;;  %v764_v56 = vrot.slane %v5592_v55, %v5848_v5  ;;  %v5594_v62 = vld [vmem:[%s7136_s0] ss:$0 sps:$4 sm:$0x33]   ;;  %s5739_s9 = smov 90   ;;  %s5740_s10 = smov 88  }
  0x30   :  { %v5857_v9 = vshrl.u32 %v5854_v7, 16  ;;  %v5869_v13 = vshrl.u32 %v5860_v10, 16  ;;  %v112_v28 = vcombine.high %v111_v25, %v111_v25  ;;  %v119_v32 = vrot.slane %v111_v25, %v5848_v5  ;;  %v5595_v4 = vld [vmem:[%s7136_s0] ss:$0 sps:$4 sm:$0x33]   ;;  %s5741_s11 = smov 86  }
  0x31   :  { %v275_v36 = vcombine.low %v274_v34, %v274_v34  ;;  %v289_v39 = vrot.slane %v274_v34, %v5848_v5  ;;  %v440_v40 = vcombine.high %v439_v37, %v439_v37  ;;  %v5965_v42 = vcombine.low %v5854_v7, %v5854_v7  ;;  %s5742_s14 = smov 84   ;;  %s5743_s15 = smov 82  }
  0x32   :  { %v5863_v11 = vrot.slane %v5857_v9, 6  ;;  %v5866_v12 = vrot.slane %v5857_v9, 7  ;;  %v5876_v14 = vrot.slane %v5869_v13, 6  ;;  %v5879_v15 = vrot.slane %v5857_v9, 5  ;;  %s5756_s21 = smov 72   ;;  %s5758_s25 = smov 68  }
  0x33   :  { %v5886_v16 = vrot.slane %v5869_v13, 5  ;;  %v5889_v17 = vrot.slane %v5857_v9, 4  ;;  %v5896_v18 = vrot.slane %v5869_v13, 4  ;;  %v5899_v19 = vrot.slane %v5857_v9, 3  ;;  %s5765_s22 = smov 101   ;;  %s5772_s12 = smov 87  }
  0x34   :  { %2698 = vrot.lane.b32.xlu1 %v5863_v11, %s5721_s4  ;;  %2623 = vrot.lane.b32.xlu0 %v5866_v12, %s5722_s26  ;;  %v5909_v21 = vrot.slane %v5869_v13, 3  ;;  %v5912_v22 = vrot.slane %v5869_v13, 7  ;;  %v5919_v23 = vrot.slane %v5869_v13, 2  ;;  %v5922_v24 = vrot.slane %v5857_v9, 2  ;;  %s5782_s29 = smov 67  }
  0x35   :  { %v5930_v26 = vrot.slane %v5869_v13, 1  ;;  %v5933_v27 = vrot.slane %v5857_v9, 1  ;;  %v126_v33 = vrot.slane %v112_v28, %v5848_v5  ;;  %v282_v38 = vrot.slane %v275_v36, %v5848_v5 }
  0x36   :  { %v5969_v43 = vcombine.low %v5860_v10, %v5860_v10  ;;  %v447_v44 = vrot.slane %v439_v37, %v5848_v5  ;;  %v454_v45 = vrot.slane %v440_v40, %v5848_v5  ;;  %v607_v49 = vcombine.low %v606_v46, %v606_v46 }
  0x37   :  { %v5984_v50 = vcombine.low %v5951_v35, %v5951_v35  ;;  %v621_v52 = vrot.slane %v606_v46, %v5848_v5  ;;  %v765_v57 = vcombine.high %v764_v56, %v764_v56  ;;  %v772_v59 = vrot.slane %v764_v56, %v5848_v5  ;;  %v2778_v46 = vld [vmem:[#allocation2 + $0x8] sm:$0x8]  ;;  %v2629_v56 = vld [vmem:[#allocation2 + $0x8] sm:$0x2] }
  0x38   :  { %2700 = vrot.lane.b32.xlu1 %v5876_v14, %s5721_s4  ;;  %2772 = vrot.lane.b32.xlu0 %v5879_v15, %s5723_s27  ;;  %v455_v47 = vcombine.low %v447_v44, %v447_v44  ;;  %v456_v48 = vcombine.low %v454_v45, %v454_v45  ;;  %v614_v51 = vrot.slane %v607_v49, %v5848_v5  ;;  %vm216_vm1 = vsmask.f32 2304 }
  0x39   :  { %v623_v54 = vcombine.low %v621_v52, %v621_v52  ;;  %v779_v60 = vrot.slane %v765_v57, %v5848_v5  ;;  %v917_v61 = vrot.slane %v5593_v58, %v5848_v5  ;;  %v1072_v0 = vrot.slane %v5594_v62, %v5848_v5  ;;  %vm6071_vm3 = vmand %vm7145_vm0, %vm216_vm1  ;;  %v3006_v62 = vld [vmem:[#allocation2 + $0x8] sm:$0x40] }
  0x3a   :  { %v622_v53 = vcombine.low %v614_v51, %v614_v51  ;;  %v1229_v20 = vrot.slane %v5595_v4, %v5848_v5  ;;  %vm298_vm5 = vsmask.f32 3328  ;;  %vm7143_vm8 = vcmask 1044484  }
  0x3b   :  { %v918_v63 = vcombine.low %v917_v61, %v917_v61  ;;  %v932_v2 = vrot.slane %v917_v61, %v5848_v5  ;;  %v1073_v3 = vcombine.high %v1072_v0, %v1072_v0  ;;  %v1080_v6 = vrot.slane %v1072_v0, %v5848_v5  ;;  %vm6083_vm7 = vmand %vm7144_vm4, %vm298_vm5 }
  0x3c   :  { %2774 = vrot.lane.b32.xlu1 %v5886_v16, %s5723_s27  ;;  %2847 = vrot.lane.b32.xlu0 %v5889_v17, %s5724_s28  ;;  %v1230_v29 = vcombine.low %v1229_v20, %v1229_v20  ;;  %v1244_v31 = vrot.slane %v1229_v20, %v5848_v5  ;;  %vm381_vm9 = vsmask.f32 4352  ;;  %vm377_vm10 = vcmask 982016  }
  0x3d   :  { %v925_v1 = vrot.slane %v918_v63, %v5848_v5  ;;  %v1087_v8 = vrot.slane %v1073_v3, %v5848_v5  ;;  %v1088_v25 = vcombine.low %v1080_v6, %v1080_v6  ;;  %vm6095_vm11 = vmand %vm7143_vm8, %vm381_vm9  ;;  %vm7146_vm12 = vcmask 1045509  }
  0x3e   :  { %v1237_v30 = vrot.slane %v1230_v29, %v5848_v5  ;;  %vm465_vm13 = vsmask.f32 5376  ;;  %vm7147_vm14 = vcmask 1041409   ;;  %vm135_vm15 = vsmask.f32 1280 }
  0x3f   :  { %v1089_v28 = vcombine.low %v1087_v8, %v1087_v8  ;;  %vm461_vm1 = vcmask 965632   ;;  %vm6107_vm5 = vmand %vm7146_vm12, %vm465_vm13  ;;  %vm131_vm9 = vcmask 1031168   ;;  %vm7148_vm4 = vcmask 1046534  }
  0x40   :  { %2849 = vrot.lane.b32.xlu1 %v5896_v18, %s5724_s28  ;;  %2923 = vrot.lane.b32.xlu0 %v5899_v19, %s5725_s7  ;;  %vm6112_vm8 = vmand %vm7147_vm14, %vm135_vm15  ;;  %vm548_vm0 = vsmask.f32 6400  ;;  %vm544_vm13 = vcmask 949248   ;;  %v7184_v61 = vmov 0  ;;  %vm7149_vm12 = vcmask 1047559  }
  0x41   :  { %vm6127_vm15 = vmand %vm7148_vm4, %vm548_vm0  ;;  %vm632_vm14 = vsmask.f32 7424  ;;  %vm628_vm0 = vcmask 932864  }
  0x42   :  { %v7185_v61 = vsel %vm6127_vm15, 4294967295, %v7184_v61  ;;  %vm6139_vm4 = vmand %vm7149_vm12, %vm632_vm14  ;;  %vm709_vm14 = vcmask 916480   ;;  %vm1172_vm12 = vcmask 818176  }
  0x44   :  { %2925 = vrot.lane.b32.xlu1 %v5909_v21, %s5725_s7  ;;  %2625 = vrot.lane.b32.xlu0 %v5912_v22, %s5722_s26 }
  0x48   :  { %3002 = vrot.lane.b32.xlu1 %v5919_v23, %s5726_s8  ;;  %3000 = vrot.lane.b32.xlu0 %v5922_v24, %s5726_s8 }
  0x4c   :  { %3078 = vrot.lane.b32.xlu1 %v5930_v26, %s5727_s13  ;;  %3076 = vrot.lane.b32.xlu0 %v5933_v27, %s5727_s13 }
  0x50   :  { %127 = vrot.lane.b32.xlu0 %v119_v32, %s5722_s26  ;;  %129 = vrot.lane.b32.xlu1 %v126_v33, %s5722_s26  ;;  %v1245_v32 = vcombine.low %v1237_v30, %v1237_v30  ;;  %v1246_v33 = vcombine.low %v1244_v31, %v1244_v31  ;;  %s5778_s26 = smov 75  }
  0x54   :  { %208 = vrot.lane.b32.xlu0 %v5951_v35, %s5721_s4  ;;  %210 = vrot.lane.b32.xlu1 %v5854_v7, %s5721_s4  ;;  %s5759_s4 = smov 66  }
  0x58   :  { %290 = vrot.lane.b32.xlu0 %v282_v38, %s5723_s27  ;;  %292 = vrot.lane.b32.xlu1 %v289_v39, %s5723_s27  ;;  %v2704_v38 = vld [vmem:[#allocation2 + $0x8] sm:$0x4]  ;;  %s5780_s27 = smov 71  }
  0x5c   :  { %373 = vrot.lane.b32.xlu0 %v5965_v42, %s5724_s28  ;;  %375 = vrot.lane.b32.xlu1 %v5969_v43, %s5724_s28  ;;  %s5744_s28 = smov 127  }
  0x60   :  { %457 = vrot.lane.b32.xlu0 %v455_v47, %s5725_s7  ;;  %459 = vrot.lane.b32.xlu1 %v456_v48, %s5725_s7  ;;  %s5737_s7 = smov 94  }
  0x64   :  { %540 = vrot.lane.b32.xlu0 %v5984_v50, %s5726_s8  ;;  %542 = vrot.lane.b32.xlu1 %v5965_v42, %s5726_s8  ;;  %s5738_s8 = smov 92  }
  0x68   :  { %624 = vrot.lane.b32.xlu0 %v622_v53, %s5727_s13  ;;  %626 = vrot.lane.b32.xlu1 %v623_v54, %s5727_s13  ;;  %v2929_v54 = vld [vmem:[#allocation2 + $0x8] sm:$0x20]  ;;  %s5773_s13 = smov 85  }
  0x6c   :  { %3151 = vrot.lane.b32.xlu0 %v5857_v9, %s5728_s16  ;;  %3153 = vrot.lane.b32.xlu1 %v5869_v13, %s5728_s16 }
  0x70   :  { %3225 = vrot.lane.b32.xlu0 %v5866_v12, %s5729_s17  ;;  %3227 = vrot.lane.b32.xlu1 %v5912_v22, %s5729_s17 }
  0x74   :  { %3300 = vrot.lane.b32.xlu0 %v5863_v11, %s5730_s18  ;;  %3302 = vrot.lane.b32.xlu1 %v5876_v14, %s5730_s18 }
  0x78   :  { %3374 = vrot.lane.b32.xlu0 %v5879_v15, %s5731_s19  ;;  %3376 = vrot.lane.b32.xlu1 %v5886_v16, %s5731_s19 }
  0x7c   :  { %3449 = vrot.lane.b32.xlu0 %v5889_v17, %s5732_s20  ;;  %3451 = vrot.lane.b32.xlu1 %v5896_v18, %s5732_s20 }
  0x80   :  { %3525 = vrot.lane.b32.xlu0 %v5899_v19, %s5733_s1  ;;  %3527 = vrot.lane.b32.xlu1 %v5909_v21, %s5733_s1 }
  0x84   :  { %3602 = vrot.lane.b32.xlu0 %v5922_v24, %s5734_s23  ;;  %3604 = vrot.lane.b32.xlu1 %v5919_v23, %s5734_s23 }
  0x88   :  { %3678 = vrot.lane.b32.xlu0 %v5933_v27, %s5735_s24  ;;  %3680 = vrot.lane.b32.xlu1 %v5930_v26, %s5735_s24 }
  0x8c   :  { %705 = vrot.lane.b32.xlu0 %v5854_v7, %s5728_s16  ;;  %707 = vrot.lane.b32.xlu1 %v5860_v10, %s5728_s16  ;;  %s5750_s16 = smov 115  }
  0x90   :  { %780 = vrot.lane.b32.xlu0 %v772_v59, %s5729_s17  ;;  %782 = vrot.lane.b32.xlu1 %v779_v60, %s5729_s17  ;;  %s5751_s17 = smov 113  }
  0x94   :  { %856 = vrot.lane.b32.xlu0 %v5951_v35, %s5730_s18  ;;  %858 = vrot.lane.b32.xlu1 %v5854_v7, %s5730_s18  ;;  %s5752_s18 = smov 80  }
  0x98   :  { %933 = vrot.lane.b32.xlu0 %v925_v1, %s5731_s19  ;;  %935 = vrot.lane.b32.xlu1 %v932_v2, %s5731_s19  ;;  %v3082_v2 = vld [vmem:[#allocation2 + $0x8] sm:$0x80]  ;;  %s5753_s19 = smov 78  }
  0x9c   :  { %1011 = vrot.lane.b32.xlu0 %v5965_v42, %s5732_s20  ;;  %1013 = vrot.lane.b32.xlu1 %v5969_v43, %s5732_s20  ;;  %s5754_s20 = smov 76  }
  0xa0   :  { %1090 = vrot.lane.b32.xlu0 %v1088_v25, %s5733_s1  ;;  %1092 = vrot.lane.b32.xlu1 %v1089_v28, %s5733_s1  ;;  %s5755_s1 = smov 74  }
  0xa4   :  { %1168 = vrot.lane.b32.xlu0 %v5984_v50, %s5734_s23  ;;  %1170 = vrot.lane.b32.xlu1 %v5965_v42, %s5734_s23  ;;  %v2853_v50 = vld [vmem:[#allocation2 + $0x8] sm:$0x10]  ;;  %s5766_s23 = smov 99  }
  0xa6   :  { %v2699_v34 = vpop.permute.xlu1 %2698  ;;  %v2624_v36 = vpop.permute.xlu0 %2623 }
  0xa8   :  { %1247 = vrot.lane.b32.xlu0 %v1245_v32, %s5735_s24  ;;  %1249 = vrot.lane.b32.xlu1 %v1246_v33, %s5735_s24  ;;  %s5757_s24 = smov 70  }
  0xaa   :  { %v2701_v39 = vpop.permute.xlu1 %2700  ;;  %v2773_v40 = vpop.permute.xlu0 %2772 }
  0xab   :  { %v2702_v41 = vsel %vm212_vm2, %v2699_v34, %v2701_v39  ;;  %v300_v34 = vld [vmem:[#allocation2] sm:$0x8]  ;;  %v5598_v39 = vld [vmem:[%s7136_s0] ss:$0 sps:$4 sm:$0x33]  }
  0xac   :  { %v2705_v44 = vsel %vm6071_vm3, %v2702_v41, %v2704_v38  ;;  %3753 = vrot.lane.b32.xlu0 %v5857_v9, %s5736_s30  ;;  %3755 = vrot.lane.b32.xlu1 %v5869_v13, %s5736_s30  ;;  %v5619_v13 = vld [vmem:[%s7136_s0] ss:$0 sps:$4 sm:$0x33]  }
  0xad   :  { %2706 = vst [vmem:[#allocation2 + $0x8] sm:$0x4] %v2705_v44 }
  0xae   :  { %v2775_v47 = vpop.permute.xlu1 %2774  ;;  %v2848_v48 = vpop.permute.xlu0 %2847 }
  0xaf   :  { %v2776_v49 = vsel %vm294_vm6, %v2773_v40, %v2775_v47 }
  0xb0   :  { %v2779_v9 = vsel %vm6083_vm7, %v2776_v49, %v2778_v46  ;;  %3827 = vrot.lane.b32.xlu0 %v5866_v12, %s5737_s7  ;;  %3829 = vrot.lane.b32.xlu1 %v5912_v22, %s5737_s7  ;;  %v7180_v22 = vmov 0  ;;  %v383_v46 = vld [vmem:[#allocation2] sm:$0x10]  ;;  %v1690_v49 = vrot.slane %v5598_v39, %v5848_v5 }
  0xb1   :  { %2780 = vst [vmem:[#allocation2 + $0x8] sm:$0x8] %v2779_v9  ;;  %v7181_v22 = vsel %vm6107_vm5, 4294967295, %v7180_v22 }
  0xb2   :  { %v2850_v51 = vpop.permute.xlu1 %2849  ;;  %v2924_v52 = vpop.permute.xlu0 %2923 }
  0xb3   :  { %v2851_v53 = vsel %vm377_vm10, %v2848_v48, %v2850_v51  ;;  %v467_v51 = vld [vmem:[#allocation2] sm:$0x20] }
  0xb4   :  { %v2854_v12 = vsel %vm6095_vm11, %v2851_v53, %v2853_v50  ;;  %3902 = vrot.lane.b32.xlu0 %v5863_v11, %s5738_s8  ;;  %3904 = vrot.lane.b32.xlu1 %v5876_v14, %s5738_s8 }
  0xb5   :  { %2855 = vst [vmem:[#allocation2 + $0x8] sm:$0x10] %v2854_v12  ;;  %v1691_v12 = vcombine.high %v1690_v49, %v1690_v49 }
  0xb6   :  { %v2926_v57 = vpop.permute.xlu1 %2925  ;;  %v2626_v58 = vpop.permute.xlu0 %2625 }
  0xb7   :  { %v2927_v11 = vsel %vm461_vm1, %v2924_v52, %v2926_v57  ;;  %v2627_v14 = vsel %vm131_vm9, %v2624_v36, %v2626_v58  ;;  %v5599_v57 = vld [vmem:[%s7136_s0] ss:$0 sps:$4 sm:$0x33]  }
  0xb8   :  { %v2930_v59 = vsel %vm6107_vm5, %v2927_v11, %v2929_v54  ;;  %v2630_v60 = vsel %vm6112_vm8, %v2627_v14, %v2629_v56  ;;  %3976 = vrot.lane.b32.xlu0 %v5879_v15, %s5739_s9  ;;  %3978 = vrot.lane.b32.xlu1 %v5886_v16, %s5739_s9  ;;  %v7186_v16 = vmov 0  ;;  %v5267_v54 = vld.sshfl [vmem:[%s7136_s0] sm:$0x1 pattern:$0x75316420] }
  0xb9   :  { %2931 = vst [vmem:[#allocation2 + $0x8] sm:$0x20] %v2930_v59  ;;  %2631 = vst [vmem:[#allocation2 + $0x8] sm:$0x2] %v2630_v60  ;;  %v7187_v16 = vsel %vm6139_vm4, 4294967295, %v7186_v16  ;;  %v2550_v58 = vrot.slane %v5267_v54, %v5848_v5 }
  0xba   :  { %v3003_v63 = vpop.permute.xlu1 %3002  ;;  %v3001_v0 = vpop.permute.xlu0 %3000  ;;  %v550_v14 = vld [vmem:[#allocation2] sm:$0x40] }
  0xbb   :  { %v3004_v1 = vsel %vm544_vm13, %v3001_v0, %v3003_v63  ;;  %v2552_v63 = vshrl.u32 %v2550_v58, 16 }
  0xbc   :  { %v3007_v15 = vsel %vm6127_vm15, %v3004_v1, %v3006_v62  ;;  %4051 = vrot.lane.b32.xlu0 %v5889_v17, %s5740_s10  ;;  %4053 = vrot.lane.b32.xlu1 %v5896_v18, %s5740_s10  ;;  %v5596_v17 = vld [vmem:[%s7136_s0] ss:$0 sps:$4 sm:$0x33]   ;;  %v137_v18 = vld [vmem:[#allocation2] sm:$0x2] }
  0xbd   :  { %3008 = vst [vmem:[#allocation2 + $0x8] sm:$0x40] %v3007_v15  ;;  %v6209_v62 = vld.sshfl [vmem:[%s7136_s0] sm:$0x11 pattern:$0x75316420] }
  0xbe   :  { %v3079_v3 = vpop.permute.xlu1 %3078  ;;  %v3077_v4 = vpop.permute.xlu0 %3076  ;;  %v2555_v15 = vld [vmem:[#allocation2 + $0x8] sm:$0x1] }
  0xbf   :  { %v3080_v6 = vsel %vm628_vm0, %v3077_v4, %v3079_v3  ;;  %v1705_v3 = vrot.slane %v1691_v12, %v5848_v5  ;;  %v1847_v4 = vrot.slane %v5599_v57, %v5848_v5  ;;  %v3380_v57 = vld [vmem:[#allocation2 + $0x18] sm:$0x8] }
  0xc0   :  { %v3083_v8 = vsel %vm6139_vm4, %v3080_v6, %v3082_v2  ;;  %4127 = vrot.lane.b32.xlu0 %v5899_v19, %s5741_s11  ;;  %4129 = vrot.lane.b32.xlu1 %v5909_v21, %s5741_s11  ;;  %v1382_v19 = vrot.slane %v5596_v17, %v5848_v5  ;;  %v218_v21 = vld [vmem:[#allocation2] sm:$0x4]  ;;  %v1769_v17 = vcombine.low %v6209_v62, %v6209_v62 }
  0xc1   :  { %3084 = vst [vmem:[#allocation2 + $0x8] sm:$0x80] %v3083_v8 }
  0xc2   :  { %v128_v20 = vpop.permute.xlu0 %127  ;;  %v130_v25 = vpop.permute.xlu1 %129 }
  0xc3   :  { %v132_v28 = vsel %vm131_vm9, %v128_v20, %v130_v25  ;;  %vm860_vm9 = vcmask 883712  }
  0xc4   :  { %v138_v29 = vsel %vm6112_vm8, %v132_v28, %v137_v18  ;;  %4204 = vrot.lane.b32.xlu0 %v5922_v24, %s5742_s14  ;;  %4206 = vrot.lane.b32.xlu1 %v5919_v23, %s5742_s14  ;;  %v1383_v24 = vcombine.high %v1382_v19, %v1382_v19  ;;  %v5597_v23 = vld [vmem:[%s7136_s0] ss:$0 sps:$4 sm:$0x33]   ;;  %v634_v18 = vld [vmem:[#allocation2] sm:$0x80] }
  0xc5   :  { %139 = vst [vmem:[#allocation2] sm:$0x2] %v138_v29  ;;  %v1535_v44 = vrot.slane %v5597_v23, %v5848_v5 }
  0xc6   :  { %v209_v30 = vpop.permute.xlu0 %208  ;;  %v211_v31 = vpop.permute.xlu1 %210  ;;  %v1397_v41 = vrot.slane %v1383_v24, %v5848_v5 }
  0xc7   :  { %v213_v32 = vsel %vm212_vm2, %v209_v30, %v211_v31  ;;  %vm7150_vm2 = vcmask 1040384   ;;  %v1550_v60 = vrot.slane %v1535_v44, %v5848_v5  ;;  %v6236_v31 = vrot.slane %v1769_v17, %v5848_v5 }
  0xc8   :  { %v219_v33 = vsel %vm6071_vm3, %v213_v32, %v218_v21  ;;  %4280 = vrot.lane.b32.xlu0 %v5933_v27, %s5743_s15  ;;  %4282 = vrot.lane.b32.xlu1 %v5930_v26, %s5743_s15  ;;  %v1390_v27 = vrot.slane %v1382_v19, %v5848_v5  ;;  %v1707_v19 = vcombine.low %v1705_v3, %v1705_v3 }
  0xc9   :  { %220 = vst [vmem:[#allocation2] sm:$0x4] %v219_v33  ;;  %v1848_v21 = vcombine.low %v1847_v4, %v1847_v4  ;;  %v6240_v32 = vrot.slane %v6209_v62, %v5848_v5  ;;  %v3157_v33 = vld [vmem:[#allocation2 + $0x18] sm:$0x1] }
  0xca   :  { %v291_v36 = vpop.permute.xlu0 %290  ;;  %v293_v38 = vpop.permute.xlu1 %292 }
  0xcb   :  { %v295_v40 = vsel %vm294_vm6, %v291_v36, %v293_v38  ;;  %vm55_vm6 = vsmask.f32 256  ;;  %v1855_v36 = vrot.slane %v1848_v21, %v5848_v5  ;;  %v6251_v38 = vcombine.low %v6236_v31, %v6236_v31 }
  0xcc   :  { %v301_v26 = vsel %vm6083_vm7, %v295_v40, %v300_v34  ;;  %1323 = vrot.lane.b32.xlu0 %v5854_v7, %s5736_s30  ;;  %1325 = vrot.lane.b32.xlu1 %v5860_v10, %s5736_s30  ;;  %v1536_v10 = vcombine.low %v1535_v44, %v1535_v44  ;;  %v6255_v39 = vcombine.low %v6240_v32, %v6240_v32  ;;  %v5600_v40 = vld [vmem:[%s7136_s0] ss:$0 sps:$4 sm:$0x33]   ;;  %s5783_s30 = smov 65  }
  0xcd   :  { %302 = vst [vmem:[#allocation2] sm:$0x8] %v301_v26 }
  0xce   :  { %v374_v47 = vpop.permute.xlu0 %373  ;;  %v376_v48 = vpop.permute.xlu1 %375  ;;  %v1543_v59 = vrot.slane %v1536_v10, %v5848_v5 }
  0xcf   :  { %v378_v9 = vsel %vm377_vm10, %v374_v47, %v376_v48  ;;  %vm6212_vm10 = vmand %vm7150_vm2, %vm55_vm6  ;;  %vm1094_vm6 = vcmask 834560   ;;  %vm1251_vm2 = vcmask 801792  }
  0xd0   :  { %v384_v50 = vsel %vm6095_vm11, %v378_v9, %v383_v46  ;;  %1398 = vrot.lane.b32.xlu0 %v1390_v27, %s5737_s7  ;;  %1400 = vrot.lane.b32.xlu1 %v1397_v41, %s5737_s7  ;;  %v2556_v6 = vsel %vm6212_vm10, %v2552_v63, %v2555_v15  ;;  %v3231_v27 = vld [vmem:[#allocation2 + $0x18] sm:$0x2]  ;;  %v1863_v46 = vcombine.low %v1855_v36, %v1855_v36  ;;  %s5745_s7 = smov 125  }
  0xd1   :  { %385 = vst [vmem:[#allocation2] sm:$0x10] %v384_v50  ;;  %2557 = vst [vmem:[#allocation2 + $0x8] sm:$0x1] %v2556_v6  ;;  %v2641_v9 = vrot.slane %v5600_v40, %v5848_v5  ;;  %v3306_v50 = vld [vmem:[#allocation2 + $0x18] sm:$0x4] }
  0xd2   :  { %v458_v52 = vpop.permute.xlu0 %457  ;;  %v460_v53 = vpop.permute.xlu1 %459 }
  0xd3   :  { %v462_v56 = vsel %vm461_vm1, %v458_v52, %v460_v53  ;;  %vm784_vm1 = vcmask 900096   ;;  %v5601_v53 = vld [vmem:[%s7136_s0] ss:$0 sps:$4 sm:$0x33]  }
  0xd4   :  { %v468_v11 = vsel %vm6107_vm5, %v462_v56, %v467_v51  ;;  %1474 = vrot.lane.b32.xlu0 %v5951_v35, %s5738_s8  ;;  %1476 = vrot.lane.b32.xlu1 %v5854_v7, %s5738_s8  ;;  %v1698_v7 = vrot.slane %v1690_v49, %v5848_v5  ;;  %v2567_v49 = vcombine.high %v6209_v62, %v6209_v62 }
  0xd5   :  { %469 = vst [vmem:[#allocation2] sm:$0x20] %v468_v11  ;;  %v2642_v56 = vcombine.high %v2641_v9, %v2641_v9  ;;  %v2649_v62 = vrot.slane %v2641_v9, %v5848_v5 }
  0xd6   :  { %v541_v0 = vpop.permute.xlu0 %540  ;;  %v543_v1 = vpop.permute.xlu1 %542  ;;  %v1706_v29 = vcombine.low %v1698_v7, %v1698_v7  ;;  %v6279_v54 = vrot.slane %v2567_v49, %v5848_v5 }
  0xd7   :  { %v545_v2 = vsel %vm544_vm13, %v541_v0, %v543_v1  ;;  %vm937_vm13 = vcmask 867328   ;;  %v2656_v63 = vrot.slane %v2642_v56, %v5848_v5  ;;  %v5602_v0 = vld [vmem:[%s7136_s0] ss:$0 sps:$4 sm:$0x33]   ;;  %v3455_v1 = vld [vmem:[#allocation2 + $0x18] sm:$0x10] }
  0xd8   :  { %v551_v8 = vsel %vm6127_vm15, %v545_v2, %v550_v14  ;;  %1551 = vrot.lane.b32.xlu0 %v1543_v59, %s5739_s9  ;;  %1553 = vrot.lane.b32.xlu1 %v1550_v60, %s5739_s9  ;;  %v2790_v59 = vrot.slane %v5601_v53, %v5848_v5  ;;  %v2941_v6 = vrot.slane %v5602_v0, %v5848_v5 }
  0xd9   :  { %552 = vst [vmem:[#allocation2] sm:$0x40] %v551_v8  ;;  %v3531_v8 = vld [vmem:[#allocation2 + $0x18] sm:$0x20] }
  0xda   :  { %v625_v20 = vpop.permute.xlu0 %624  ;;  %v627_v25 = vpop.permute.xlu1 %626  ;;  %v2791_v3 = vcombine.low %v2790_v59, %v2790_v59  ;;  %v2942_v21 = vcombine.high %v2941_v6, %v2941_v6 }
  0xdb   :  { %v629_v28 = vsel %vm628_vm0, %v625_v20, %v627_v25  ;;  %vm1015_vm0 = vcmask 850944  }
  0xdc   :  { %v635_v30 = vsel %vm6139_vm4, %v629_v28, %v634_v18  ;;  %1629 = vrot.lane.b32.xlu0 %v5965_v42, %s5740_s10  ;;  %1631 = vrot.lane.b32.xlu1 %v5969_v43, %s5740_s10  ;;  %v1862_v42 = vrot.slane %v1847_v4, %v5848_v5  ;;  %v2798_v25 = vrot.slane %v2791_v3, %v5848_v5  ;;  %v5603_v28 = vld [vmem:[%s7136_s0] ss:$0 sps:$4 sm:$0x33]   ;;  %s5746_s10 = smov 123   ;;  %v863_v3 = vld [vmem:[#allocation2 + $0x10] sm:$0x4] }
  0xdd   :  { %636 = vst [vmem:[#allocation2] sm:$0x80] %v635_v30  ;;  %v3608_v30 = vld [vmem:[#allocation2 + $0x18] sm:$0x40]  ;;  %v3094_v36 = vrot.slane %v5603_v28, %v5848_v5  ;;  %v2956_v40 = vrot.slane %v2942_v21, %v5848_v5  ;;  %v940_v21 = vld [vmem:[#allocation2 + $0x10] sm:$0x8] }
  0xde   :  { %v3152_v24 = vpop.permute.xlu0 %3151  ;;  %v3154_v23 = vpop.permute.xlu1 %3153  ;;  %v1864_v47 = vcombine.low %v1862_v42, %v1862_v42 }
  0xdf   :  { %v3155_v34 = vsel %vm709_vm14, %v3152_v24, %v3154_v23 }
  0xe0   :  { %v3158_v43 = vsel %vm6212_vm10, %v3155_v34, %v3157_v33  ;;  %1708 = vrot.lane.b32.xlu0 %v1706_v29, %s5741_s11  ;;  %1710 = vrot.lane.b32.xlu1 %v1707_v19, %s5741_s11  ;;  %v2805_v19 = vrot.slane %v2790_v59, %v5848_v5  ;;  %v6315_v34 = vcombine.low %v6279_v54, %v6279_v54  ;;  %s5747_s11 = smov 121   ;;  %v787_v59 = vld [vmem:[#allocation2 + $0x10] sm:$0x2] }
  0xe1   :  { %3159 = vst [vmem:[#allocation2 + $0x18] sm:$0x1] %v3158_v43  ;;  %v2949_v43 = vrot.slane %v2941_v6, %v5848_v5 }
  0xe2   :  { %v3226_v26 = vpop.permute.xlu0 %3225  ;;  %v3228_v41 = vpop.permute.xlu1 %3227 }
  0xe3   :  { %v3229_v44 = vsel %vm784_vm1, %v3226_v26, %v3228_v41  ;;  %v53_v26 = vld [vmem:[%s7136_s0] sm:$0x1] }
  0xe4   :  { %v3232_v48 = vsel %vm6112_vm8, %v3229_v44, %v3231_v27  ;;  %1786 = vrot.lane.b32.xlu0 %v6251_v38, %s5742_s14  ;;  %1788 = vrot.lane.b32.xlu1 %v6255_v39, %s5742_s14  ;;  %v3684_v27 = vld [vmem:[#allocation2 + $0x18] sm:$0x80]  ;;  %s5748_s14 = smov 119  }
  0xe5   :  { %3233 = vst [vmem:[#allocation2 + $0x18] sm:$0x2] %v3232_v48  ;;  %v3095_v48 = vcombine.low %v3094_v36, %v3094_v36 }
  0xe6   :  { %v3301_v10 = vpop.permute.xlu0 %3300  ;;  %v3303_v51 = vpop.permute.xlu1 %3302 }
  0xe7   :  { %v3304_v52 = vsel %vm860_vm9, %v3301_v10, %v3303_v51  ;;  %v2958_v10 = vcombine.low %v2956_v40, %v2956_v40  ;;  %v712_v51 = vld [vmem:[#allocation2 + $0x10] sm:$0x1]  ;;  %v3102_v56 = vrot.slane %v3095_v48, %v5848_v5 }
  0xe8   :  { %v3307_v12 = vsel %vm6071_vm3, %v3304_v52, %v3306_v50  ;;  %1865 = vrot.lane.b32.xlu0 %v1863_v46, %s5743_s15  ;;  %1867 = vrot.lane.b32.xlu1 %v1864_v47, %s5743_s15  ;;  %v57_v46 = vld [vmem:[#allocation2] sm:$0x1]  ;;  %v2957_v50 = vcombine.low %v2949_v43, %v2949_v43  ;;  %s5749_s15 = smov 117  }
  0xe9   :  { %3308 = vst [vmem:[#allocation2 + $0x18] sm:$0x4] %v3307_v12  ;;  %v58_v49 = vsel %vm6212_vm10, %v53_v26, %v57_v46  ;;  %v3110_v0 = vcombine.low %v3102_v56, %v3102_v56 }
  0xea   :  { %v3375_v58 = vpop.permute.xlu0 %3374  ;;  %v3377_v11 = vpop.permute.xlu1 %3376  ;;  %59 = vst [vmem:[#allocation2] sm:$0x1] %v58_v49 }
  0xeb   :  { %v3378_v14 = vsel %vm937_vm13, %v3375_v58, %v3377_v11  ;;  %v6340_v58 = vshll.u32 %v6240_v32, 16 }
  0xec   :  { %v3381_v60 = vsel %vm6083_vm7, %v3378_v14, %v3380_v57  ;;  %2582 = vrot.lane.b32.xlu0 %v6240_v32, %s5744_s28  ;;  %2584 = vrot.lane.b32.xlu1 %v6279_v54, %s5744_s28  ;;  %v3109_v57 = vrot.slane %v3094_v36, %v5848_v5  ;;  %v6347_v14 = vshll.u32 %v6279_v54, 16 }
  0xed   :  { %3382 = vst [vmem:[#allocation2 + $0x18] sm:$0x8] %v3381_v60  ;;  %v497_v36 = vrot.slane %v6340_v58, 3  ;;  %v413_v40 = vrot.slane %v6340_v58, 4 }
  0xee   :  { %v3450_v7 = vpop.permute.xlu0 %3449  ;;  %v3452_v15 = vpop.permute.xlu1 %3451  ;;  %v334_v6 = vrot.slane %v6347_v14, 5 }
  0xef   :  { %v3453_v2 = vsel %vm1015_vm0, %v3450_v7, %v3452_v15  ;;  %v167_v7 = vrot.slane %v6340_v58, 7 }
  0xf0   :  { %v3456_v4 = vsel %vm6095_vm11, %v3453_v2, %v3455_v1  ;;  %2657 = vrot.lane.b32.xlu0 %v2649_v62, %s5745_s7  ;;  %2659 = vrot.lane.b32.xlu1 %v2656_v63, %s5745_s7  ;;  %v3111_v1 = vcombine.low %v3109_v57, %v3109_v57  ;;  %v171_v2 = vrot.slane %v6347_v14, 7 }
  0xf1   :  { %3457 = vst [vmem:[#allocation2 + $0x18] sm:$0x10] %v3456_v4  ;;  %v330_v4 = vrot.slane %v6340_v58, 5 }
  0xf2   :  { %v3526_v17 = vpop.permute.xlu0 %3525  ;;  %v3528_v18 = vpop.permute.xlu1 %3527 }
  0xf3   :  { %v3529_v20 = vsel %vm1094_vm6, %v3526_v17, %v3528_v18  ;;  %v248_v18 = vrot.slane %v6340_v58, 6 }
  0xf4   :  { %v3532_v29 = vsel %vm6107_vm5, %v3529_v20, %v3531_v8  ;;  %2731 = vrot.lane.b32.xlu0 %v6236_v31, %s5746_s10  ;;  %2733 = vrot.lane.b32.xlu1 %v6240_v32, %s5746_s10  ;;  %v252_v20 = vrot.slane %v6347_v14, 6 }
  0xf5   :  { %3533 = vst [vmem:[#allocation2 + $0x18] sm:$0x20] %v3532_v29  ;;  %v5431_v29 = vpack.i.bf16 %v171_v2, %v167_v7  ;;  %v6401_v7 = vshrl.u32 %v6240_v32, 16 }
  0xf6   :  { %v3603_v33 = vpop.permute.xlu0 %3602  ;;  %v3605_v24 = vpop.permute.xlu1 %3604 }
  0xf7   :  { %v3606_v23 = vsel %vm1172_vm12, %v3603_v33, %v3605_v24  ;;  %v5441_v24 = vpack.i.bf16 %v334_v6, %v330_v4 }
  0xf8   :  { %v3609_v42 = vsel %vm6127_vm15, %v3606_v23, %v3608_v30  ;;  %2806 = vrot.lane.b32.xlu0 %v2798_v25, %s5747_s11  ;;  %2808 = vrot.lane.b32.xlu1 %v2805_v19, %s5747_s11  ;;  %v5426_v19 = vpack.i.bf16 %v6347_v14, %v6340_v58  ;;  %v5436_v23 = vpack.i.bf16 %v252_v20, %v248_v18  ;;  %v3759_v18 = vld [vmem:[#allocation2 + $0x28] sm:$0x1] }
  0xf9   :  { %3610 = vst [vmem:[#allocation2 + $0x18] sm:$0x40] %v3609_v42  ;;  %v501_v42 = vrot.slane %v6347_v14, 3 }
  0xfa   :  { %v3679_v41 = vpop.permute.xlu0 %3678  ;;  %v3681_v44 = vpop.permute.xlu1 %3680 }
  0xfb   :  { %v3682_v47 = vsel %vm1251_vm2, %v3679_v41, %v3681_v44  ;;  %v1018_v41 = vld [vmem:[#allocation2 + $0x10] sm:$0x10]  ;;  %v5451_v48 = vpack.i.bf16 %v501_v42, %v497_v36 }
  0xfc   :  { %v3685_v9 = vsel %vm6139_vm4, %v3682_v47, %v3684_v27  ;;  %2882 = vrot.lane.b32.xlu0 %v6255_v39, %s5748_s14  ;;  %2884 = vrot.lane.b32.xlu1 %v6315_v34, %s5748_s14  ;;  %v417_v27 = vrot.slane %v6347_v14, 4 }
  0xfd   :  { %3686 = vst [vmem:[#allocation2 + $0x18] sm:$0x80] %v3685_v9  ;;  %v664_v9 = vrot.slane %v6340_v58, 1 }
  0xfe   :  { %v706_v52 = vpop.permute.xlu0 %705  ;;  %v708_v53 = vpop.permute.xlu1 %707  ;;  %v5446_v49 = vpack.i.bf16 %v417_v27, %v413_v40  ;;  %v3908_v40 = vld [vmem:[#allocation2 + $0x28] sm:$0x4] }
  0xff   :  { %v710_v12 = vsel %vm709_vm14, %v706_v52, %v708_v53  ;;  %v584_v52 = vrot.slane %v6347_v14, 2  ;;  %v1097_v53 = vld [vmem:[#allocation2 + $0x10] sm:$0x20]  ;;  %vm1478_vm14 = vcmask 752640  }
 0x100   :  { %v713_v11 = vsel %vm6212_vm10, %v710_v12, %v712_v51  ;;  %2959 = vrot.lane.b32.xlu0 %v2957_v50, %s5749_s15  ;;  %2961 = vrot.lane.b32.xlu1 %v2958_v10, %s5749_s15  ;;  %v668_v10 = vrot.slane %v6347_v14, 1  ;;  %v580_v51 = vrot.slane %v6340_v58, 2 }
 0x101   :  { %714 = vst [vmem:[#allocation2 + $0x10] sm:$0x1] %v713_v11 }
 0x102   :  { %v781_v60 = vpop.permute.xlu0 %780  ;;  %v783_v62 = vpop.permute.xlu1 %782 }
 0x103   :  { %v785_v63 = vsel %vm784_vm1, %v781_v60, %v783_v62  ;;  %v5456_v60 = vpack.i.bf16 %v584_v52, %v580_v51  ;;  %v1175_v62 = vld [vmem:[#allocation2 + $0x10] sm:$0x40]  ;;  %vm1555_vm1 = vcmask 736256   ;;  %v4724_v52 = vrot.slane %v6401_v7, 3 }
 0x104   :  { %v788_v15 = vsel %vm6112_vm8, %v785_v63, %v787_v59  ;;  %3035 = vrot.lane.b32.xlu0 %v6251_v38, %s5750_s16  ;;  %3037 = vrot.lane.b32.xlu1 %v6255_v39, %s5750_s16  ;;  %v5461_v59 = vpack.i.bf16 %v668_v10, %v664_v9 }
 0x105   :  { %789 = vst [vmem:[#allocation2 + $0x10] sm:$0x2] %v788_v15  ;;  %v1254_v15 = vld [vmem:[#allocation2 + $0x10] sm:$0x80] }
 0x106   :  { %v857_v8 = vpop.permute.xlu0 %856  ;;  %v859_v17 = vpop.permute.xlu1 %858 }
 0x107   :  { %v861_v25 = vsel %vm860_vm9, %v857_v8, %v859_v17  ;;  %v4424_v17 = vrot.slane %v6401_v7, 7  ;;  %vm1633_vm9 = vcmask 719872  }
 0x108   :  { %v864_v28 = vsel %vm6071_vm3, %v861_v25, %v863_v3  ;;  %3112 = vrot.lane.b32.xlu0 %v3110_v0, %s5751_s17  ;;  %3114 = vrot.lane.b32.xlu1 %v3111_v1, %s5751_s17  ;;  %v6394_v0 = vshrl.u32 %v6279_v54, 16 }
 0x109   :  { %865 = vst [vmem:[#allocation2 + $0x10] sm:$0x4] %v864_v28 }
 0x10a   :  { %v934_v30 = vpop.permute.xlu0 %933  ;;  %v936_v33 = vpop.permute.xlu1 %935  ;;  %v4428_v8 = vrot.slane %v6394_v0, 7  ;;  %v4577_v42 = vrot.slane %v6394_v0, 5  ;;  %v4728_v51 = vrot.slane %v6394_v0, 3 }
 0x10b   :  { %v938_v43 = vsel %vm937_vm13, %v934_v30, %v936_v33  ;;  %v3833_v30 = vld [vmem:[#allocation2 + $0x28] sm:$0x2]  ;;  %vm1712_vm13 = vcmask 703488  }
 0x10c   :  { %v941_v26 = vsel %vm6083_vm7, %v938_v43, %v940_v21  ;;  %5432 = vrot.lane.b32.xlu1 %v5431_v29, %s5745_s7  ;;  %5427 = vrot.lane.b32.xlu0 %v5426_v19, %s5744_s28  ;;  %v4503_v29 = vrot.slane %v6394_v0, 6  ;;  %v4499_v21 = vrot.slane %v6401_v7, 6  ;;  %v4573_v43 = vrot.slane %v6401_v7, 5  ;;  %s5768_s28 = smov 95   ;;  %s5769_s7 = smov 93  }
 0x10d   :  { %942 = vst [vmem:[#allocation2 + $0x10] sm:$0x8] %v941_v26 }
 0x10e   :  { %v1012_v44 = vpop.permute.xlu0 %1011  ;;  %v1014_v46 = vpop.permute.xlu1 %1013 }
 0x10f   :  { %v1016_v47 = vsel %vm1015_vm0, %v1012_v44, %v1014_v46  ;;  %v4652_v44 = vrot.slane %v6394_v0, 4  ;;  %vm1790_vm0 = vcmask 687104  }
 0x110   :  { %v1019_v50 = vsel %vm6095_vm11, %v1016_v47, %v1018_v41  ;;  %5442 = vrot.lane.b32.xlu1 %v5441_v24, %s5747_s11  ;;  %5437 = vrot.lane.b32.xlu0 %v5436_v23, %s5746_s10  ;;  %v4648_v47 = vrot.slane %v6401_v7, 4  ;;  %s5770_s10 = smov 91   ;;  %s5771_s11 = smov 89  }
 0x111   :  { %1020 = vst [vmem:[#allocation2 + $0x10] sm:$0x10] %v1019_v50 }
 0x112   :  { %v1091_v12 = vpop.permute.xlu0 %1090  ;;  %v1093_v56 = vpop.permute.xlu1 %1092 }
 0x113   :  { %v1095_v57 = vsel %vm1094_vm6, %v1091_v12, %v1093_v56  ;;  %vm1869_vm6 = vcmask 670720  }
 0x114   :  { %v1098_v11 = vsel %vm6107_vm5, %v1095_v57, %v1097_v53  ;;  %5452 = vrot.lane.b32.xlu1 %v5451_v48, %s5749_s15  ;;  %5447 = vrot.lane.b32.xlu0 %v5446_v49, %s5748_s14  ;;  %v3982_v48 = vld [vmem:[#allocation2 + $0x28] sm:$0x8]  ;;  %v4057_v53 = vld [vmem:[#allocation2 + $0x28] sm:$0x10]  ;;  %s5760_s14 = smov 111   ;;  %s5775_s15 = smov 81  }
 0x115   :  { %1099 = vst [vmem:[#allocation2 + $0x10] sm:$0x20] %v1098_v11  ;;  %v4805_v11 = vrot.slane %v6394_v0, 2 }
 0x116   :  { %v1169_v58 = vpop.permute.xlu0 %1168  ;;  %v1171_v63 = vpop.permute.xlu1 %1170 }
 0x117   :  { %v1173_v14 = vsel %vm1172_vm12, %v1169_v58, %v1171_v63  ;;  %vm1327_vm12 = vcmask 785408   ;;  %v4133_v58 = vld [vmem:[#allocation2 + $0x28] sm:$0x20] }
 0x118   :  { %v1176_v1 = vsel %vm6127_vm15, %v1173_v14, %v1175_v62  ;;  %5462 = vrot.lane.b32.xlu1 %v5461_v59, %s5751_s17  ;;  %5457 = vrot.lane.b32.xlu0 %v5456_v60, %s5750_s16  ;;  %v5604_v59 = vld [vmem:[%s7136_s0] ss:$0 sps:$4 sm:$0x33]   ;;  %v4801_v62 = vrot.slane %v6401_v7, 2  ;;  %s5761_s17 = smov 109  }
 0x119   :  { %1177 = vst [vmem:[#allocation2 + $0x10] sm:$0x40] %v1176_v1 }
 0x11a   :  { %v1248_v2 = vpop.permute.xlu0 %1247  ;;  %v1250_v3 = vpop.permute.xlu1 %1249 }
 0x11b   :  { %v1252_v4 = vsel %vm1251_vm2, %v1248_v2, %v1250_v3  ;;  %vm1402_vm2 = vcmask 769024   ;;  %v4881_v3 = vrot.slane %v6394_v0, 1 }
 0x11c   :  { %v1255_v6 = vsel %vm6139_vm4, %v1252_v4, %v1254_v15  ;;  %4357 = vrot.lane.b32.xlu1 %v6394_v0, %s5752_s18  ;;  %4355 = vrot.lane.b32.xlu0 %v6401_v7, %s5752_s18  ;;  %v2000_v15 = vrot.slane %v5604_v59, %v5848_v5  ;;  %v4877_v4 = vrot.slane %v6401_v7, 1  ;;  %v5605_v0 = vld [vmem:[%s7136_s0] ss:$0 sps:$4 sm:$0x33]   ;;  %v4286_v7 = vld [vmem:[#allocation2 + $0x28] sm:$0x80] }
 0x11d   :  { %1256 = vst [vmem:[#allocation2 + $0x10] sm:$0x80] %v1255_v6  ;;  %v4210_v6 = vld [vmem:[#allocation2 + $0x28] sm:$0x40] }
 0x11e   :  { %v3754_v20 = vpop.permute.xlu0 %3753  ;;  %v3756_v25 = vpop.permute.xlu1 %3755 }
 0x11f   :  { %v3757_v28 = vsel %vm1327_vm12, %v3754_v20, %v3756_v25  ;;  %v2001_v20 = vcombine.high %v2000_v15, %v2000_v15 }
 0x120   :  { %v3760_v19 = vsel %vm6212_vm10, %v3757_v28, %v3759_v18  ;;  %4431 = vrot.lane.b32.xlu1 %v4428_v8, %s5753_s19  ;;  %4429 = vrot.lane.b32.xlu0 %v4424_v17, %s5753_s19 }
 0x121   :  { %3761 = vst [vmem:[#allocation2 + $0x28] sm:$0x1] %v3760_v19 }
 0x122   :  { %v3828_v33 = vpop.permute.xlu0 %3827  ;;  %v3830_v24 = vpop.permute.xlu1 %3829 }
 0x123   :  { %v3831_v23 = vsel %vm1402_vm2, %v3828_v33, %v3830_v24  ;;  %v2008_v24 = vrot.slane %v2000_v15, %v5848_v5  ;;  %v1636_v15 = vld [vmem:[#allocation2 + $0x20] sm:$0x10] }
 0x124   :  { %v3834_v36 = vsel %vm6112_vm8, %v3831_v23, %v3833_v30  ;;  %4506 = vrot.lane.b32.xlu1 %v4503_v29, %s5754_s20  ;;  %4504 = vrot.lane.b32.xlu0 %v4499_v21, %s5754_s20  ;;  %v2015_v21 = vrot.slane %v2001_v20, %v5848_v5  ;;  %v5606_v30 = vld [vmem:[%s7136_s0] ss:$0 sps:$4 sm:$0x33]   ;;  %v2153_v23 = vrot.slane %v5605_v0, %v5848_v5 }
 0x125   :  { %3835 = vst [vmem:[#allocation2 + $0x28] sm:$0x2] %v3834_v36  ;;  %v1330_v36 = vld [vmem:[#allocation2 + $0x20] sm:$0x1] }
 0x126   :  { %v3903_v27 = vpop.permute.xlu0 %3902  ;;  %v3905_v26 = vpop.permute.xlu1 %3904  ;;  %v5280_v20 = vld.sshfl [vmem:[%s7136_s0] sm:$0x11 pattern:$0x75316420] }
 0x127   :  { %v3906_v41 = vsel %vm1478_vm14, %v3903_v27, %v3905_v26  ;;  %v2308_v27 = vrot.slane %v5606_v30, %v5848_v5  ;;  %v3169_v30 = vcombine.high %v5280_v20, %v5280_v20 }
 0x128   :  { %v3909_v46 = vsel %vm6071_vm3, %v3906_v41, %v3908_v40  ;;  %4580 = vrot.lane.b32.xlu1 %v4577_v42, %s5755_s1  ;;  %4578 = vrot.lane.b32.xlu0 %v4573_v43, %s5755_s1  ;;  %v1405_v41 = vld [vmem:[#allocation2 + $0x20] sm:$0x2] }
 0x129   :  { %3910 = vst [vmem:[#allocation2 + $0x28] sm:$0x4] %v3909_v46 }
 0x12a   :  { %v3977_v49 = vpop.permute.xlu0 %3976  ;;  %v3979_v9 = vpop.permute.xlu1 %3978 }
 0x12b   :  { %v3980_v50 = vsel %vm1555_vm1, %v3977_v49, %v3979_v9  ;;  %v2168_v9 = vrot.slane %v2153_v23, %v5848_v5 }
 0x12c   :  { %v3983_v10 = vsel %vm6083_vm7, %v3980_v50, %v3982_v48  ;;  %4655 = vrot.lane.b32.xlu1 %v4652_v44, %s5756_s21  ;;  %4653 = vrot.lane.b32.xlu0 %v4648_v47, %s5756_s21  ;;  %v2309_v48 = vcombine.high %v2308_v27, %v2308_v27 }
 0x12d   :  { %3984 = vst [vmem:[#allocation2 + $0x28] sm:$0x8] %v3983_v10  ;;  %v5607_v10 = vld [vmem:[%s7136_s0] ss:$0 sps:$4 sm:$0x33]  }
 0x12e   :  { %v4052_v12 = vpop.permute.xlu0 %4051  ;;  %v4054_v56 = vpop.permute.xlu1 %4053 }
 0x12f   :  { %v4055_v57 = vsel %vm1633_vm9, %v4052_v12, %v4054_v56  ;;  %v2323_v56 = vrot.slane %v2309_v48, %v5848_v5 }
 0x130   :  { %v4058_v60 = vsel %vm6095_vm11, %v4055_v57, %v4057_v53  ;;  %4731 = vrot.lane.b32.xlu1 %v4728_v51, %s5757_s24  ;;  %4729 = vrot.lane.b32.xlu0 %v4724_v52, %s5757_s24  ;;  %v1481_v51 = vld [vmem:[#allocation2 + $0x20] sm:$0x4]  ;;  %v2465_v57 = vrot.slane %v5607_v10, %v5848_v5  ;;  %v2588_v10 = vld [vmem:[#allocation2 + $0x8] sm:$0x1] }
 0x131   :  { %4059 = vst [vmem:[#allocation2 + $0x28] sm:$0x10] %v4058_v60 }
 0x132   :  { %v4128_v63 = vpop.permute.xlu0 %4127  ;;  %v4130_v14 = vpop.permute.xlu1 %4129 }
 0x133   :  { %v4131_v1 = vsel %vm1712_vm13, %v4128_v63, %v4130_v14 }
 0x134   :  { %v4134_v2 = vsel %vm6107_vm5, %v4131_v1, %v4133_v58  ;;  %4808 = vrot.lane.b32.xlu1 %v4805_v11, %s5758_s25  ;;  %4806 = vrot.lane.b32.xlu0 %v4801_v62, %s5758_s25  ;;  %v1558_v11 = vld [vmem:[#allocation2 + $0x20] sm:$0x8]  ;;  %v2325_v58 = vcombine.low %v2323_v56, %v2323_v56  ;;  %v2466_v1 = vcombine.low %v2465_v57, %v2465_v57 }
 0x135   :  { %4135 = vst [vmem:[#allocation2 + $0x28] sm:$0x20] %v4134_v2 }
 0x136   :  { %v4205_v8 = vpop.permute.xlu0 %4204  ;;  %v4207_v17 = vpop.permute.xlu1 %4206 }
 0x137   :  { %v4208_v18 = vsel %vm1790_vm0, %v4205_v8, %v4207_v17  ;;  %v5608_v8 = vld [vmem:[%s7136_s0] ss:$0 sps:$4 sm:$0x33]   ;;  %v2473_v17 = vrot.slane %v2466_v1, %v5848_v5 }
 0x138   :  { %v4211_v25 = vsel %vm6127_vm15, %v4208_v18, %v4210_v6  ;;  %4884 = vrot.lane.b32.xlu1 %v4881_v3, %s5759_s4  ;;  %4882 = vrot.lane.b32.xlu0 %v4877_v4, %s5759_s4  ;;  %v2480_v6 = vrot.slane %v2465_v57, %v5848_v5  ;;  %v1715_v18 = vld [vmem:[#allocation2 + $0x20] sm:$0x20] }
 0x139   :  { %4212 = vst [vmem:[#allocation2 + $0x28] sm:$0x40] %v4211_v25 }
 0x13a   :  { %v4281_v28 = vpop.permute.xlu0 %4280  ;;  %v4283_v29 = vpop.permute.xlu1 %4282 }
 0x13b   :  { %v4284_v19 = vsel %vm1869_vm6, %v4281_v28, %v4283_v29  ;;  %v2482_v28 = vcombine.low %v2480_v6, %v2480_v6  ;;  %v3243_v29 = vrot.slane %v5608_v8, %v5848_v5  ;;  %v2737_v6 = vld [vmem:[#allocation2 + $0x8] sm:$0x4] }
 0x13c   :  { %v4287_v33 = vsel %vm6139_vm4, %v4284_v19, %v4286_v7  ;;  %1943 = vrot.lane.b32.xlu1 %v6279_v54, %s5752_s18  ;;  %1941 = vrot.lane.b32.xlu0 %v6240_v32, %s5752_s18  ;;  %v2154_v54 = vcombine.low %v2153_v23, %v2153_v23 }
 0x13d   :  { %4288 = vst [vmem:[#allocation2 + $0x28] sm:$0x80] %v4287_v33  ;;  %v1793_v33 = vld [vmem:[#allocation2 + $0x20] sm:$0x40]  ;;  %v3251_v48 = vrot.slane %v3243_v29, %v5848_v5 }
 0x13e   :  { %v1324_v42 = vpop.permute.xlu0 %1323  ;;  %v1326_v43 = vpop.permute.xlu1 %1325  ;;  %v2161_v50 = vrot.slane %v2154_v54, %v5848_v5 }
 0x13f   :  { %v1328_v40 = vsel %vm1327_vm12, %v1324_v42, %v1326_v43  ;;  %v3244_v42 = vcombine.high %v3243_v29, %v3243_v29  ;;  %vm97_vm12 = vsmask.f32 7938 }
 0x140   :  { %v1331_v26 = vsel %vm6212_vm10, %v1328_v40, %v1330_v36  ;;  %2018 = vrot.lane.b32.xlu1 %v2015_v21, %s5753_s19  ;;  %2016 = vrot.lane.b32.xlu0 %v2008_v24, %s5753_s19  ;;  %v2481_v21 = vcombine.low %v2473_v17, %v2473_v17  ;;  %v5609_v40 = vld [vmem:[%s7136_s0] ss:$0 sps:$4 sm:$0x33]  }
 0x141   :  { %1332 = vst [vmem:[#allocation2 + $0x20] sm:$0x1] %v1331_v26 }
 0x142   :  { %v1399_v44 = vpop.permute.xlu0 %1398  ;;  %v1401_v46 = vpop.permute.xlu1 %1400 }
 0x143   :  { %v1403_v47 = vsel %vm1402_vm2, %v1399_v44, %v1401_v46  ;;  %v3258_v44 = vrot.slane %v3244_v42, %v5848_v5  ;;  %v3318_v46 = vcombine.low %v5280_v20, %v5280_v20  ;;  %vm7151_vm2 = vcmask 1039360  }
 0x144   :  { %v1406_v49 = vsel %vm6112_vm8, %v1403_v47, %v1405_v41  ;;  %2094 = vrot.lane.b32.xlu1 %v6240_v32, %s5754_s20  ;;  %2092 = vrot.lane.b32.xlu0 %v6236_v31, %s5754_s20  ;;  %v2316_v31 = vrot.slane %v2308_v27, %v5848_v5  ;;  %v1872_v27 = vld [vmem:[#allocation2 + $0x20] sm:$0x80]  ;;  %s5762_s20 = smov 107  }
 0x145   :  { %1407 = vst [vmem:[#allocation2 + $0x20] sm:$0x2] %v1406_v49  ;;  %v3392_v49 = vrot.slane %v5609_v40, %v5848_v5 }
 0x146   :  { %v1475_v52 = vpop.permute.xlu0 %1474  ;;  %v1477_v53 = vpop.permute.xlu1 %1476  ;;  %v2324_v14 = vcombine.low %v2316_v31, %v2316_v31 }
 0x147   :  { %v1479_v12 = vsel %vm1478_vm14, %v1475_v52, %v1477_v53  ;;  %vm7190_vm14 = vcmask 1040384  }
 0x148   :  { %v1482_v32 = vsel %vm6071_vm3, %v1479_v12, %v1481_v51  ;;  %2171 = vrot.lane.b32.xlu1 %v2168_v9, %s5755_s1  ;;  %2169 = vrot.lane.b32.xlu0 %v2161_v50, %s5755_s1  ;;  %v5610_v9 = vld [vmem:[%s7136_s0] ss:$0 sps:$4 sm:$0x33]   ;;  %v6567_v12 = vrot.slane %v3318_v46, %v5848_v5  ;;  %s5763_s1 = smov 105  }
 0x149   :  { %1483 = vst [vmem:[#allocation2 + $0x20] sm:$0x4] %v1482_v32  ;;  %v3393_v32 = vcombine.low %v3392_v49, %v3392_v49  ;;  %v3543_v31 = vrot.slane %v5610_v9, %v5848_v5 }
 0x14a   :  { %v1552_v59 = vpop.permute.xlu0 %1551  ;;  %v1554_v60 = vpop.permute.xlu1 %1553  ;;  %v6641_v46 = vcombine.low %v6567_v12, %v6567_v12 }
 0x14b   :  { %v1556_v62 = vsel %vm1555_vm1, %v1552_v59, %v1554_v60  ;;  %vm6561_vm1 = vmand %vm7190_vm14, %vm97_vm12  ;;  %vm260_vm12 = vsmask.f32 7946  ;;  %v2663_v60 = vld [vmem:[#allocation2 + $0x8] sm:$0x2]  ;;  %vm7152_vm14 = vcmask 1006592   ;;  %v3400_v1 = vrot.slane %v3393_v32, %v5848_v5 }
 0x14c   :  { %v1559_v63 = vsel %vm6083_vm7, %v1556_v62, %v1558_v11  ;;  %2249 = vrot.lane.b32.xlu1 %v6315_v34, %s5756_s21  ;;  %2247 = vrot.lane.b32.xlu0 %v6255_v39, %s5756_s21  ;;  %s5764_s21 = smov 103  }
 0x14d   :  { %1560 = vst [vmem:[#allocation2 + $0x20] sm:$0x8] %v1559_v63  ;;  %v5611_v63 = vld [vmem:[%s7136_s0] ss:$0 sps:$4 sm:$0x33]  }
 0x14e   :  { %v1630_v2 = vpop.permute.xlu0 %1629  ;;  %v1632_v3 = vpop.permute.xlu1 %1631 }
 0x14f   :  { %v1634_v4 = vsel %vm1633_vm9, %v1630_v2, %v1632_v3  ;;  %vm179_vm9 = vsmask.f32 7942 }
 0x150   :  { %v1637_v34 = vsel %vm6095_vm11, %v1634_v4, %v1636_v15  ;;  %2328 = vrot.lane.b32.xlu1 %v2325_v58, %s5757_s24  ;;  %2326 = vrot.lane.b32.xlu0 %v2324_v14, %s5757_s24  ;;  %v3407_v58 = vrot.slane %v3392_v49, %v5848_v5  ;;  %v3544_v15 = vcombine.high %v3543_v31, %v3543_v31  ;;  %s5767_s24 = smov 97  }
 0x151   :  { %1638 = vst [vmem:[#allocation2 + $0x20] sm:$0x10] %v1637_v34 }
 0x152   :  { %v1709_v25 = vpop.permute.xlu0 %1708  ;;  %v1711_v0 = vpop.permute.xlu1 %1710 }
 0x153   :  { %v1713_v7 = vsel %vm1712_vm13, %v1709_v25, %v1711_v0  ;;  %vm7153_vm13 = vcmask 1022976   ;;  %v3558_v25 = vrot.slane %v3544_v15, %v5848_v5  ;;  %v3551_v0 = vrot.slane %v3543_v31, %v5848_v5 }
 0x154   :  { %v1716_v19 = vsel %vm6107_vm5, %v1713_v7, %v1715_v18  ;;  %2406 = vrot.lane.b32.xlu1 %v6255_v39, %s5758_s25  ;;  %2404 = vrot.lane.b32.xlu0 %v6251_v38, %s5758_s25  ;;  %v6539_v39 = vrot.slane %v3169_v30, %v5848_v5  ;;  %v6542_v38 = vrot.slane %v5280_v20, %v5848_v5  ;;  %vm7208_vm5 = vcmask 957440  }
 0x155   :  { %1717 = vst [vmem:[#allocation2 + $0x20] sm:$0x20] %v1716_v19  ;;  %v3696_v18 = vrot.slane %v5611_v63, %v5848_v5  ;;  %v2812_v19 = vld [vmem:[#allocation2 + $0x8] sm:$0x8] }
 0x156   :  { %v1787_v24 = vpop.permute.xlu0 %1786  ;;  %v1789_v23 = vpop.permute.xlu1 %1788  ;;  %v6599_v34 = vcombine.low %v6539_v39, %v6539_v39  ;;  %v6603_v17 = vcombine.low %v6542_v38, %v6542_v38 }
 0x157   :  { %v1791_v36 = vsel %vm1790_vm0, %v1787_v24, %v1789_v23  ;;  %vm7193_vm0 = vcmask 1041409   ;;  %v3697_v30 = vcombine.low %v3696_v18, %v3696_v18  ;;  %v3560_v24 = vcombine.low %v3558_v25, %v3558_v25 }
 0x158   :  { %v1794_v43 = vsel %vm6127_vm15, %v1791_v36, %v1793_v33  ;;  %2485 = vrot.lane.b32.xlu1 %v2482_v28, %s5759_s4  ;;  %2483 = vrot.lane.b32.xlu0 %v2481_v21, %s5759_s4  ;;  %v3559_v23 = vcombine.low %v3551_v0, %v3551_v0  ;;  %v3711_v40 = vrot.slane %v3696_v18, %v5848_v5  ;;  %vm592_vm15 = vsmask.f32 7962 }
 0x159   :  { %1795 = vst [vmem:[#allocation2 + $0x20] sm:$0x40] %v1794_v43 }
 0x15a   :  { %v1866_v26 = vpop.permute.xlu0 %1865  ;;  %v1868_v54 = vpop.permute.xlu1 %1867 }
 0x15b   :  { %v1870_v41 = vsel %vm1869_vm6, %v1866_v26, %v1868_v54  ;;  %vm6575_vm6 = vmand %vm7193_vm0, %vm179_vm9  ;;  %vm7196_vm9 = vcmask 1042434   ;;  %v3704_v54 = vrot.slane %v3697_v30, %v5848_v5 }
 0x15c   :  { %v1873_v47 = vsel %vm6139_vm4, %v1870_v41, %v1872_v27  ;;  %3186 = vrot.lane.b32.xlu1 %v6539_v39, %s5760_s14  ;;  %3184 = vrot.lane.b32.xlu0 %v6542_v38, %s5760_s14  ;;  %vm6592_vm0 = vmand %vm7196_vm9, %vm260_vm12  ;;  %vm7156_vm12 = vcmask 990208   ;;  %vm7199_vm9 = vcmask 1043459   ;;  %v2888_v27 = vld [vmem:[#allocation2 + $0x8] sm:$0x10]  ;;  %v6633_v41 = vshll.u32 %v6542_v38, 16 }
 0x15d   :  { %1874 = vst [vmem:[#allocation2 + $0x20] sm:$0x80] %v1873_v47  ;;  %v6644_v47 = vshll.u32 %v6539_v39, 16 }
 0x15e   :  { %v2583_v51 = vpop.permute.xlu0 %2582  ;;  %v2585_v52 = vpop.permute.xlu1 %2584  ;;  %v893_v63 = vrot.slane %v6633_v41, 6  ;;  %v1127_v0 = vrot.slane %v6633_v41, 3  ;;  %v1048_v30 = vrot.slane %v6633_v41, 4 }
 0x15f   :  { %v2586_v53 = vsel %vm7151_vm2, %v2583_v51, %v2585_v52  ;;  %vm342_vm2 = vsmask.f32 7950  ;;  %v2965_v51 = vld [vmem:[#allocation2 + $0x8] sm:$0x20]  ;;  %v821_v31 = vrot.slane %v6644_v47, 7  ;;  %v897_v15 = vrot.slane %v6644_v47, 6 }
 0x160   :  { %v2589_v56 = vsel %vm6561_vm1, %v2586_v53, %v2588_v10  ;;  %3261 = vrot.lane.b32.xlu1 %v3258_v44, %s5761_s17  ;;  %3259 = vrot.lane.b32.xlu0 %v3251_v48, %s5761_s17  ;;  %v3713_v10 = vcombine.low %v3711_v40, %v3711_v40  ;;  %v3712_v53 = vcombine.low %v3704_v54, %v3704_v54  ;;  %v1284_v40 = vrot.slane %v6633_v41, 1 }
 0x161   :  { %2590 = vst [vmem:[#allocation2 + $0x8] sm:$0x1] %v2589_v56  ;;  %v817_v56 = vrot.slane %v6633_v41, 7 }
 0x162   :  { %v2658_v11 = vpop.permute.xlu0 %2657  ;;  %v2660_v59 = vpop.permute.xlu1 %2659 }
 0x163   :  { %v2661_v62 = vsel %vm7153_vm13, %v2658_v11, %v2660_v59  ;;  %vm425_vm13 = vsmask.f32 7954  ;;  %v7210_v11 = vmov 0  ;;  %v970_v59 = vrot.slane %v6633_v41, 5 }
 0x164   :  { %v2664_v14 = vsel %vm6575_vm6, %v2661_v62, %v2663_v60  ;;  %3335 = vrot.lane.b32.xlu1 %v6542_v38, %s5762_s20  ;;  %3333 = vrot.lane.b32.xlu0 %v6567_v12, %s5762_s20 }
 0x165   :  { %2665 = vst [vmem:[#allocation2 + $0x8] sm:$0x2] %v2664_v14  ;;  %v3041_v14 = vld [vmem:[#allocation2 + $0x8] sm:$0x40] }
 0x166   :  { %v2732_v3 = vpop.permute.xlu0 %2731  ;;  %v2734_v4 = vpop.permute.xlu1 %2733 }
 0x167   :  { %v2735_v8 = vsel %vm7152_vm14, %v2732_v3, %v2734_v4  ;;  %vm6613_vm14 = vmand %vm7199_vm9, %vm342_vm2  ;;  %vm7159_vm2 = vcmask 973824   ;;  %vm7202_vm9 = vcmask 1044484   ;;  %v6674_v4 = vpack.i.bf16 %v821_v31, %v817_v56  ;;  %v181_v56 = vld [vmem:[#allocation2] sm:$0x2] }
 0x168   :  { %v2738_v20 = vsel %vm6592_vm0, %v2735_v8, %v2737_v6  ;;  %3410 = vrot.lane.b32.xlu1 %v3407_v58, %s5763_s1  ;;  %3408 = vrot.lane.b32.xlu0 %v3400_v1, %s5763_s1  ;;  %vm6625_vm4 = vmand %vm7202_vm9, %vm425_vm13  ;;  %vm7205_vm13 = vcmask 1045509   ;;  %v974_v58 = vrot.slane %v6644_v47, 5  ;;  %v6678_v6 = vpack.i.bf16 %v6644_v47, %v6633_v41 }
 0x169   :  { %2739 = vst [vmem:[#allocation2 + $0x8] sm:$0x4] %v2738_v20  ;;  %v7213_v8 = vmov 0 }
 0x16a   :  { %v2807_v28 = vpop.permute.xlu0 %2806  ;;  %v2809_v29 = vpop.permute.xlu1 %2808  ;;  %v6686_v25 = vpack.i.bf16 %v974_v58, %v970_v59 }
 0x16b   :  { %v2810_v21 = vsel %vm7156_vm12, %v2807_v28, %v2809_v29  ;;  %vm509_vm12 = vsmask.f32 7958  ;;  %v1131_v28 = vrot.slane %v6644_v47, 3  ;;  %v3118_v29 = vld [vmem:[#allocation2 + $0x8] sm:$0x80] }
 0x16c   :  { %v2813_v33 = vsel %vm6613_vm14, %v2810_v21, %v2812_v19  ;;  %3486 = vrot.lane.b32.xlu1 %v6599_v34, %s5764_s21  ;;  %3484 = vrot.lane.b32.xlu0 %v6603_v17, %s5764_s21  ;;  %vm6647_vm9 = vmand %vm7205_vm13, %vm509_vm12  ;;  %vm7209_vm12 = vcmask 1046534   ;;  %v6691_v21 = vpack.i.bf16 %v897_v15, %v893_v63 }
 0x16d   :  { %2814 = vst [vmem:[#allocation2 + $0x8] sm:$0x8] %v2813_v33  ;;  %vm6661_vm13 = vmand %vm7209_vm12, %vm592_vm15  ;;  %vm673_vm15 = vcmask 924672   ;;  %vm7212_vm12 = vcmask 1047559   ;;  %v1052_v33 = vrot.slane %v6644_v47, 4 }
 0x16e   :  { %v2883_v42 = vpop.permute.xlu0 %2882  ;;  %v2885_v43 = vpop.permute.xlu1 %2884  ;;  %v7211_v11 = vsel %vm6661_vm13, 4294967295, %v7210_v11 }
 0x16f   :  { %v2886_v26 = vsel %vm7159_vm2, %v2883_v42, %v2885_v43  ;;  %vm7162_vm2 = vcmask 941056   ;;  %v6701_v43 = vpack.i.bf16 %v1131_v28, %v1127_v0  ;;  %v262_v28 = vld [vmem:[#allocation2] sm:$0x4] }
 0x170   :  { %v2889_v44 = vsel %vm6625_vm4, %v2886_v26, %v2888_v27  ;;  %3563 = vrot.lane.b32.xlu1 %v3560_v24, %s5765_s22  ;;  %3561 = vrot.lane.b32.xlu0 %v3559_v23, %s5765_s22 }
 0x171   :  { %2890 = vst [vmem:[#allocation2 + $0x8] sm:$0x10] %v2889_v44 }
 0x172   :  { %v2960_v49 = vpop.permute.xlu0 %2959  ;;  %v2962_v9 = vpop.permute.xlu1 %2961 }
 0x173   :  { %v2963_v52 = vsel %vm7208_vm5, %v2960_v49, %v2962_v9  ;;  %vm676_vm5 = vsmask.f32 7966  ;;  %v99_v49 = vld [vmem:[#allocation2] sm:$0x1]  ;;  %v6708_v9 = vpack.i.bf16 %v1052_v33, %v1048_v30 }
 0x174   :  { %v2966_v32 = vsel %vm6647_vm9, %v2963_v52, %v2965_v51  ;;  %3639 = vrot.lane.b32.xlu1 %v6603_v17, %s5766_s23  ;;  %3637 = vrot.lane.b32.xlu0 %v6641_v46, %s5766_s23  ;;  %v1205_v51 = vrot.slane %v6633_v41, 2  ;;  %v1209_v52 = vrot.slane %v6644_v47, 2 }
 0x175   :  { %2967 = vst [vmem:[#allocation2 + $0x8] sm:$0x20] %v2966_v32 }
 0x176   :  { %v3036_v60 = vpop.permute.xlu0 %3035  ;;  %v3038_v62 = vpop.permute.xlu1 %3037 }
 0x177   :  { %v3039_v1 = vsel %vm7162_vm2, %v3036_v60, %v3038_v62  ;;  %vm6682_vm2 = vmand %vm7212_vm12, %vm676_vm5  ;;  %vm7215_vm5 = vcmask 1022976   ;;  %vm7216_vm12 = vcmask 1039360  }
 0x178   :  { %v3042_v3 = vsel %vm6661_vm13, %v3039_v1, %v3041_v14  ;;  %3716 = vrot.lane.b32.xlu1 %v3713_v10, %s5767_s24  ;;  %3714 = vrot.lane.b32.xlu0 %v3712_v53, %s5767_s24  ;;  %v7214_v8 = vsel %vm6682_vm2, 4294967295, %v7213_v8  ;;  %v1288_v10 = vrot.slane %v6644_v47, 1  ;;  %v5612_v53 = vld [vmem:[%s7136_s0] ss:$0 sps:$4 sm:$0x33]  }
 0x179   :  { %3043 = vst [vmem:[#allocation2 + $0x8] sm:$0x40] %v3042_v3  ;;  %v6728_v3 = vpack.i.bf16 %v1209_v52, %v1205_v51 }
 0x17a   :  { %v3113_v18 = vpop.permute.xlu0 %3112  ;;  %v3115_v20 = vpop.permute.xlu1 %3114  ;;  %v6726_v15 = vpack.i.bf16 %v1288_v10, %v1284_v40  ;;  %v427_v10 = vld [vmem:[#allocation2] sm:$0x10] }
 0x17b   :  { %v3116_v19 = vsel %vm673_vm15, %v3113_v18, %v3115_v20  ;;  %v3845_v18 = vrot.slane %v5612_v53, %v5848_v5  ;;  %v344_v20 = vld [vmem:[#allocation2] sm:$0x8] }
 0x17c   :  { %v3119_v24 = vsel %vm6682_vm2, %v3116_v19, %v3118_v29  ;;  %5472 = vrot.lane.b32.xlu1 %v6674_v4, %s5761_s17  ;;  %5467 = vrot.lane.b32.xlu0 %v6678_v6, %s5760_s14  ;;  %s5774_s14 = smov 83  }
 0x17d   :  { %3120 = vst [vmem:[#allocation2 + $0x8] sm:$0x80] %v3119_v24 }
 0x17e   :  { %v5433_v23 = vpop.permute.xlu1 %5432  ;;  %v5428_v42 = vpop.permute.xlu0 %5427 }
 0x17f   :  { %v5435_v27 = vunpack.i.h.bf16 %v5433_v23  ;;  %v5434_v26 = vunpack.i.l.bf16 %v5433_v23  ;;  %v5430_v54 = vunpack.i.h.bf16 %v5428_v42  ;;  %v5429_v44 = vunpack.i.l.bf16 %v5428_v42 }
 0x180   :  { %5482 = vrot.lane.b32.xlu1 %v6686_v25, %s5763_s1  ;;  %5477 = vrot.lane.b32.xlu0 %v6691_v21, %s5762_s20 }
 0x181   :  { %v177_v32 = vsel %vm7215_vm5, %v5434_v26, %v5435_v27  ;;  %v95_v31 = vsel %vm7216_vm12, %v5429_v44, %v5430_v54  ;;  %vm7217_vm5 = vcmask 990208   ;;  %vm7218_vm12 = vcmask 1006592   ;;  %v5613_v54 = vld [vmem:[%s7136_s0] ss:$0 sps:$4 sm:$0x33]  }
 0x182   :  { %v182_v59 = vsel %vm6575_vm6, %v177_v32, %v181_v56  ;;  %v100_v60 = vsel %vm6561_vm1, %v95_v31, %v99_v49  ;;  %v5443_v62 = vpop.permute.xlu1 %5442  ;;  %v5438_v58 = vpop.permute.xlu0 %5437  ;;  %v3846_v26 = vcombine.high %v3845_v18, %v3845_v18  ;;  %v511_v44 = vld [vmem:[#allocation2] sm:$0x20] }
 0x183   :  { %183 = vst [vmem:[#allocation2] sm:$0x2] %v182_v59  ;;  %101 = vst [vmem:[#allocation2] sm:$0x1] %v100_v60  ;;  %v5445_v41 = vunpack.i.h.bf16 %v5443_v62  ;;  %v5444_v47 = vunpack.i.l.bf16 %v5443_v62  ;;  %v5440_v63 = vunpack.i.h.bf16 %v5438_v58  ;;  %v5439_v14 = vunpack.i.l.bf16 %v5438_v58  ;;  %v594_v58 = vld [vmem:[#allocation2] sm:$0x40] }
 0x184   :  { %5492 = vrot.lane.b32.xlu1 %v6701_v43, %s5765_s22  ;;  %5487 = vrot.lane.b32.xlu0 %v6708_v9, %s5764_s21  ;;  %v4932_v1 = vld [vmem:[#allocation2 + $0x8] sm:$0xff]  ;;  %s5776_s21 = smov 79   ;;  %s5788_s22 = smov [#allocation8]  }
 0x185   :  { %v340_v0 = vsel %vm7217_vm5, %v5444_v47, %v5445_v41  ;;  %v258_v29 = vsel %vm7218_vm12, %v5439_v14, %v5440_v63  ;;  %4980 = vmatprep.subr.bf16.mxu0 %v4932_v1  ;;  %5343 = vmatprep.subr.bf16.mxu1 %v4932_v1  ;;  %vm7219_vm5 = vcmask 957440   ;;  %vm7220_vm12 = vcmask 973824   ;;  %v5614_v14 = vld [vmem:[%s7136_s0] ss:$0 sps:$4 sm:$0x33]  }
 0x186   :  { %v345_v19 = vsel %vm6613_vm14, %v340_v0, %v344_v20  ;;  %v263_v30 = vsel %vm6592_vm0, %v258_v29, %v262_v28  ;;  %v5453_v33 = vpop.permute.xlu1 %5452  ;;  %v5448_v24 = vpop.permute.xlu0 %5447  ;;  %v3860_v41 = vrot.slane %v3846_v26, %v5848_v5  ;;  %v3853_v47 = vrot.slane %v3845_v18, %v5848_v5  ;;  %v678_v1 = vld [vmem:[#allocation2] sm:$0x80] }
 0x187   :  { %346 = vst [vmem:[#allocation2] sm:$0x8] %v345_v19  ;;  %264 = vst [vmem:[#allocation2] sm:$0x4] %v263_v30  ;;  %v5455_v23 = vunpack.i.h.bf16 %v5453_v33  ;;  %v5454_v42 = vunpack.i.l.bf16 %v5453_v33  ;;  %v5450_v40 = vunpack.i.h.bf16 %v5448_v24  ;;  %v5449_v27 = vunpack.i.l.bf16 %v5448_v24 }
 0x188   :  { %5502 = vrot.lane.b32.xlu1 %v6726_v15, %s5767_s24  ;;  %5497 = vrot.lane.b32.xlu0 %v6728_v3, %s5766_s23  ;;  %v3994_v63 = vrot.slane %v5613_v54, %v5848_v5  ;;  %s5777_s24 = smov 77   ;;  %s5210_s23 = sshll.u32 %s5788_s22, 4  ;;  %s5211_s23 = int_to_ptr.vmem [resolvable:$true] %s5210_s23 }
 0x189   :  { %v507_v49 = vsel %vm7219_vm5, %v5454_v42, %v5455_v23  ;;  %v423_v51 = vsel %vm7220_vm12, %v5449_v27, %v5450_v40  ;;  %vm7165_vm5 = vcmask 654336   ;;  %vm7221_vm12 = vcmask 941056   ;;  %v4435_v42 = vld [vmem:[#allocation2 + $0x38] sm:$0x2]  ;;  %p5691_p3 = scmp.lt.s32.totalorder %s5211_s23, %s5211_s23 }
 0x18a   :  { %v512_v52 = vsel %vm6647_vm9, %v507_v49, %v511_v44  ;;  %v428_v53 = vsel %vm6625_vm4, %v423_v51, %v427_v10  ;;  %v5463_v56 = vpop.permute.xlu1 %5462  ;;  %v5458_v32 = vpop.permute.xlu0 %5457  ;;  %v3995_v24 = vcombine.low %v3994_v63, %v3994_v63  ;;  %v4145_v23 = vrot.slane %v5614_v14, %v5848_v5  ;;  %v5615_v44 = vld [vmem:[%s7136_s0] ss:$0 sps:$4 sm:$0x33]  }
 0x18b   :  { %513 = vst [vmem:[#allocation2] sm:$0x20] %v512_v52  ;;  %429 = vst [vmem:[#allocation2] sm:$0x10] %v428_v53  ;;  %v5465_v31 = vunpack.i.h.bf16 %v5463_v56  ;;  %v5464_v59 = vunpack.i.l.bf16 %v5463_v56  ;;  %v5460_v60 = vunpack.i.h.bf16 %v5458_v32  ;;  %v5459_v62 = vunpack.i.l.bf16 %v5458_v32  ;;  %v4510_v52 = vld [vmem:[#allocation2 + $0x38] sm:$0x4] }
 0x18c   :  { %3788 = vrot.lane.b32.xlu1 %v6539_v39, %s5768_s28  ;;  %3786 = vrot.lane.b32.xlu0 %v6542_v38, %s5768_s28  ;;  %v4361_v39 = vld [vmem:[#allocation2 + $0x38] sm:$0x1]  ;;  %v4009_v54 = vrot.slane %v3994_v63, %v5848_v5  ;;  %v4002_v10 = vrot.slane %v3995_v24, %v5848_v5  ;;  %v4146_v51 = vcombine.high %v4145_v23, %v4145_v23 }
 0x18d   :  { %v674_v20 = vsel %vm673_vm15, %v5464_v59, %v5465_v31  ;;  %v590_v0 = vsel %vm7221_vm12, %v5459_v62, %v5460_v60  ;;  %vm7163_vm15 = vcmask 637952   ;;  %vm7164_vm12 = vcmask 621568   ;;  %v4584_v62 = vld [vmem:[#allocation2 + $0x38] sm:$0x8] }
 0x18e   :  { %v679_v28 = vsel %vm6682_vm2, %v674_v20, %v678_v1  ;;  %v595_v29 = vsel %vm6661_vm13, %v590_v0, %v594_v58  ;;  %v4358_v19 = vpop.permute.xlu1 %4357  ;;  %v4356_v18 = vpop.permute.xlu0 %4355  ;;  %v4298_v59 = vrot.slane %v5615_v44, %v5848_v5  ;;  %v4153_v60 = vrot.slane %v4145_v23, %v5848_v5  ;;  %v4659_v0 = vld [vmem:[#allocation2 + $0x38] sm:$0x10] }
 0x18f   :  { %680 = vst [vmem:[#allocation2] sm:$0x80] %v679_v28  ;;  %596 = vst [vmem:[#allocation2] sm:$0x40] %v595_v29  ;;  %v4359_v30 = vsel %vm7165_vm5, %v4356_v18, %v4358_v19  ;;  %vm7170_vm5 = vcmask 572416   ;;  %vm2487_vm2 = vcmask 539648   ;;  %vm7224_vm13 = vnez %v7187_v16 }
 0x190   :  { %v4362_v33 = vsel %vm6212_vm10, %v4359_v30, %v4361_v39  ;;  %3863 = vrot.lane.b32.xlu1 %v3860_v41, %s5769_s7  ;;  %3861 = vrot.lane.b32.xlu0 %v3853_v47, %s5769_s7  ;;  %v4299_v63 = vcombine.low %v4298_v59, %v4298_v59  ;;  %v4161_v20 = vcombine.low %v4153_v60, %v4153_v60  ;;  %v4735_v30 = vld [vmem:[#allocation2 + $0x38] sm:$0x20] }
 0x191   :  { %4363 = vst [vmem:[#allocation2 + $0x38] sm:$0x1] %v4362_v33  ;;  %v4313_v19 = vrot.slane %v4298_v59, %v5848_v5 }
 0x192   :  { %v4432_v40 = vpop.permute.xlu1 %4431  ;;  %v4430_v27 = vpop.permute.xlu0 %4429  ;;  %v4306_v18 = vrot.slane %v4299_v63, %v5848_v5 }
 0x193   :  { %v4433_v26 = vsel %vm7163_vm15, %v4430_v27, %v4432_v40  ;;  %vm7166_vm15 = vcmask 605184  }
 0x194   :  { %v4436_v49 = vsel %vm6112_vm8, %v4433_v26, %v4435_v42  ;;  %3937 = vrot.lane.b32.xlu1 %v6542_v38, %s5770_s10  ;;  %3935 = vrot.lane.b32.xlu0 %v6567_v12, %s5770_s10  ;;  %v4160_v12 = vrot.slane %v4146_v51, %v5848_v5  ;;  %v4315_v42 = vcombine.low %v4313_v19, %v4313_v19  ;;  %v4812_v26 = vld [vmem:[#allocation2 + $0x38] sm:$0x40] }
 0x195   :  { %4437 = vst [vmem:[#allocation2 + $0x38] sm:$0x2] %v4436_v49  ;;  %v4314_v40 = vcombine.low %v4306_v18, %v4306_v18 }
 0x196   :  { %v4507_v53 = vpop.permute.xlu1 %4506  ;;  %v4505_v56 = vpop.permute.xlu0 %4504  ;;  %v4931_v32 = vld [vmem:[#allocation2] sm:$0xff]  ;;  %v4162_v1 = vcombine.low %v4160_v12, %v4160_v12 }
 0x197   :  { %v4508_v31 = vsel %vm7164_vm12, %v4505_v56, %v4507_v53  ;;  %4981 = vmatpush1.bf16.msra.mxu0 %v4931_v32  ;;  %5347 = vmatpush1.bf16.msra.mxu1 %v4931_v32  ;;  %vm7167_vm12 = vcmask 588800   ;;  %v1948_v56 = vld [vmem:[#allocation2 + $0x30] sm:$0x1] }
 0x198   :  { %v4511_v38 = vsel %vm6071_vm3, %v4508_v31, %v4510_v52  ;;  %4012 = vrot.lane.b32.xlu1 %v4009_v54, %s5771_s11  ;;  %4010 = vrot.lane.b32.xlu0 %v4002_v10, %s5771_s11 }
 0x199   :  { %4512 = vst [vmem:[#allocation2 + $0x38] sm:$0x4] %v4511_v38  ;;  %v5616_v38 = vld [vmem:[%s7136_s0] ss:$0 sps:$4 sm:$0x33]  }
 0x19a   :  { %v4581_v58 = vpop.permute.xlu1 %4580  ;;  %v4579_v41 = vpop.permute.xlu0 %4578 }
 0x19b   :  { %v4582_v47 = vsel %vm7166_vm15, %v4579_v41, %v4581_v58  ;;  %vm7173_vm15 = vcmask 556032   ;;  %v4447_v41 = vrot.slane %v5616_v38, %v5848_v5 }
 0x19c   :  { %v4585_v14 = vsel %vm6083_vm7, %v4582_v47, %v4584_v62  ;;  %4088 = vrot.lane.b32.xlu1 %v6599_v34, %s5772_s12  ;;  %4086 = vrot.lane.b32.xlu0 %v6603_v17, %s5772_s12 }
 0x19d   :  { %4586 = vst [vmem:[#allocation2 + $0x38] sm:$0x8] %v4585_v14  ;;  %v4455_v19 = vrot.slane %v4447_v41, %v5848_v5 }
 0x19e   :  { %v4656_v39 = vpop.permute.xlu1 %4655  ;;  %v4654_v28 = vpop.permute.xlu0 %4653 }
 0x19f   :  { %v4657_v29 = vsel %vm7167_vm12, %v4654_v28, %v4656_v39  ;;  %vm7222_vm12 = vnez %v7181_v22 }
 0x1a0   :  { %v4660_v34 = vsel %vm6095_vm11, %v4657_v29, %v4659_v0  ;;  %4165 = vrot.lane.b32.xlu1 %v4162_v1, %s5773_s13  ;;  %4163 = vrot.lane.b32.xlu0 %v4161_v20, %s5773_s13  ;;  %v4448_v1 = vcombine.high %v4447_v41, %v4447_v41  ;;  %v2176_v0 = vld [vmem:[#allocation2 + $0x30] sm:$0x8] }
 0x1a1   :  { %4661 = vst [vmem:[#allocation2 + $0x38] sm:$0x10] %v4660_v34  ;;  %v5618_v34 = vld [vmem:[%s7136_s0] ss:$0 sps:$4 sm:$0x33]  }
 0x1a2   :  { %v4732_v33 = vpop.permute.xlu1 %4731  ;;  %v4730_v24 = vpop.permute.xlu0 %4729 }
 0x1a3   :  { %v4733_v23 = vsel %vm7170_vm5, %v4730_v24, %v4732_v33  ;;  %vm7223_vm5 = vnez %v7185_v61 }
 0x1a4   :  { %v4736_v27 = vsel %vm7222_vm12, %v4733_v23, %v4735_v30  ;;  %4241 = vrot.lane.b32.xlu1 %v6603_v17, %s5774_s14  ;;  %4239 = vrot.lane.b32.xlu0 %v6641_v46, %s5774_s14  ;;  %v4888_v17 = vld [vmem:[#allocation2 + $0x38] sm:$0x80]  ;;  %v2254_v30 = vld [vmem:[#allocation2 + $0x30] sm:$0x10] }
 0x1a5   :  { %4737 = vst [vmem:[#allocation2 + $0x38] sm:$0x20] %v4736_v27  ;;  %v4747_v27 = vrot.slane %v5618_v34, %v5848_v5 }
 0x1a6   :  { %v4809_v54 = vpop.permute.xlu1 %4808  ;;  %v4807_v44 = vpop.permute.xlu0 %4806 }
 0x1a7   :  { %v4810_v49 = vsel %vm7173_vm15, %v4807_v44, %v4809_v54  ;;  %vm7225_vm15 = vcmask 654336  }
 0x1a8   :  { %v4813_v10 = vsel %vm7223_vm5, %v4810_v49, %v4812_v26  ;;  %4318 = vrot.lane.b32.xlu1 %v4315_v42, %s5775_s15  ;;  %4316 = vrot.lane.b32.xlu0 %v4314_v40, %s5775_s15  ;;  %v2333_v26 = vld [vmem:[#allocation2 + $0x30] sm:$0x20] }
 0x1a9   :  { %4814 = vst [vmem:[#allocation2 + $0x38] sm:$0x40] %v4813_v10 }
 0x1aa   :  { %v4885_v51 = vpop.permute.xlu1 %4884  ;;  %v4883_v52 = vpop.permute.xlu0 %4882 }
 0x1ab   :  { %v4886_v46 = vsel %vm2487_vm2, %v4883_v52, %v4885_v51  ;;  %v4748_v52 = vcombine.high %v4747_v27, %v4747_v27 }
 0x1ac   :  { %v4889_v53 = vsel %vm7224_vm13, %v4886_v46, %v4888_v17  ;;  %5512 = vrot.lane.b32.xlu1 %v6674_v4, %s5769_s7  ;;  %5507 = vrot.lane.b32.xlu0 %v6678_v6, %s5768_s28  ;;  %v2023_v4 = vld [vmem:[#allocation2 + $0x30] sm:$0x2]  ;;  %v5304_v6 = vld.sshfl [vmem:[%s7136_s0] sm:$0x11 pattern:$0x75316420] }
 0x1ad   :  { %4890 = vst [vmem:[#allocation2 + $0x38] sm:$0x80] %v4889_v53  ;;  %v4522_v29 = vcombine.low %v5304_v6, %v5304_v6  ;;  %v2411_v46 = vld [vmem:[#allocation2 + $0x30] sm:$0x40]  ;;  %s5781_s28 = smov 69  }
 0x1ae   :  { %v1944_v32 = vpop.permute.xlu1 %1943  ;;  %v1942_v31 = vpop.permute.xlu0 %1941 }
 0x1af   :  { %v1946_v59 = vsel %vm7225_vm15, %v1942_v31, %v1944_v32  ;;  %vm7226_vm15 = vcmask 637952   ;;  %v6877_v23 = vrot.slane %v4522_v29, %v5848_v5 }
 0x1b0   :  { %v1949_v12 = vsel %vm6212_vm10, %v1946_v59, %v1948_v56  ;;  %5522 = vrot.lane.b32.xlu1 %v6686_v25, %s5771_s11  ;;  %5517 = vrot.lane.b32.xlu0 %v6691_v21, %s5770_s10  ;;  %v4373_v25 = vcombine.high %v5304_v6, %v5304_v6  ;;  %v2099_v21 = vld [vmem:[#allocation2 + $0x30] sm:$0x4]  ;;  %vm7227_vm10 = vcmask 621568   ;;  %v4900_v59 = vrot.slane %v5619_v13, %v5848_v5 }
 0x1b1   :  { %1950 = vst [vmem:[#allocation2 + $0x30] sm:$0x1] %v1949_v12  ;;  %v4762_v12 = vrot.slane %v4748_v52, %v5848_v5 }
 0x1b2   :  { %v2019_v60 = vpop.permute.xlu1 %2018  ;;  %v2017_v62 = vpop.permute.xlu0 %2016  ;;  %v6854_v55 = vrot.slane %v4373_v25, %v5848_v5  ;;  %v4901_v41 = vcombine.low %v4900_v59, %v4900_v59 }
 0x1b3   :  { %v2021_v58 = vsel %vm7226_vm15, %v2017_v62, %v2019_v60  ;;  %vm1057_vm15 = vcmask 842752  }
 0x1b4   :  { %v2024_v35 = vsel %vm6112_vm8, %v2021_v58, %v2023_v4  ;;  %5532 = vrot.lane.b32.xlu1 %v6701_v43, %s5773_s13  ;;  %5527 = vrot.lane.b32.xlu0 %v6708_v9, %s5772_s12  ;;  %v6857_v43 = vrot.slane %v5304_v6, %v5848_v5  ;;  %v5617_v9 = vld [vmem:[%s7136_s0] ss:$0 sps:$4 sm:$0x33]   ;;  %vm7230_vm8 = vcmask 572416   ;;  %v4687_v22 = vcombine.low %v6854_v55, %v6854_v55  ;;  %s5779_s0 = smov 73  }
 0x1b5   :  { %2025 = vst [vmem:[#allocation2 + $0x30] sm:$0x2] %v2024_v35  ;;  %v4596_v18 = vrot.slane %v5617_v9, %v5848_v5  ;;  %v4755_v4 = vrot.slane %v4747_v27, %v5848_v5  ;;  %v2490_v6 = vld [vmem:[#allocation2 + $0x30] sm:$0x80]  ;;  %v4764_v35 = vcombine.low %v4762_v12, %v4762_v12  ;;  %v4908_v16 = vrot.slane %v4901_v41, %v5848_v5 }
 0x1b6   :  { %v2095_v47 = vpop.permute.xlu1 %2094  ;;  %v2093_v63 = vpop.permute.xlu0 %2092  ;;  %v4686_v31 = vcombine.low %v6857_v43, %v6857_v43 }
 0x1b7   :  { %v2097_v14 = vsel %vm7227_vm10, %v2093_v63, %v2095_v47  ;;  %v4597_v40 = vcombine.low %v4596_v18, %v4596_v18  ;;  %v4611_v10 = vrot.slane %v4596_v18, %v5848_v5  ;;  %v4763_v25 = vcombine.low %v4755_v4, %v4755_v4  ;;  %v3190_v63 = vld [vmem:[#allocation2 + $0x18] sm:$0x1] }
 0x1b8   :  { %v2100_v20 = vsel %vm6071_vm3, %v2097_v14, %v2099_v21  ;;  %5542 = vrot.lane.b32.xlu1 %v6726_v15, %s5775_s15  ;;  %5537 = vrot.lane.b32.xlu0 %v6728_v3, %s5774_s14  ;;  %vm7228_vm3 = vcmask 605184   ;;  %v4462_v15 = vrot.slane %v4448_v1, %v5848_v5  ;;  %v4915_v1 = vrot.slane %v4900_v59, %v5848_v5 }
 0x1b9   :  { %2101 = vst [vmem:[#allocation2 + $0x30] sm:$0x4] %v2100_v20  ;;  %v4604_v51 = vrot.slane %v4597_v40, %v5848_v5  ;;  %v6917_v20 = vshll.u32 %v6857_v43, 16  ;;  %v4916_v29 = vcombine.low %v4908_v16, %v4908_v16  ;;  %vm1136_vm10 = vcmask 826368   ;;  %v3643_v16 = vld [vmem:[#allocation2 + $0x18] sm:$0x40] }
 0x1ba   :  { %v2172_v37 = vpop.permute.xlu1 %2171  ;;  %v2170_v39 = vpop.permute.xlu0 %2169 }
 0x1bb   :  { %v2174_v28 = vsel %vm7228_vm3, %v2170_v39, %v2172_v37  ;;  %v6926_v37 = vshll.u32 %v6854_v55, 16  ;;  %v2206_v18 = vrot.slane %v6917_v20, 5  ;;  %v2363_v13 = vrot.slane %v6917_v20, 3 }
 0x1bc   :  { %v2177_v3 = vsel %vm6083_vm7, %v2174_v28, %v2176_v0  ;;  %4390 = vrot.lane.b32.xlu1 %v6854_v55, %s5776_s21  ;;  %4388 = vrot.lane.b32.xlu0 %v6857_v43, %s5776_s21  ;;  %vm7229_vm7 = vcmask 588800   ;;  %v4839_v0 = vcombine.low %v6877_v23, %v6877_v23  ;;  %v2520_v4 = vrot.slane %v6917_v20, 1 }
 0x1bd   :  { %2178 = vst [vmem:[#allocation2 + $0x30] sm:$0x8] %v2177_v3  ;;  %v2053_v3 = vrot.slane %v6917_v20, 7  ;;  %v2057_v55 = vrot.slane %v6926_v37, 7  ;;  %v2210_v34 = vrot.slane %v6926_v37, 5  ;;  %vm1214_vm3 = vcmask 809984  }
 0x1be   :  { %v2250_v33 = vpop.permute.xlu1 %2249  ;;  %v2248_v45 = vpop.permute.xlu0 %2247 }
 0x1bf   :  { %v2252_v24 = vsel %vm7229_vm7, %v2248_v45, %v2250_v33  ;;  %v2129_v45 = vrot.slane %v6917_v20, 6  ;;  %v5551_v27 = vpack.i.bf16 %v2057_v55, %v2053_v3  ;;  %vm7232_vm7 = vnez %v7211_v11  ;;  %v4942_v3 = vld [vmem:[%s7138_s2 + $0x18] sm:$0xff] }
 0x1c0   :  { %v2255_v42 = vsel %vm6095_vm11, %v2252_v24, %v2254_v30  ;;  %4465 = vrot.lane.b32.xlu1 %v4462_v15, %s5777_s24  ;;  %4463 = vrot.lane.b32.xlu0 %v4455_v19, %s5777_s24  ;;  %vm7231_vm11 = vcmask 556032   ;;  %v4917_v15 = vcombine.low %v4915_v1, %v4915_v1  ;;  %v2133_v24 = vrot.slane %v6926_v37, 6 }
 0x1c1   :  { %2256 = vst [vmem:[#allocation2 + $0x30] sm:$0x10] %v2255_v42 }
 0x1c2   :  { %v2329_v54 = vpop.permute.xlu1 %2328  ;;  %v2327_v44 = vpop.permute.xlu0 %2326 }
 0x1c3   :  { %v2331_v49 = vsel %vm7230_vm8, %v2327_v44, %v2329_v54  ;;  %vm1293_vm8 = vcmask 793600  }
 0x1c4   :  { %v2334_v17 = vsel %vm7222_vm12, %v2331_v49, %v2333_v26  ;;  %4539 = vrot.lane.b32.xlu1 %v6857_v43, %s5778_s26  ;;  %4537 = vrot.lane.b32.xlu0 %v6877_v23, %s5778_s26  ;;  %vm826_vm12 = vcmask 891904   ;;  %v3265_v43 = vld [vmem:[#allocation2 + $0x18] sm:$0x2]  ;;  %v3339_v23 = vld [vmem:[#allocation2 + $0x18] sm:$0x4]  ;;  %v5546_v26 = vpack.i.bf16 %v6926_v37, %v6917_v20  ;;  %v5561_v49 = vpack.i.bf16 %v2210_v34, %v2206_v18 }
 0x1c5   :  { %2335 = vst [vmem:[#allocation2 + $0x30] sm:$0x20] %v2334_v17  ;;  %v2367_v17 = vrot.slane %v6926_v37, 3 }
 0x1c6   :  { %v2407_v53 = vpop.permute.xlu1 %2406  ;;  %v2405_v56 = vpop.permute.xlu0 %2404 }
 0x1c7   :  { %v2409_v32 = vsel %vm7231_vm11, %v2405_v56, %v2407_v53  ;;  %v2288_v53 = vrot.slane %v6926_v37, 4  ;;  %vm7233_vm11 = vnez %v7214_v8 }
 0x1c8   :  { %v2412_v38 = vsel %vm7223_vm5, %v2409_v32, %v2411_v46  ;;  %4614 = vrot.lane.b32.xlu1 %v4611_v10, %s5779_s0  ;;  %4612 = vrot.lane.b32.xlu0 %v4604_v51, %s5779_s0  ;;  %vm749_vm5 = vcmask 908288   ;;  %v5556_v10 = vpack.i.bf16 %v2133_v24, %v2129_v45  ;;  %v3414_v51 = vld [vmem:[#allocation2 + $0x18] sm:$0x8]  ;;  %v2284_v46 = vrot.slane %v6917_v20, 4  ;;  %v829_v24 = vld [vmem:[#allocation2 + $0x10] sm:$0x2] }
 0x1c9   :  { %2413 = vst [vmem:[#allocation2 + $0x30] sm:$0x40] %v2412_v38  ;;  %v5571_v38 = vpack.i.bf16 %v2367_v17, %v2363_v13 }
 0x1ca   :  { %v2486_v60 = vpop.permute.xlu1 %2485  ;;  %v2484_v62 = vpop.permute.xlu0 %2483  ;;  %v5566_v12 = vpack.i.bf16 %v2288_v53, %v2284_v46  ;;  %v905_v53 = vld [vmem:[#allocation2 + $0x10] sm:$0x4] }
 0x1cb   :  { %v2488_v58 = vsel %vm2487_vm2, %v2484_v62, %v2486_v60  ;;  %vm902_vm2 = vcmask 875520   ;;  %v2524_v60 = vrot.slane %v6926_v37, 1  ;;  %v2441_v62 = vrot.slane %v6917_v20, 2 }
 0x1cc   :  { %v2491_v61 = vsel %vm7224_vm13, %v2488_v58, %v2490_v6  ;;  %4690 = vrot.lane.b32.xlu1 %v4687_v22, %s5780_s27  ;;  %4688 = vrot.lane.b32.xlu0 %v4686_v31, %s5780_s27  ;;  %vm979_vm13 = vcmask 859136   ;;  %v2445_v58 = vrot.slane %v6926_v37, 2 }
 0x1cd   :  { %2492 = vst [vmem:[#allocation2 + $0x30] sm:$0x80] %v2491_v61 }
 0x1ce   :  { %v3187_v21 = vpop.permute.xlu1 %3186  ;;  %v3185_v47 = vpop.permute.xlu0 %3184 }
 0x1cf   :  { %v3188_v14 = vsel %vm749_vm5, %v3185_v47, %v3187_v21  ;;  %v5581_v47 = vpack.i.bf16 %v2524_v60, %v2520_v4  ;;  %v1139_v60 = vld [vmem:[#allocation2 + $0x10] sm:$0x20] }
 0x1d0   :  { %v3191_v9 = vsel %vm6561_vm1, %v3188_v14, %v3190_v63  ;;  %4767 = vrot.lane.b32.xlu1 %v4764_v35, %s5781_s28  ;;  %4765 = vrot.lane.b32.xlu0 %v4763_v25, %s5781_s28  ;;  %v3567_v35 = vld [vmem:[#allocation2 + $0x18] sm:$0x20]  ;;  %v5576_v63 = vpack.i.bf16 %v2445_v58, %v2441_v62  ;;  %v1060_v58 = vld [vmem:[#allocation2 + $0x10] sm:$0x10] }
 0x1d1   :  { %3192 = vst [vmem:[#allocation2 + $0x18] sm:$0x1] %v3191_v9 }
 0x1d2   :  { %v3262_v39 = vpop.permute.xlu1 %3261  ;;  %v3260_v5 = vpop.permute.xlu0 %3259 }
 0x1d3   :  { %v3263_v28 = vsel %vm826_vm12, %v3260_v5, %v3262_v39  ;;  %v4939_v5 = vld [vmem:[%s7138_s2] sm:$0xff] }
 0x1d4   :  { %v3266_v19 = vsel %vm6575_vm6, %v3263_v28, %v3265_v43  ;;  %4843 = vrot.lane.b32.xlu1 %v4686_v31, %s5782_s29  ;;  %4841 = vrot.lane.b32.xlu0 %v4839_v0, %s5782_s29  ;;  %v3490_v31 = vld [vmem:[#allocation2 + $0x18] sm:$0x10]  ;;  %v5784_v0 = vmov 0   ;;  %v4940_v43 = vld [vmem:[%s7138_s2 + $0x8] sm:$0xff]  ;;  %v3720_v28 = vld [vmem:[#allocation2 + $0x18] sm:$0x80] }
 0x1d5   :  { %3267 = vst [vmem:[#allocation2 + $0x18] sm:$0x2] %v3266_v19  ;;  %5012 = vmatprep.mubr.bf16.mxu0 %v5784_v0  ;;  %5022 = vmatprep.mubr.bf16.mxu1 %v5784_v0  ;;  %v4941_v19 = vld [vmem:[%s7138_s2 + $0x10] sm:$0xff] }
 0x1d6   :  { %v3336_v30 = vpop.permute.xlu1 %3335  ;;  %v3334_v33 = vpop.permute.xlu0 %3333  ;;  %5586 = vset.pattern.permute.xlu0 %v5784_v0  ;;  %5587 = vset.pattern.permute.xlu1 %v5784_v0 }
 0x1d7   :  { %v3337_v42 = vsel %vm902_vm2, %v3334_v33, %v3336_v30 }
 0x1d8   :  { %v3340_v40 = vsel %vm6592_vm0, %v3337_v42, %v3339_v23  ;;  %4920 = vrot.lane.b32.xlu1 %v4917_v15, %s5783_s30  ;;  %4918 = vrot.lane.b32.xlu0 %v4916_v29, %s5783_s30  ;;  %v752_v42 = vld [vmem:[#allocation2 + $0x10] sm:$0x1] }
 0x1d9   :  { %3341 = vst [vmem:[#allocation2 + $0x18] sm:$0x4] %v3340_v40 }
 0x1da   :  { %v3411_v54 = vpop.permute.xlu1 %3410  ;;  %v3409_v44 = vpop.permute.xlu0 %3408 }
 0x1db   :  { %v3412_v52 = vsel %vm979_vm13, %v3409_v44, %v3411_v54 }
 0x1dc   :  { %v3415_v56 = vsel %vm6613_vm14, %v3412_v52, %v3414_v51  ;;  %5552 = vrot.lane.b32.xlu1 %v5551_v27, %s5777_s24  ;;  %5547 = vrot.lane.b32.xlu0 %v5546_v26, %s5776_s21  ;;  %v982_v52 = vld [vmem:[#allocation2 + $0x10] sm:$0x8] }
 0x1dd   :  { %3416 = vst [vmem:[#allocation2 + $0x18] sm:$0x8] %v3415_v56 }
 0x1de   :  { %v3487_v32 = vpop.permute.xlu1 %3486  ;;  %v3485_v22 = vpop.permute.xlu0 %3484 }
 0x1df   :  { %v3488_v59 = vsel %vm1057_vm15, %v3485_v22, %v3487_v32 }
 0x1e0   :  { %v3491_v6 = vsel %vm6625_vm4, %v3488_v59, %v3490_v31  ;;  %5562 = vrot.lane.b32.xlu1 %v5561_v49, %s5779_s0  ;;  %5557 = vrot.lane.b32.xlu0 %v5556_v10, %s5778_s26 }
 0x1e1   :  { %3492 = vst [vmem:[#allocation2 + $0x18] sm:$0x10] %v3491_v6 }
 0x1e2   :  { %v3564_v41 = vpop.permute.xlu1 %3563  ;;  %v3562_v61 = vpop.permute.xlu0 %3561 }
 0x1e3   :  { %v3565_v25 = vsel %vm1136_vm10, %v3562_v61, %v3564_v41 }
 0x1e4   :  { %v3568_v21 = vsel %vm6647_vm9, %v3565_v25, %v3567_v35  ;;  %5572 = vrot.lane.b32.xlu1 %v5571_v38, %s5781_s28  ;;  %5567 = vrot.lane.b32.xlu0 %v5566_v12, %s5780_s27 }
 0x1e5   :  { %3569 = vst [vmem:[#allocation2 + $0x18] sm:$0x20] %v3568_v21 }
 0x1e6   :  { %v3640_v14 = vpop.permute.xlu1 %3639  ;;  %v3638_v1 = vpop.permute.xlu0 %3637 }
 0x1e7   :  { %v3641_v20 = vsel %vm1214_vm3, %v3638_v1, %v3640_v14 }
 0x1e8   :  { %v3644_v9 = vsel %vm7232_vm7, %v3641_v20, %v3643_v16  ;;  %5582 = vrot.lane.b32.xlu1 %v5581_v47, %s5783_s30  ;;  %5577 = vrot.lane.b32.xlu0 %v5576_v63, %s5782_s29  ;;  %v1296_v16 = vld [vmem:[#allocation2 + $0x10] sm:$0x80] }
 0x1e9   :  { %3645 = vst [vmem:[#allocation2 + $0x18] sm:$0x40] %v3644_v9  ;;  %v1217_v9 = vld [vmem:[#allocation2 + $0x10] sm:$0x40] }
 0x1ea   :  { %v3717_v37 = vpop.permute.xlu1 %3716  ;;  %v3715_v39 = vpop.permute.xlu0 %3714 }
 0x1eb   :  { %v3718_v15 = vsel %vm1293_vm8, %v3715_v39, %v3717_v37 }
 0x1ec   :  { %v3721_v29 = vsel %vm7233_vm11, %v3718_v15, %v3720_v28  ;;  %4945 = vperm.xlu0 %5586, %v4939_v5   ;;  %4950 = vperm.xlu1 %5587, %v4940_v43   ;;  %v3792_v28 = vld [vmem:[#allocation2 + $0x28] sm:$0x1] }
 0x1ed   :  { %3722 = vst [vmem:[#allocation2 + $0x18] sm:$0x80] %v3721_v29 }
 0x1ee   :  { %v5473_v55 = vpop.permute.xlu1 %5472  ;;  %v5468_v18 = vpop.permute.xlu0 %5467 }
 0x1ef   :  { %v5475_v34 = vunpack.i.h.bf16 %v5473_v55  ;;  %v5474_v30 = vunpack.i.l.bf16 %v5473_v55  ;;  %v5470_v33 = vunpack.i.h.bf16 %v5468_v18  ;;  %v5469_v45 = vunpack.i.l.bf16 %v5468_v18  ;;  %v3867_v55 = vld [vmem:[#allocation2 + $0x28] sm:$0x2] }
 0x1f0   :  { %4960 = vperm.xlu0 %5586, %v4942_v3   ;;  %4955 = vperm.xlu1 %5587, %v4941_v19  }
 0x1f1   :  { %v827_v23 = vsel %vm826_vm12, %v5474_v30, %v5475_v34  ;;  %v750_v40 = vsel %vm749_vm5, %v5469_v45, %v5470_v33  ;;  %vm1367_vm5 = vcmask 777216   ;;  %vm1444_vm12 = vcmask 760832  }
 0x1f2   :  { %v830_v27 = vsel %vm6575_vm6, %v827_v23, %v829_v24  ;;  %v753_v26 = vsel %vm6561_vm1, %v750_v40, %v752_v42  ;;  %v5483_v54 = vpop.permute.xlu1 %5482  ;;  %v5478_v44 = vpop.permute.xlu0 %5477  ;;  %v3941_v24 = vld [vmem:[#allocation2 + $0x28] sm:$0x4] }
 0x1f3   :  { %831 = vst [vmem:[#allocation2 + $0x10] sm:$0x2] %v830_v27  ;;  %754 = vst [vmem:[#allocation2 + $0x10] sm:$0x1] %v753_v26  ;;  %v5485_v49 = vunpack.i.h.bf16 %v5483_v54  ;;  %v5484_v10 = vunpack.i.l.bf16 %v5483_v54  ;;  %v5480_v13 = vunpack.i.h.bf16 %v5478_v44  ;;  %v5479_v17 = vunpack.i.l.bf16 %v5478_v44  ;;  %v4016_v26 = vld [vmem:[#allocation2 + $0x28] sm:$0x8] }
 0x1f4   :  { %v4934_v51 = vld [vmem:[#allocation2 + $0x18] sm:$0xff] }
 0x1f5   :  { %v980_v46 = vsel %vm979_vm13, %v5484_v10, %v5485_v49  ;;  %v903_v56 = vsel %vm902_vm2, %v5479_v17, %v5480_v13  ;;  %4982 = vmatprep.subr.bf16.mxu0 %v4934_v51  ;;  %5344 = vmatprep.subr.bf16.mxu1 %v4934_v51  ;;  %vm1520_vm2 = vcmask 744448   ;;  %vm1597_vm13 = vcmask 728064   ;;  %v4092_v13 = vld [vmem:[#allocation2 + $0x28] sm:$0x10] }
 0x1f6   :  { %v983_v32 = vsel %vm6613_vm14, %v980_v46, %v982_v52  ;;  %v906_v22 = vsel %vm6592_vm0, %v903_v56, %v905_v53  ;;  %v5493_v31 = vpop.permute.xlu1 %5492  ;;  %v5488_v59 = vpop.permute.xlu0 %5487  ;;  %v4169_v53 = vld [vmem:[#allocation2 + $0x28] sm:$0x20] }
 0x1f7   :  { %984 = vst [vmem:[#allocation2 + $0x10] sm:$0x8] %v983_v32  ;;  %907 = vst [vmem:[#allocation2 + $0x10] sm:$0x4] %v906_v22  ;;  %v5495_v38 = vunpack.i.h.bf16 %v5493_v31  ;;  %v5494_v12 = vunpack.i.l.bf16 %v5493_v31  ;;  %v5490_v4 = vunpack.i.h.bf16 %v5488_v59  ;;  %v5489_v6 = vunpack.i.l.bf16 %v5488_v59  ;;  %v4245_v59 = vld [vmem:[#allocation2 + $0x28] sm:$0x40] }
 0x1f9   :  { %v1137_v62 = vsel %vm1136_vm10, %v5494_v12, %v5495_v38  ;;  %v1058_v41 = vsel %vm1057_vm15, %v5489_v6, %v5490_v4  ;;  %vm1675_vm15 = vcmask 711680   ;;  %vm1754_vm10 = vcmask 695296  }
 0x1fa   :  { %v1140_v61 = vsel %vm6647_vm9, %v1137_v62, %v1139_v60  ;;  %v1061_v35 = vsel %vm6625_vm4, %v1058_v41, %v1060_v58  ;;  %v5503_v25 = vpop.permute.xlu1 %5502  ;;  %v5498_v21 = vpop.permute.xlu0 %5497  ;;  %v4322_v60 = vld [vmem:[#allocation2 + $0x28] sm:$0x80] }
 0x1fb   :  { %1141 = vst [vmem:[#allocation2 + $0x10] sm:$0x20] %v1140_v61  ;;  %1062 = vst [vmem:[#allocation2 + $0x10] sm:$0x10] %v1061_v35  ;;  %v5505_v47 = vunpack.i.h.bf16 %v5503_v25  ;;  %v5504_v63 = vunpack.i.l.bf16 %v5503_v25  ;;  %v5500_v14 = vunpack.i.h.bf16 %v5498_v21  ;;  %v5499_v1 = vunpack.i.l.bf16 %v5498_v21 }
 0x1fd   :  { %v1294_v20 = vsel %vm1293_vm8, %v5504_v63, %v5505_v47  ;;  %v1215_v0 = vsel %vm1214_vm3, %v5499_v1, %v5500_v14  ;;  %vm1832_vm3 = vcmask 678912   ;;  %vm1911_vm8 = vcmask 662528   ;;  %v1447_v63 = vld [vmem:[#allocation2 + $0x20] sm:$0x2]  ;;  %v1370_v1 = vld [vmem:[#allocation2 + $0x20] sm:$0x1] }
 0x1fe   :  { %v1297_v37 = vsel %vm7233_vm11, %v1294_v20, %v1296_v16  ;;  %v1218_v39 = vsel %vm7232_vm7, %v1215_v0, %v1217_v9  ;;  %v3789_v5 = vpop.permute.xlu1 %3788  ;;  %v3787_v43 = vpop.permute.xlu0 %3786 }
 0x1ff   :  { %1298 = vst [vmem:[#allocation2 + $0x10] sm:$0x80] %v1297_v37  ;;  %1219 = vst [vmem:[#allocation2 + $0x10] sm:$0x40] %v1218_v39  ;;  %v3790_v15 = vsel %vm1367_vm5, %v3787_v43, %v3789_v5 }
 0x200   :  { %v3793_v29 = vsel %vm6561_vm1, %v3790_v15, %v3792_v28 }
 0x201   :  { %3794 = vst [vmem:[#allocation2 + $0x28] sm:$0x1] %v3793_v29  ;;  %v1600_v29 = vld [vmem:[#allocation2 + $0x20] sm:$0x8] }
 0x202   :  { %v3864_v3 = vpop.permute.xlu1 %3863  ;;  %v3862_v19 = vpop.permute.xlu0 %3861 }
 0x203   :  { %v3865_v18 = vsel %vm1444_vm12, %v3862_v19, %v3864_v3  ;;  %v1523_v19 = vld [vmem:[#allocation2 + $0x20] sm:$0x4] }
 0x204   :  { %v3868_v34 = vsel %vm6575_vm6, %v3865_v18, %v3867_v55 }
 0x205   :  { %3869 = vst [vmem:[#allocation2 + $0x28] sm:$0x2] %v3868_v34 }
 0x206   :  { %v3938_v30 = vpop.permute.xlu1 %3937  ;;  %v3936_v33 = vpop.permute.xlu0 %3935  ;;  %v4933_v45 = vld [vmem:[#allocation2 + $0x10] sm:$0xff] }
 0x207   :  { %v3939_v23 = vsel %vm1520_vm2, %v3936_v33, %v3938_v30  ;;  %4983 = vmatpush1.bf16.msra.mxu0 %v4933_v45  ;;  %5348 = vmatpush1.bf16.msra.mxu1 %v4933_v45 }
 0x208   :  { %v3942_v42 = vsel %vm6592_vm0, %v3939_v23, %v3941_v24 }
 0x209   :  { %3943 = vst [vmem:[#allocation2 + $0x28] sm:$0x4] %v3942_v42 }
 0x20a   :  { %v4013_v40 = vpop.permute.xlu1 %4012  ;;  %v4011_v27 = vpop.permute.xlu0 %4010 }
 0x20b   :  { %v4014_v54 = vsel %vm1597_vm13, %v4011_v27, %v4013_v40  ;;  %v1757_v40 = vld [vmem:[#allocation2 + $0x20] sm:$0x20] }
 0x20c   :  { %v4017_v44 = vsel %vm6613_vm14, %v4014_v54, %v4016_v26  ;;  %v1678_v26 = vld [vmem:[#allocation2 + $0x20] sm:$0x10] }
 0x20d   :  { %4018 = vst [vmem:[#allocation2 + $0x28] sm:$0x8] %v4017_v44 }
 0x20e   :  { %v4089_v49 = vpop.permute.xlu1 %4088  ;;  %v4087_v10 = vpop.permute.xlu0 %4086 }
 0x20f   :  { %v4090_v17 = vsel %vm1675_vm15, %v4087_v10, %v4089_v49 }
 0x210   :  { %v4093_v51 = vsel %vm6625_vm4, %v4090_v17, %v4092_v13 }
 0x211   :  { %4094 = vst [vmem:[#allocation2 + $0x28] sm:$0x10] %v4093_v51 }
 0x212   :  { %v4166_v52 = vpop.permute.xlu1 %4165  ;;  %v4164_v46 = vpop.permute.xlu0 %4163 }
 0x213   :  { %v4167_v56 = vsel %vm1754_vm10, %v4164_v46, %v4166_v52 }
 0x214   :  { %v4170_v32 = vsel %vm6647_vm9, %v4167_v56, %v4169_v53  ;;  %v1914_v53 = vld [vmem:[#allocation2 + $0x20] sm:$0x80] }
 0x215   :  { %4171 = vst [vmem:[#allocation2 + $0x28] sm:$0x20] %v4170_v32  ;;  %v1835_v32 = vld [vmem:[#allocation2 + $0x20] sm:$0x40] }
 0x216   :  { %v4242_v22 = vpop.permute.xlu1 %4241  ;;  %v4240_v31 = vpop.permute.xlu0 %4239 }
 0x217   :  { %v4243_v38 = vsel %vm1832_vm3, %v4240_v31, %v4242_v22 }
 0x218   :  { %v4246_v12 = vsel %vm7232_vm7, %v4243_v38, %v4245_v59 }
 0x219   :  { %4247 = vst [vmem:[#allocation2 + $0x28] sm:$0x40] %v4246_v12 }
 0x21a   :  { %v4319_v4 = vpop.permute.xlu1 %4318  ;;  %v4317_v6 = vpop.permute.xlu0 %4316 }
 0x21b   :  { %v4320_v62 = vsel %vm1911_vm8, %v4317_v6, %v4319_v4  ;;  %v4394_v4 = vld [vmem:[#allocation2 + $0x38] sm:$0x1] }
 0x21c   :  { %v4323_v58 = vsel %vm7233_vm11, %v4320_v62, %v4322_v60 }
 0x21d   :  { %4324 = vst [vmem:[#allocation2 + $0x28] sm:$0x80] %v4323_v58 }
 0x21e   :  { %v5513_v41 = vpop.permute.xlu1 %5512  ;;  %v5508_v61 = vpop.permute.xlu0 %5507 }
 0x21f   :  { %v5515_v35 = vunpack.i.h.bf16 %v5513_v41  ;;  %v5514_v25 = vunpack.i.l.bf16 %v5513_v41  ;;  %v5510_v21 = vunpack.i.h.bf16 %v5508_v61  ;;  %v5509_v47 = vunpack.i.l.bf16 %v5508_v61  ;;  %v4469_v41 = vld [vmem:[#allocation2 + $0x38] sm:$0x2] }
 0x221   :  { %v1445_v14 = vsel %vm1444_vm12, %v5514_v25, %v5515_v35  ;;  %v1368_v16 = vsel %vm1367_vm5, %v5509_v47, %v5510_v21  ;;  %vm1985_vm5 = vcmask 646144   ;;  %vm2062_vm12 = vcmask 629760  }
 0x222   :  { %v1448_v20 = vsel %vm6575_vm6, %v1445_v14, %v1447_v63  ;;  %v1371_v9 = vsel %vm6561_vm1, %v1368_v16, %v1370_v1  ;;  %v5523_v0 = vpop.permute.xlu1 %5522  ;;  %v5518_v37 = vpop.permute.xlu0 %5517  ;;  %v4543_v63 = vld [vmem:[#allocation2 + $0x38] sm:$0x4] }
 0x223   :  { %1449 = vst [vmem:[#allocation2 + $0x20] sm:$0x2] %v1448_v20  ;;  %1372 = vst [vmem:[#allocation2 + $0x20] sm:$0x1] %v1371_v9  ;;  %v5525_v39 = vunpack.i.h.bf16 %v5523_v0  ;;  %v5524_v5 = vunpack.i.l.bf16 %v5523_v0  ;;  %v5520_v43 = vunpack.i.h.bf16 %v5518_v37  ;;  %v5519_v28 = vunpack.i.l.bf16 %v5518_v37  ;;  %v4618_v9 = vld [vmem:[#allocation2 + $0x38] sm:$0x8] }
 0x224   :  { %v4936_v15 = vld [vmem:[#allocation2 + $0x28] sm:$0xff] }
 0x225   :  { %v1598_v3 = vsel %vm1597_vm13, %v5524_v5, %v5525_v39  ;;  %v1521_v55 = vsel %vm1520_vm2, %v5519_v28, %v5520_v43  ;;  %4984 = vmatprep.subr.bf16.mxu0 %v4936_v15  ;;  %5345 = vmatprep.subr.bf16.mxu1 %v4936_v15  ;;  %vm2138_vm2 = vcmask 613376   ;;  %vm2215_vm13 = vcmask 596992   ;;  %v4694_v43 = vld [vmem:[#allocation2 + $0x38] sm:$0x10] }
 0x226   :  { %v1601_v18 = vsel %vm6613_vm14, %v1598_v3, %v1600_v29  ;;  %v1524_v34 = vsel %vm6592_vm0, %v1521_v55, %v1523_v19  ;;  %v5533_v30 = vpop.permute.xlu1 %5532  ;;  %v5528_v33 = vpop.permute.xlu0 %5527  ;;  %v4771_v19 = vld [vmem:[#allocation2 + $0x38] sm:$0x20] }
 0x227   :  { %1602 = vst [vmem:[#allocation2 + $0x20] sm:$0x8] %v1601_v18  ;;  %1525 = vst [vmem:[#allocation2 + $0x20] sm:$0x4] %v1524_v34  ;;  %v5535_v45 = vunpack.i.h.bf16 %v5533_v30  ;;  %v5534_v24 = vunpack.i.l.bf16 %v5533_v30  ;;  %v5530_v23 = vunpack.i.h.bf16 %v5528_v33  ;;  %v5529_v42 = vunpack.i.l.bf16 %v5528_v33  ;;  %v4847_v33 = vld [vmem:[#allocation2 + $0x38] sm:$0x40] }
 0x229   :  { %v1755_v27 = vsel %vm1754_vm10, %v5534_v24, %v5535_v45  ;;  %v1676_v54 = vsel %vm1675_vm15, %v5529_v42, %v5530_v23  ;;  %vm2293_vm15 = vcmask 580608   ;;  %vm2372_vm10 = vcmask 564224  }
 0x22a   :  { %v1758_v44 = vsel %vm6647_vm9, %v1755_v27, %v1757_v40  ;;  %v1679_v49 = vsel %vm6625_vm4, %v1676_v54, %v1678_v26  ;;  %v5543_v10 = vpop.permute.xlu1 %5542  ;;  %v5538_v13 = vpop.permute.xlu0 %5537  ;;  %v4924_v40 = vld [vmem:[#allocation2 + $0x38] sm:$0x80] }
 0x22b   :  { %1759 = vst [vmem:[#allocation2 + $0x20] sm:$0x20] %v1758_v44  ;;  %1680 = vst [vmem:[#allocation2 + $0x20] sm:$0x10] %v1679_v49  ;;  %v5545_v17 = vunpack.i.h.bf16 %v5543_v10  ;;  %v5544_v51 = vunpack.i.l.bf16 %v5543_v10  ;;  %v5540_v52 = vunpack.i.h.bf16 %v5538_v13  ;;  %v5539_v46 = vunpack.i.l.bf16 %v5538_v13 }
 0x22d   :  { %v1912_v56 = vsel %vm1911_vm8, %v5544_v51, %v5545_v17  ;;  %v1833_v22 = vsel %vm1832_vm3, %v5539_v46, %v5540_v52  ;;  %vm2450_vm3 = vcmask 547840   ;;  %vm2529_vm8 = vcmask 531456   ;;  %v2065_v52 = vld [vmem:[#allocation2 + $0x30] sm:$0x2]  ;;  %v1988_v46 = vld [vmem:[#allocation2 + $0x30] sm:$0x1] }
 0x22e   :  { %v1915_v31 = vsel %vm7233_vm11, %v1912_v56, %v1914_v53  ;;  %v1836_v59 = vsel %vm7232_vm7, %v1833_v22, %v1835_v32  ;;  %v4391_v38 = vpop.permute.xlu1 %4390  ;;  %v4389_v12 = vpop.permute.xlu0 %4388 }
 0x22f   :  { %1916 = vst [vmem:[#allocation2 + $0x20] sm:$0x80] %v1915_v31  ;;  %1837 = vst [vmem:[#allocation2 + $0x20] sm:$0x40] %v1836_v59  ;;  %v4392_v6 = vsel %vm1985_vm5, %v4389_v12, %v4391_v38 }
 0x230   :  { %v4395_v60 = vsel %vm6561_vm1, %v4392_v6, %v4394_v4 }
 0x231   :  { %4396 = vst [vmem:[#allocation2 + $0x38] sm:$0x1] %v4395_v60 }
 0x232   :  { %v4466_v62 = vpop.permute.xlu1 %4465  ;;  %v4464_v58 = vpop.permute.xlu0 %4463 }
 0x233   :  { %v4467_v61 = vsel %vm2062_vm12, %v4464_v58, %v4466_v62  ;;  %v2218_v62 = vld [vmem:[#allocation2 + $0x30] sm:$0x8]  ;;  %v2141_v58 = vld [vmem:[#allocation2 + $0x30] sm:$0x4] }
 0x234   :  { %v4470_v35 = vsel %vm6575_vm6, %v4467_v61, %v4469_v41 }
 0x235   :  { %4471 = vst [vmem:[#allocation2 + $0x38] sm:$0x2] %v4470_v35 }
 0x236   :  { %v4540_v25 = vpop.permute.xlu1 %4539  ;;  %v4538_v21 = vpop.permute.xlu0 %4537  ;;  %v4935_v47 = vld [vmem:[#allocation2 + $0x20] sm:$0xff] }
 0x237   :  { %v4541_v14 = vsel %vm2138_vm2, %v4538_v21, %v4540_v25  ;;  %4985 = vmatpush1.bf16.msra.mxu0 %v4935_v47  ;;  %5349 = vmatpush1.bf16.msra.mxu1 %v4935_v47 }
 0x238   :  { %v4544_v1 = vsel %vm6592_vm0, %v4541_v14, %v4543_v63 }
 0x239   :  { %4545 = vst [vmem:[#allocation2 + $0x38] sm:$0x4] %v4544_v1  ;;  %v2375_v1 = vld [vmem:[#allocation2 + $0x30] sm:$0x20] }
 0x23a   :  { %v4615_v16 = vpop.permute.xlu1 %4614  ;;  %v4613_v20 = vpop.permute.xlu0 %4612 }
 0x23b   :  { %v4616_v0 = vsel %vm2215_vm13, %v4613_v20, %v4615_v16  ;;  %v2296_v16 = vld [vmem:[#allocation2 + $0x30] sm:$0x10] }
 0x23c   :  { %v4619_v37 = vsel %vm6613_vm14, %v4616_v0, %v4618_v9 }
 0x23d   :  { %4620 = vst [vmem:[#allocation2 + $0x38] sm:$0x8] %v4619_v37 }
 0x23e   :  { %v4691_v39 = vpop.permute.xlu1 %4690  ;;  %v4689_v5 = vpop.permute.xlu0 %4688 }
 0x23f   :  { %v4692_v28 = vsel %vm2293_vm15, %v4689_v5, %v4691_v39 }
 0x240   :  { %v4695_v15 = vsel %vm6625_vm4, %v4692_v28, %v4694_v43 }
 0x241   :  { %4696 = vst [vmem:[#allocation2 + $0x38] sm:$0x10] %v4695_v15  ;;  %v2532_v15 = vld [vmem:[#allocation2 + $0x30] sm:$0x80] }
 0x242   :  { %v4768_v29 = vpop.permute.xlu1 %4767  ;;  %v4766_v3 = vpop.permute.xlu0 %4765 }
 0x243   :  { %v4769_v55 = vsel %vm2372_vm10, %v4766_v3, %v4768_v29  ;;  %v2453_v29 = vld [vmem:[#allocation2 + $0x30] sm:$0x40] }
 0x244   :  { %v4772_v18 = vsel %vm6647_vm9, %v4769_v55, %v4771_v19  ;;  %v5620_v55 = vld [vmem:[#allocation3] sm:$0xff]  }
 0x245   :  { %4773 = vst [vmem:[#allocation2 + $0x38] sm:$0x20] %v4772_v18  ;;  %v5621_v18 = vld [vmem:[#allocation3 + $0x8] sm:$0xff]  }
 0x246   :  { %v4844_v34 = vpop.permute.xlu1 %4843  ;;  %v4842_v30 = vpop.permute.xlu0 %4841 }
 0x247   :  { %v4845_v45 = vsel %vm2450_vm3, %v4842_v30, %v4844_v34 }
 0x248   :  { %v4848_v24 = vsel %vm7232_vm7, %v4845_v45, %v4847_v33 }
 0x249   :  { %4849 = vst [vmem:[#allocation2 + $0x38] sm:$0x40] %v4848_v24 }
 0x24a   :  { %v4921_v23 = vpop.permute.xlu1 %4920  ;;  %v4919_v42 = vpop.permute.xlu0 %4918 }
 0x24b   :  { %v4922_v27 = vsel %vm2529_vm8, %v4919_v42, %v4921_v23 }
 0x24c   :  { %v4925_v26 = vsel %vm7233_vm11, %v4922_v27, %v4924_v40 }
 0x24d   :  { %4926 = vst [vmem:[#allocation2 + $0x38] sm:$0x80] %v4925_v26 }
 0x24e   :  { %v5553_v54 = vpop.permute.xlu1 %5552  ;;  %v5548_v44 = vpop.permute.xlu0 %5547 }
 0x24f   :  { %v5555_v49 = vunpack.i.h.bf16 %v5553_v54  ;;  %v5554_v10 = vunpack.i.l.bf16 %v5553_v54  ;;  %v5550_v13 = vunpack.i.h.bf16 %v5548_v44  ;;  %v5549_v17 = vunpack.i.l.bf16 %v5548_v44 }
 0x251   :  { %v2063_v51 = vsel %vm2062_vm12, %v5554_v10, %v5555_v49  ;;  %v1986_v53 = vsel %vm1985_vm5, %v5549_v17, %v5550_v13 }
 0x252   :  { %v2066_v56 = vsel %vm6575_vm6, %v2063_v51, %v2065_v52  ;;  %v1989_v32 = vsel %vm6561_vm1, %v1986_v53, %v1988_v46  ;;  %v5563_v22 = vpop.permute.xlu1 %5562  ;;  %v5558_v31 = vpop.permute.xlu0 %5557  ;;  %v5041_v46 = vld [vmem:[%s7139_s3] sm:$0xff]  ;;  %vm5786_vm1 = vmmov 0   ;;  %vm5069_vm6 = vcmask 7168  }
 0x253   :  { %2067 = vst [vmem:[#allocation2 + $0x30] sm:$0x2] %v2066_v56  ;;  %1990 = vst [vmem:[#allocation2 + $0x30] sm:$0x1] %v1989_v32  ;;  %v5565_v59 = vunpack.i.h.bf16 %v5563_v22  ;;  %v5564_v38 = vunpack.i.l.bf16 %v5563_v22  ;;  %v5560_v12 = vunpack.i.h.bf16 %v5558_v31  ;;  %v5559_v4 = vunpack.i.l.bf16 %v5558_v31  ;;  %v5042_v31 = vld [vmem:[%s7139_s3 + $0x8] sm:$0xff] }
 0x254   :  { %v4938_v6 = vld [vmem:[#allocation2 + $0x38] sm:$0xff] }
 0x255   :  { %v2216_v60 = vsel %vm2215_vm13, %v5564_v38, %v5565_v59  ;;  %v2139_v41 = vsel %vm2138_vm2, %v5559_v4, %v5560_v12  ;;  %4986 = vmatprep.subr.bf16.mxu0 %v4938_v6  ;;  %5346 = vmatprep.subr.bf16.mxu1 %v4938_v6 }
 0x256   :  { %v2219_v50 = vsel %vm6613_vm14, %v2216_v60, %v2218_v62  ;;  %v2142_v57 = vsel %vm6592_vm0, %v2139_v41, %v2141_v58  ;;  %v5573_v61 = vpop.permute.xlu1 %5572  ;;  %v5568_v35 = vpop.permute.xlu0 %5567  ;;  %v5043_v60 = vld [vmem:[%s7139_s3 + $0x10] sm:$0xff]  ;;  %vm5117_vm14 = vcmask 261120   ;;  %vm5191_vm0 = vcmask 1041408  }
 0x257   :  { %2220 = vst [vmem:[#allocation2 + $0x30] sm:$0x8] %v2219_v50  ;;  %2143 = vst [vmem:[#allocation2 + $0x30] sm:$0x4] %v2142_v57  ;;  %v5575_v25 = vunpack.i.h.bf16 %v5573_v61  ;;  %v5574_v21 = vunpack.i.l.bf16 %v5573_v61  ;;  %v5570_v47 = vunpack.i.h.bf16 %v5568_v35  ;;  %v5569_v63 = vunpack.i.l.bf16 %v5568_v35  ;;  %v5044_v57 = vld [vmem:[%s7139_s3 + $0x18] sm:$0xff] }
 0x259   :  { %v2373_v14 = vsel %vm2372_vm10, %v5574_v21, %v5575_v25  ;;  %v2294_v20 = vsel %vm2293_vm15, %v5569_v63, %v5570_v47  ;;  %v5106_v21 = vld [vmem:[#allocation6] sm:$0xff]  ;;  %v5107_v47 = vld [vmem:[#allocation6 + $0x8] sm:$0xff]  ;;  %v5108_v63 = vld [vmem:[#allocation6 + $0x10] sm:$0xff] }
 0x25a   :  { %v2376_v7 = vsel %vm6647_vm9, %v2373_v14, %v2375_v1  ;;  %v2297_v2 = vsel %vm6625_vm4, %v2294_v20, %v2296_v16  ;;  %v5583_v9 = vpop.permute.xlu1 %5582  ;;  %v5578_v0 = vpop.permute.xlu0 %5577  ;;  %vm4973_vm4 = vcmask 523264   ;;  %v5785_v14 = vmov 0.0|0.0   ;;  %v5109_v16 = vld [vmem:[#allocation6 + $0x18] sm:$0xff] }
 0x25b   :  { %2377 = vst [vmem:[#allocation2 + $0x30] sm:$0x20] %v2376_v7  ;;  %2298 = vst [vmem:[#allocation2 + $0x30] sm:$0x10] %v2297_v2  ;;  %v5585_v37 = vunpack.i.h.bf16 %v5583_v9  ;;  %v5584_v39 = vunpack.i.l.bf16 %v5583_v9  ;;  %v5580_v5 = vunpack.i.h.bf16 %v5578_v0  ;;  %v5579_v43 = vunpack.i.l.bf16 %v5578_v0 }
 0x25c   :  { %v5338_v1 = vpack.c.bf16 %v5107_v47, %v5106_v21  ;;  %v5787_v20 = vmov 0.0   ;;  %v5341_v7 = vpack.c.bf16 %v5109_v16, %v5108_v63 }
 0x25d   :  { %v2530_v28 = vsel %vm2529_vm8, %v5584_v39, %v5585_v37  ;;  %v2451_v3 = vsel %vm2450_vm3, %v5579_v43, %v5580_v5 }
 0x25e   :  { %v2533_v48 = vsel %vm7233_vm11, %v2530_v28, %v2532_v15  ;;  %v2454_v36 = vsel %vm7232_vm7, %v2451_v3, %v2453_v29 }
 0x25f   :  { %2534 = vst [vmem:[#allocation2 + $0x30] sm:$0x80] %v2533_v48  ;;  %2455 = vst [vmem:[#allocation2 + $0x30] sm:$0x40] %v2454_v36 }
 0x266   :  { %v4937_v19 = vld [vmem:[#allocation2 + $0x30] sm:$0xff] }
 0x267   :  { %4987 = vmatpush1.bf16.msra.mxu0 %v4937_v19  ;;  %5350 = vmatpush1.bf16.msra.mxu1 %v4937_v19  ;;  %v5319_v19 = vld [vmem:[%s7141_s5] ss:$0 sm:$0xff]  ;;  %s5686_s5 = scalar_lea.vmem %s5211_s23, 32 }
 0x268   :  { %5337 = vmatprep.subr.bf16.mxu1 %v5785_v14  ;;  %p5687_p2 = scmp.ne.s32.totalorder %s5211_s23, %s5686_s5  ;;  %p5692_p4 = scmp.lt.s32.totalorder %s5686_s5, %s5686_s5 }
 0x26a   :  { %5317 = vmatmul.mubr.msk.bf16.vlgmr.msra.gmra.mrb[0].mxu0 %vm4973_vm4, %v5620_v55  ;;  %5318 = vmatmul.mubr.msk.bf16.vlgmr.msra.gmra.mrb[0].mxu1 %vm4973_vm4, %v5621_v18  ;;  %p5693_p5 = por %p5692_p4, %p5691_p3 }
 0x26b   :  { %v4951_v34 = vpop.permute.xlu1 %4950  ;;  %v4946_v30 = vpop.permute.xlu0 %4945  ;;  %5334 = vmatprep.mubr.msk.f32.mxu1 %vm5786_vm1, %v5787_v20  ;;  %5339 = vmatpush3.bf16.msra.mxu1 %v5338_v1 }
 0x26c   :  { %5340 = vmatprep.subr.bf16.mxu1 %v5785_v14  ;;  %p5694_p6 = pnand %p5693_p5, %p5687_p2 }
 0x26f   :  { %v4956_v33 = vpop.permute.xlu1 %4955  ;;  %v4961_v17 = vpop.permute.xlu0 %4960  ;;  %5342 = vmatpush3.bf16.msra.mxu1 %v5341_v7 }
 0x33d   :  { %v5014_v45 = vpop.f32.mrb[0].mxu0  ;;  %v5024_v24 = vpop.f32.mrb[0].mxu1 }
 0x33e   :  { %v5015_v8 = vadd.f32 %v5014_v45, %v4946_v30  ;;  %v5016_v23 = vpop.f32.mrb[1].mxu0  ;;  %v5026_v42 = vpop.f32.mrb[1].mxu1  ;;  %v5025_v10 = vadd.f32 %v5024_v24, %v4956_v33 }
 0x33f   :  { %v5017_v11 = vadd.f32 %v5016_v23, %v4946_v30  ;;  %v5018_v40 = vpop.f32.mrb[2].mxu0  ;;  %v5028_v27 = vpop.f32.mrb[2].mxu1  ;;  %v5027_v13 = vadd.f32 %v5026_v42, %v4956_v33 }
 0x340   :  { %5622 = vtanh.f32 %v5015_v8  ;;  %v5019_v26 = vadd.f32 %v5018_v40, %v4951_v34  ;;  %v5020_v54 = vpop.f32.mrb[3].mxu0  ;;  %v5030_v44 = vpop.f32.mrb[3].mxu1  ;;  %v5029_v52 = vadd.f32 %v5028_v27, %v4961_v17 }
 0x341   :  { %5624 = vtanh.f32 %v5017_v11  ;;  %v5021_v49 = vadd.f32 %v5020_v54, %v4951_v34  ;;  %v5031_v51 = vadd.f32 %v5030_v44, %v4961_v17 }
 0x342   :  { %5626 = vtanh.f32 %v5019_v26 }
 0x343   :  { %5628 = vtanh.f32 %v5021_v49 }
 0x344   :  { %5630 = vtanh.f32 %v5025_v10 }
 0x345   :  { %5632 = vtanh.f32 %v5027_v13 }
 0x346   :  { %5634 = vtanh.f32 %v5031_v51 }
 0x347   :  { %5636 = vtanh.f32 %v5029_v52 }
 0x34a   :  { %v5623_v53 = vpop.eup %5622 }
 0x34b   :  { %v5625_v56 = vpop.eup %5624  ;;  %v5045_v32 = vadd.f32 %v5623_v53, %v5041_v46 }
 0x34c   :  { %v5057_v22 = vadd.f32 %v5625_v56, %v5041_v46  ;;  %v5627_v59 = vpop.eup %5626 }
 0x34d   :  { %5049 = vmax.xlane.f32.xlu1 %v5045_v32  ;;  %v5629_v38 = vpop.eup %5628  ;;  %v5046_v6 = vadd.f32 %v5627_v59, %v5042_v31 }
 0x34e   :  { %5061 = vmax.xlane.f32.xlu0 %v5057_v22  ;;  %v5058_v12 = vadd.f32 %v5629_v38, %v5042_v31  ;;  %v5631_v4 = vpop.eup %5630 }
 0x34f   :  { %v5633_v62 = vpop.eup %5632  ;;  %v5047_v50 = vadd.f32 %v5631_v4, %v5043_v60 }
 0x350   :  { %v5059_v58 = vadd.f32 %v5633_v62, %v5043_v60  ;;  %v5635_v41 = vpop.eup %5634 }
 0x351   :  { %5063 = vmax.xlane.f32.xlu1 %v5058_v12  ;;  %v5637_v61 = vpop.eup %5636  ;;  %v5060_v35 = vadd.f32 %v5635_v41, %v5044_v57 }
 0x352   :  { %5051 = vmax.xlane.f32.xlu0 %v5046_v6  ;;  %v5048_v25 = vadd.f32 %v5637_v61, %v5044_v57 }
 0x355   :  { %5065 = vmax.xlane.f32.xlu1 %v5059_v58 }
 0x356   :  { %5053 = vmax.xlane.f32.xlu0 %v5047_v50 }
 0x359   :  { %5067 = vmax.xlane.f32.xlu1 %v5060_v35 }
 0x35a   :  { %5055 = vmax.xlane.f32.xlu0 %v5048_v25 }
 0x3da   :  { %v5050_v2 = vpop.xlane.xlu1 %5049 }
 0x3db   :  { %v5062_v9 = vpop.xlane.xlu0 %5061 }
 0x3dc   :  { %v5070_v0 = vsel %vm5069_vm6, %v5050_v2, %v5062_v9 }
 0x3dd   :  { %5074 = vxpose.xlu0.b32.start [1/4] (short) (narrow) %v5070_v0, 8 }
 0x3de   :  { %v5064_v37 = vpop.xlane.xlu1 %5063 }
 0x3df   :  { %v5052_v39 = vpop.xlane.xlu0 %5051 }
 0x3e0   :  { %v5071_v5 = vsel %vm5069_vm6, %v5052_v39, %v5064_v37 }
 0x3e1   :  { %5075 = vxpose.xlu0.b32.cont [2/4] (short) (narrow) %v5071_v5, 8 }
 0x3e2   :  { %v5066_v43 = vpop.xlane.xlu1 %5065 }
 0x3e3   :  { %v5054_v28 = vpop.xlane.xlu0 %5053 }
 0x3e4   :  { %v5072_v15 = vsel %vm5069_vm6, %v5054_v28, %v5066_v43 }
 0x3e5   :  { %5076 = vxpose.xlu0.b32.cont [3/4] (short) (narrow) %v5072_v15, 8 }
 0x3e6   :  { %v5068_v29 = vpop.xlane.xlu1 %5067 }
 0x3e7   :  { %v5056_v3 = vpop.xlane.xlu0 %5055 }
 0x3e8   :  { %v5073_v48 = vsel %vm5069_vm6, %v5056_v3, %v5068_v29 }
 0x3e9   :  { %5077 = vxpose.xlu0.b32.end [4/4] (short) (narrow) %v5073_v48, 8 }
 0x45d   :  { %v5090_v36 = vpop.trf.xlu0 }
 0x45e   :  { %5335 = vmatmul.mubr.msk.f32.vlgmr.msra.gmra.mrb[4].mxu1 %vm5117_vm14, %v5090_v36 }
 0x531   :  { %v5187_v55 = vpop.f32.mrb[4].mxu1 }
 0x532   :  { %v5188_v18 = vadd.f32 %v5319_v19, %v5187_v55  ;;  %v5336_v34 = vpop.f32.mrb[5].mxu1 }
 0x534   :  { %v5192_v30 = vsel %vm5191_vm0, %v5188_v18, -inf }
 0x535   :  { %5193 = vmax.xlane.f32.xlu1 %v5192_v30 }
 0x5c2   :  { %v5194_v33 = vpop.xlane.xlu1 %5193 }
 0x5c3   :  { %v5195_v45 = vsub.f32 %v5188_v18, %v5194_v33 }
 0x5c5   :  { %v5196_v24 = vmul.f32 1.442695, %v5195_v45 }
 0x5c7   :  { %5638 = vpow2.f32 %v5196_v24 }
 0x5d1   :  { %v5639_v8 = vpop.eup %5638 }
 0x5d2   :  { %v5198_v23 = vsel %vm5191_vm0, %v5639_v8, 0.0 }
 0x5d3   :  { %5199 = vadd.xlane.f32.xlu1 %v5198_v23 }
 0x660   :  { %v5200_v42 = vpop.xlane.xlu1 %5199 }
 0x661   :  { %5640 = vrcp.f32 %v5200_v42 }
 0x66b   :  { %v5641_v11 = vpop.eup %5640 }
 0x66c   :  { %v5202_v40 = vmul.f32 %v5641_v11, %v5639_v8 }
 0x66e   :  { %5203 = vst [vmem:[#allocation8] sm:$0x3] %v5202_v40 }
 0x66f   :  { %5697 = shalt.err (!%p5694_p6)
}
 0x670   :  { %s5698_s4 = scalar_lea.hbm %s7142_s6, 32 }
 0x671   :  { %p5699_p7 = scmp.ne.s32.totalorder %s7142_s6, %s5698_s4  ;;  %p5702_p8 = scmp.lt.u32.totalorder %s5698_s4, %s7142_s6 }
 0x673   :  { %p5704_p9 = pnand %p5702_p8, %p5699_p7 }
 0x675   :  { %5707 = shalt.err (!%p5704_p9)
}
 0x676   :  { %5213 = dma.vmem_to_hbm [thread:$0]  %s5211_s23, 32, %s7142_s6, [#allocation5]  }
 0x677   :  { %5712 = dma.done.wait [#allocation5], 32  }
 0x678   :  { %5713 = vsyncadd [#allocation5], 4294967264 }
 0x679   :  { %5217 = vsyncpa [#allocation4], 1 }
 0x67a   :  { %5218 = vsyncpa [#allocation7], 1 }
 0x67b   :  { %5219 = vsyncpa [#allocation5], 1 }

</bundles_post_ra>
